<compile_context>
chip_gen: v6e
topology: v6e:2x2x1
jax: 0.10.0
libtpu: 0.0.40
codegen_flags: <defaults>
</compile_context>

<pallas_src>
import functools

import jax
import jax.numpy as jnp
import numpy as np
from jax.experimental import pallas as pl
from jax.experimental.pallas import tpu as pltpu

# HIGHEST (6-pass bf16) keeps the 1e-4 check bit-safe; Precision.HIGH (3-pass) is the
# cheaper option once its error budget has been verified on hardware.
MATMUL_PRECISION = jax.lax.Precision.HIGHEST


def _round_up(x, m):
    return (x + m - 1) // m * m


def iaf_fused_kernel(z_ref, w1_ref, b1_ref, w2_ref, b2_ref, w3_ref, b3_ref, out_ref):
    """Fused MADE (3 masked linears + LeakyReLU(0.001)) + IAF sigmoid gating.

    z_ref  : (TB, P)      z padded to P = round_up(dim, 128) lanes
    w1_ref : (P,  H1)     masks already folded into the weights
    w2_ref : (H1, H2)
    w3_ref : (H2, 2*P)    cols [0:dim] = shift weights, cols [P:P+dim] = scale weights
    out_ref: (TB, P)      lanes [0:dim] hold x = z*gate + (1-gate)*shift
    """
    slope = jnp.float32(0.001)
    z = z_ref[...]

    # Hidden layer 1 + LeakyReLU(0.001).
    h = jnp.dot(z, w1_ref[...], precision=MATMUL_PRECISION,
                preferred_element_type=jnp.float32) + b1_ref[...]
    h = jnp.where(h >= 0, h, slope * h)

    # Hidden layer 2 + LeakyReLU(0.001).
    h = jnp.dot(h, w2_ref[...], precision=MATMUL_PRECISION,
                preferred_element_type=jnp.float32) + b2_ref[...]
    h = jnp.where(h >= 0, h, slope * h)

    # Single merged output matmul; shift / scale halves are vreg-aligned at lane P.
    out3 = jnp.dot(h, w3_ref[...], precision=MATMUL_PRECISION,
                   preferred_element_type=jnp.float32) + b3_ref[...]
    half = out3.shape[-1] // 2
    shift = out3[:, :half]
    scale = out3[:, half:]

    gate = 1.0 / (1.0 + jnp.exp(-scale))      # sigmoid (EUP exp, exact divide)
    # x = z*gate + (1-gate)*shift, rewritten with one fewer multiply.
    out_ref[...] = shift + gate * (z - shift)


def make_iaf_forward(weights, biases, masks):
    """Construction-time preprocessing (done ONCE, host-side numpy) + jitted forward.

    weights: [ (dim, h1), (h1, h2), (h2, 2*dim) ]  stored as (in, out) == W.T
    biases:  [ (h1,), (h2,), (2*dim,) ]
    masks:   [ (dim, h1), (h1, h2), (h2, 2*dim) ]  0/1 MADE masks
    """
    LANE, SUB = 128, 8

    w1 = np.asarray(weights[0], np.float32) * np.asarray(masks[0], np.float32)
    w2 = np.asarray(weights[1], np.float32) * np.asarray(masks[1], np.float32)
    w3 = np.asarray(weights[2], np.float32) * np.asarray(masks[2], np.float32)
    b1 = np.asarray(biases[0], np.float32)
    b2 = np.asarray(biases[1], np.float32)
    b3 = np.asarray(biases[2], np.float32)

    dim = w1.shape[0]
    h1, h2 = w1.shape[1], w2.shape[1]
    P = _round_up(dim, LANE)            # padded feature width (shift/scale alignment)
    H1 = _round_up(h1, LANE)
    H2 = _round_up(h2, LANE)

    # Zero-padding is exact: pad biases/weight rows are 0 and LeakyReLU(0) = 0.
    w1p = np.zeros((P, H1), np.float32); w1p[:dim, :h1] = w1
    b1p = np.zeros((1, H1), np.float32); b1p[0, :h1] = b1
    w2p = np.zeros((H1, H2), np.float32); w2p[:h1, :h2] = w2
    b2p = np.zeros((1, H2), np.float32); b2p[0, :h2] = b2
    # Final layer: shift weights at cols [0:dim], scale weights at cols [P:P+dim].
    w3p = np.zeros((H2, 2 * P), np.float32)
    w3p[:h2, :dim] = w3[:, :dim]
    w3p[:h2, P:P + dim] = w3[:, dim:]
    b3p = np.zeros((1, 2 * P), np.float32)
    b3p[0, :dim] = b3[:dim]
    b3p[0, P:P + dim] = b3[dim:]

    params = tuple(jnp.asarray(a) for a in (w1p, b1p, w2p, b2p, w3p, b3p))
    param_specs = [pl.BlockSpec(p.shape, lambda i: (0, 0)) for p in params]

    @jax.jit
    def forward(z):
        squeeze = (z.ndim == 1)
        z2 = z[None, :] if squeeze else z
        B = z2.shape[0]

        # Batch tiling: sublane-align, and with >=128 rows use TB=64 so the grid has
        # >=2 "parallel" blocks (both TensorCores on v7x; harmless on v5e/v6e).
        Bp8 = _round_up(max(B, 1), SUB)
        TB = Bp8 if Bp8 < 128 else 64
        Bp = _round_up(Bp8, TB)

        zp = jnp.pad(z2.astype(jnp.float32), ((0, Bp - B), (0, P - dim)))

        out = pl.pallas_call(
            iaf_fused_kernel,
            out_shape=jax.ShapeDtypeStruct((Bp, P), jnp.float32),
            grid=(Bp // TB,),
            in_specs=[pl.BlockSpec((TB, P), lambda i: (i, 0))] + param_specs,
            out_specs=pl.BlockSpec((TB, P), lambda i: (i, 0)),
            compiler_params=pltpu.CompilerParams(
                dimension_semantics=("parallel",)),
        )(zp, *params)

        x = out[:B, :dim]
        return x[0] if squeeze else x

    return forward


def made_masks(nin, hidden_sizes, nout, natural_ordering=False, seed=0):
    """Exact mirror of MADE.update_masks (num_masks=1). Returns (in, out) 0/1 masks."""
    L = len(hidden_sizes)
    rng = np.random.RandomState(seed)
    m = {}
    m[-1] = np.arange(nin) if natural_ordering else rng.permutation(nin)
    for l in range(L):
        m[l] = rng.randint(m[l - 1].min(), nin - 1, size=hidden_sizes[l])
    masks = [m[l - 1][:, None] <= m[l][None, :] for l in range(L)]
    masks.append(m[L - 1][:, None] < m[-1][None, :])
    if nout > nin:
        k = int(nout / nin)
        masks[-1] = np.concatenate([masks[-1]] * k, axis=1)
    return [mk.astype(np.float32) for mk in masks]


if __name__ == "__main__":
    key = jax.random.PRNGKey(0)

    dim = 32                  # flow dimension
    h_sizes = [250, 250]      # IAF default MADE hidden sizes
    nout = 2 * dim
    B = 128                   # batch of independent flow evaluations

    # MADE autoregressive masks (host-side numpy, identical to the reference).
    masks = made_masks(dim, h_sizes, nout)

    # Deterministic Linear-style init: uniform(+-1/sqrt(fan_in)), weights as (in, out).
    sizes = [dim] + h_sizes + [nout]
    keys = jax.random.split(key, 2 * len(sizes) - 1)
    weights, biases = [], []
    for l, (fan_in, fan_out) in enumerate(zip(sizes[:-1], sizes[1:])):
        bound = 1.0 / float(np.sqrt(fan_in))
        weights.append(jax.random.uniform(keys[2 * l], (fan_in, fan_out),
                                          jnp.float32, -bound, bound))
        biases.append(jax.random.uniform(keys[2 * l + 1], (fan_out,),
                                         jnp.float32, -bound, bound))
    z = jax.random.normal(keys[-1], (B, dim), dtype=jnp.float32)

    # Build once (folds masks, pads, packs shift/scale), then call.
    iaf = make_iaf_forward(weights, biases, masks)
    x = jax.block_until_ready(iaf(z))          # batched rows
    x1 = jax.block_until_ready(iaf(z[0]))      # original 1-D z signature

    # Float64 numpy reference of the exact PyTorch IAF.forward math.
    def leaky(v):
        return np.where(v >= 0, v, 0.001 * v)

    Wn = [np.asarray(w, np.float64) * np.asarray(m, np.float64)
          for w, m in zip(weights, masks)]
    bn = [np.asarray(b_, np.float64) for b_ in biases]
    zn = np.asarray(z, np.float64)
    h = leaky(zn @ Wn[0] + bn[0])
    h = leaky(h @ Wn[1] + bn[1])
    out_ref = h @ Wn[2] + bn[2]
    shift_ref, scale_ref = out_ref[:, :dim], out_ref[:, dim:]
    gate_ref = 1.0 / (1.0 + np.exp(-scale_ref))
    expected = zn * gate_ref + (1.0 - gate_ref) * shift_ref

    # TODO(synk): IAF.log_det() (sum of log(gate)) is a separate method, not part of
    # forward(); it can be emitted from the same fused kernel as a second output.
    assert x.shape == (B, dim) and x.dtype == jnp.float32
    assert x1.shape == (dim,) and x1.dtype == jnp.float32
    assert np.allclose(np.asarray(x, np.float64), expected, atol=1e-4, rtol=1e-4), \
        "batched forward mismatch vs reference"
    assert np.allclose(np.asarray(x1, np.float64), expected[0], atol=1e-4, rtol=1e-4), \
        "1-D forward mismatch vs reference"

    print("KERNEL_OK")
</pallas_src>

<mosaic_0001>
module attributes {stable_mosaic.version = 11 : i64} {
  func.func @iaf_fused_kernel(%arg0: i32, %arg1: memref<64x128xf32, #tpu.memory_space<vmem>>, %arg2: memref<128x256xf32, #tpu.memory_space<vmem>>, %arg3: memref<1x256xf32, #tpu.memory_space<vmem>>, %arg4: memref<256x256xf32, #tpu.memory_space<vmem>>, %arg5: memref<1x256xf32, #tpu.memory_space<vmem>>, %arg6: memref<256x256xf32, #tpu.memory_space<vmem>>, %arg7: memref<1x256xf32, #tpu.memory_space<vmem>>, %arg8: memref<64x128xf32, #tpu.memory_space<vmem>>) attributes {dimension_semantics = [#tpu.dimension_semantics<parallel>], iteration_bounds = array<i64: 2>, scalar_prefetch = 0 : i64, scratch_operands = 0 : i64, tpu.core_type = #tpu.core_type<tc>, window_params = [{transform_indices = @transform_0, window_bounds = array<i64: 64, 128>}, {pipeline_mode = #tpu.pipeline_mode<synchronous>, transform_indices = @transform_1, window_bounds = array<i64: 128, 256>}, {pipeline_mode = #tpu.pipeline_mode<synchronous>, transform_indices = @transform_2, window_bounds = array<i64: 1, 256>}, {pipeline_mode = #tpu.pipeline_mode<synchronous>, transform_indices = @transform_3, window_bounds = array<i64: 256, 256>}, {pipeline_mode = #tpu.pipeline_mode<synchronous>, transform_indices = @transform_4, window_bounds = array<i64: 1, 256>}, {pipeline_mode = #tpu.pipeline_mode<synchronous>, transform_indices = @transform_5, window_bounds = array<i64: 256, 256>}, {pipeline_mode = #tpu.pipeline_mode<synchronous>, transform_indices = @transform_6, window_bounds = array<i64: 1, 256>}, {transform_indices = @transform_7, window_bounds = array<i64: 64, 128>}]} {
    %c0 = arith.constant 0 : index
    %c0_0 = arith.constant 0 : index
    %0 = vector.load %arg1[%c0, %c0_0] : memref<64x128xf32, #tpu.memory_space<vmem>>, vector<64x128xf32>
    %c0_1 = arith.constant 0 : index
    %c0_2 = arith.constant 0 : index
    %1 = vector.load %arg2[%c0_1, %c0_2] : memref<128x256xf32, #tpu.memory_space<vmem>>, vector<128x256xf32>
    %cst = arith.constant dense<0.000000e+00> : vector<64x256xf32>
    %2 = tpu.matmul %0, %1, %cst {dimension_numbers = #tpu.dot_dimension_numbers<[1], [0], [0], [1], [0, 0, 1, 1], [], []>, precision = #tpu.contract_precision<fp32>} : vector<64x128xf32>, vector<128x256xf32>, vector<64x256xf32> -> vector<64x256xf32>
    %c0_3 = arith.constant 0 : index
    %c0_4 = arith.constant 0 : index
    %3 = vector.load %arg3[%c0_3, %c0_4] : memref<1x256xf32, #tpu.memory_space<vmem>>, vector<1x256xf32>
    %4 = vector.broadcast %3 : vector<1x256xf32> to vector<64x256xf32>
    %5 = arith.addf %2, %4 : vector<64x256xf32>
    %cst_5 = arith.constant 0.000000e+00 : f32
    %6 = vector.broadcast %cst_5 : f32 to vector<64x256xf32>
    %7 = arith.cmpf oge, %5, %6 : vector<64x256xf32>
    %cst_6 = arith.constant 1.000000e-03 : f32
    %8 = vector.broadcast %cst_6 : f32 to vector<64x256xf32>
    %9 = arith.mulf %8, %5 : vector<64x256xf32>
    %10 = arith.select %7, %5, %9 : vector<64x256xi1>, vector<64x256xf32>
    %c0_7 = arith.constant 0 : index
    %c0_8 = arith.constant 0 : index
    %11 = vector.load %arg4[%c0_7, %c0_8] : memref<256x256xf32, #tpu.memory_space<vmem>>, vector<256x256xf32>
    %cst_9 = arith.constant dense<0.000000e+00> : vector<64x256xf32>
    %12 = tpu.matmul %10, %11, %cst_9 {dimension_numbers = #tpu.dot_dimension_numbers<[1], [0], [0], [1], [0, 0, 1, 1], [], []>, precision = #tpu.contract_precision<fp32>} : vector<64x256xf32>, vector<256x256xf32>, vector<64x256xf32> -> vector<64x256xf32>
    %c0_10 = arith.constant 0 : index
    %c0_11 = arith.constant 0 : index
    %13 = vector.load %arg5[%c0_10, %c0_11] : memref<1x256xf32, #tpu.memory_space<vmem>>, vector<1x256xf32>
    %14 = vector.broadcast %13 : vector<1x256xf32> to vector<64x256xf32>
    %15 = arith.addf %12, %14 : vector<64x256xf32>
    %cst_12 = arith.constant 0.000000e+00 : f32
    %16 = vector.broadcast %cst_12 : f32 to vector<64x256xf32>
    %17 = arith.cmpf oge, %15, %16 : vector<64x256xf32>
    %cst_13 = arith.constant 1.000000e-03 : f32
    %18 = vector.broadcast %cst_13 : f32 to vector<64x256xf32>
    %19 = arith.mulf %18, %15 : vector<64x256xf32>
    %20 = arith.select %17, %15, %19 : vector<64x256xi1>, vector<64x256xf32>
    %c0_14 = arith.constant 0 : index
    %c0_15 = arith.constant 0 : index
    %21 = vector.load %arg6[%c0_14, %c0_15] : memref<256x256xf32, #tpu.memory_space<vmem>>, vector<256x256xf32>
    %cst_16 = arith.constant dense<0.000000e+00> : vector<64x256xf32>
    %22 = tpu.matmul %20, %21, %cst_16 {dimension_numbers = #tpu.dot_dimension_numbers<[1], [0], [0], [1], [0, 0, 1, 1], [], []>, precision = #tpu.contract_precision<fp32>} : vector<64x256xf32>, vector<256x256xf32>, vector<64x256xf32> -> vector<64x256xf32>
    %c0_17 = arith.constant 0 : index
    %c0_18 = arith.constant 0 : index
    %23 = vector.load %arg7[%c0_17, %c0_18] : memref<1x256xf32, #tpu.memory_space<vmem>>, vector<1x256xf32>
    %24 = vector.broadcast %23 : vector<1x256xf32> to vector<64x256xf32>
    %25 = arith.addf %22, %24 : vector<64x256xf32>
    %26 = vector.extract_strided_slice %25 {offsets = [0, 0], sizes = [64, 128], strides = [1, 1]} : vector<64x256xf32> to vector<64x128xf32>
    %27 = vector.extract_strided_slice %25 {offsets = [0, 128], sizes = [64, 128], strides = [1, 1]} : vector<64x256xf32> to vector<64x128xf32>
    %cst_19 = arith.constant 0.000000e+00 : f32
    %28 = vector.broadcast %cst_19 : f32 to vector<64x128xf32>
    %29 = arith.subf %28, %27 : vector<64x128xf32>
    %30 = math.exp %29 : vector<64x128xf32>
    %cst_20 = arith.constant 1.000000e+00 : f32
    %31 = vector.broadcast %cst_20 : f32 to vector<64x128xf32>
    %32 = arith.addf %31, %30 : vector<64x128xf32>
    %cst_21 = arith.constant 1.000000e+00 : f32
    %33 = vector.broadcast %cst_21 : f32 to vector<64x128xf32>
    %34 = arith.divf %33, %32 : vector<64x128xf32>
    %35 = arith.subf %0, %26 : vector<64x128xf32>
    %36 = arith.mulf %34, %35 : vector<64x128xf32>
    %37 = arith.addf %26, %36 : vector<64x128xf32>
    %c0_22 = arith.constant 0 : index
    %c0_23 = arith.constant 0 : index
    %38 = vector.load %arg8[%c0_22, %c0_23] : memref<64x128xf32, #tpu.memory_space<vmem>>, vector<64x128xf32>
    tpu.vector_store %arg8[%c0_22, %c0_23], %37 {strides = array<i32>} : memref<64x128xf32, #tpu.memory_space<vmem>>, vector<64x128xf32>,
    return
  }
  func.func @transform_0(%arg0: i32) -> (i32, i32) {
    %c0_i32 = arith.constant 0 : i32
    %c0_i32_0 = arith.constant 0 : i32
    return %arg0, %c0_i32 : i32, i32
  }
  func.func @transform_1(%arg0: i32) -> (i32, i32) {
    %c0_i32 = arith.constant 0 : i32
    %c0_i32_0 = arith.constant 0 : i32
    %c0_i32_1 = arith.constant 0 : i32
    return %c0_i32, %c0_i32_0 : i32, i32
  }
  func.func @transform_2(%arg0: i32) -> (i32, i32) {
    %c0_i32 = arith.constant 0 : i32
    %c0_i32_0 = arith.constant 0 : i32
    %c0_i32_1 = arith.constant 0 : i32
    return %c0_i32, %c0_i32_0 : i32, i32
  }
  func.func @transform_3(%arg0: i32) -> (i32, i32) {
    %c0_i32 = arith.constant 0 : i32
    %c0_i32_0 = arith.constant 0 : i32
    %c0_i32_1 = arith.constant 0 : i32
    return %c0_i32, %c0_i32_0 : i32, i32
  }
  func.func @transform_4(%arg0: i32) -> (i32, i32) {
    %c0_i32 = arith.constant 0 : i32
    %c0_i32_0 = arith.constant 0 : i32
    %c0_i32_1 = arith.constant 0 : i32
    return %c0_i32, %c0_i32_0 : i32, i32
  }
  func.func @transform_5(%arg0: i32) -> (i32, i32) {
    %c0_i32 = arith.constant 0 : i32
    %c0_i32_0 = arith.constant 0 : i32
    %c0_i32_1 = arith.constant 0 : i32
    return %c0_i32, %c0_i32_0 : i32, i32
  }
  func.func @transform_6(%arg0: i32) -> (i32, i32) {
    %c0_i32 = arith.constant 0 : i32
    %c0_i32_0 = arith.constant 0 : i32
    %c0_i32_1 = arith.constant 0 : i32
    return %c0_i32, %c0_i32_0 : i32, i32
  }
  func.func @transform_7(%arg0: i32) -> (i32, i32) {
    %c0_i32 = arith.constant 0 : i32
    %c0_i32_0 = arith.constant 0 : i32
    return %arg0, %c0_i32 : i32, i32
  }
}

</mosaic_0001>

<bundles_post_ra>
// kernel: forward.1
= control target key start
LH: loop header
LB: loop body
LE: loop exit
PB: predicated region body
PF: predicated region fallthrough
CT: control target
= control target key end

     0   :  { %12 = vsyncpa [#allocation3], 0  ;;  %s9530_s0 = inlined_call_operand.vmem [shape: f32[128,128], index: 0, kind: input, shape index: {}]   ;;  %s9531_s1 = inlined_call_operand.vmem [shape: f32[128,256], index: 1, kind: input, shape index: {}]   ;;  %s9532_s2 = inlined_call_operand.vmem [shape: f32[1,256], index: 2, kind: input, shape index: {}]   ;;  %s9533_s3 = inlined_call_operand.hbm [shape: f32[256,256], index: 3, kind: input, shape index: {}]   ;;  %s9534_s4 = inlined_call_operand.vmem [shape: f32[1,256], index: 4, kind: input, shape index: {}]   ;;  %s9535_s5 = inlined_call_operand.hbm [shape: f32[256,256], index: 5, kind: input, shape index: {}]   ;;  %s9536_s6 = inlined_call_operand.vmem [shape: f32[1,256], index: 6, kind: input, shape index: {}]   ;;  %s9537_s7 = inlined_call_operand.vmem [shape: f32[128,128], index: 7, kind: output, shape index: {}]  }
   0x1   :  { %13 = vsyncpa [#allocation5], 0  ;;  %s5604_s24 = smov 0  }
   0x2 LB: > { %s5404_s25 = sadd.s32 4294967295, %s5557_s24   ;;  %p5406_p0 = scmp.ge.s32.totalorder %s5557_s24, 1  ;;  %s5557_s24 = sphi %s5604_s24, %s19_s24  }
   0x3   : > { %p202_p1 = scmp.lt.s32.totalorder %s5557_s24, 3  ;;  %s5559_s26 = smov [#allocation2]  }
   0x4   : > { %s220_s27 = sshll.u32 %s5559_s26, 4  ;;  %p5618_p3 = scmp.eq.s32.totalorder %s5404_s25, 0  ;;  %s221_s27 = int_to_ptr.vmem [resolvable:$true] %s220_s27 }
   0x5   : > { %p5612_p2 = pnand %p5406_p0, %p202_p1  ;;  %s5560_s30 = smov [#allocation4]  }
   0x6   : > { %s236_s8 = sshll.u32 %s5560_s30, 4  ;;  %s5502_s10 = scalar_lea.vmem %s221_s27, 8192  ;;  %s237_s8 = int_to_ptr.vmem [resolvable:$true] %s236_s8 }
   0x7   : > { %p5427_p4 = pneg %p5612_p2  ;;  %p5503_p7 = scmp.ne.s32.totalorder %s221_s27, %s5502_s10 }
   0x8   : > { %p5510_p10 = scmp.lt.s32.totalorder %s221_s27, %s221_s27  ;;  %p5511_p11 = scmp.lt.s32.totalorder %s5502_s10, %s5502_s10 }
   0x9   : > { %p5626_p5 = pnand %p5618_p3, %p5427_p4 }
   0xa   : > { %p5512_p12 = por %p5511_p11, %p5510_p10 }
   0xb   : > { %p5493_p6 = pneg %p5626_p5 }
   0xd   : > { %p5505_p8 = pnand %p5503_p7, %p5493_p6 }
   0xf   : > { %p5506_p9 = pneg %p5505_p8 }
  0x11   : > { %p5513_p13 = pnand %p5512_p12, %p5506_p9 }
  0x13   : > { %5516 = shalt.err (!%p5513_p13)
}
  0x14   : > { %s5561_s11 = smov 256   ;;  %s5562_s12 = smov 16  }
  0x15   : > { %5430 = dma.hbm_to_vmem [thread:$0]  (!%p5626_p5), %s9533_s3, 8192, %s221_s27, [#allocation3], %s5561_s11, %s5561_s11, %s5562_s12  }
  0x16   : > { %s5528_s15 = scalar_lea.vmem %s237_s8, 8192  ;;  %p5536_p7 = scmp.lt.s32.totalorder %s237_s8, %s237_s8 }
  0x17   : > { %p5529_p0 = scmp.ne.s32.totalorder %s237_s8, %s5528_s15  ;;  %p5537_p8 = scmp.lt.s32.totalorder %s5528_s15, %s5528_s15 }
  0x19   : > { %p5531_p1 = pnand %p5529_p0, %p5493_p6  ;;  %p5538_p10 = por %p5537_p8, %p5536_p7 }
  0x1b   : > { %p5532_p4 = pneg %p5531_p1 }
  0x1d   : > { %p5539_p9 = pnand %p5538_p10, %p5532_p4 }
  0x1f   : > { %5542 = shalt.err (!%p5539_p9)
}
  0x20   : > { %5433 = dma.hbm_to_vmem [thread:$0]  (!%p5626_p5), %s9535_s5, 8192, %s237_s8, [#allocation5], %s5561_s11, %s5561_s11, %s5562_s12  }
  0x21   : > { %264 = sbr.rel (%p5612_p2) target bundleno = 1192 (0x4a8), region = 48 }
  0x26   : > { %5548 = dma.done.wait (%p5618_p3), [#allocation3], 8192  }
  0x27   : > { %5550 = vsyncadd (%p5618_p3), [#allocation3], 4294959104 }
  0x28   : > { %5552 = dma.done.wait (%p5618_p3), [#allocation5], 8192  }
  0x29   : > { %5554 = vsyncadd (%p5618_p3), [#allocation5], 4294959104  ;;  %v9552_v0 = vmov 0.0   ;;  %v351_v1 = vld [vmem:[%s9531_s1 + $0xf8] sm:$0xff]  ;;  %v350_v2 = vld [vmem:[%s9531_s1 + $0xf0] sm:$0xff]  ;;  %s5847_s16 = sshll.u32 %s5404_s25, 3 }
  0x2a   : > { %460 = vmatprep.mubr.f32.mxu0 %v9552_v0  ;;  %773 = vmatprep.mubr.f32.mxu1 %v9552_v0  ;;  %v349_v3 = vld [vmem:[%s9531_s1 + $0xe8] sm:$0xff]  ;;  %v5669_v4 = vand.u32 4294901760, %v351_v1  ;;  %v5671_v5 = vand.u32 4294901760, %v350_v2  ;;  %v348_v7 = vld [vmem:[%s9531_s1 + $0xe0] sm:$0xff]  ;;  %v347_v8 = vld [vmem:[%s9531_s1 + $0xd8] sm:$0xff]  ;;  %p301_p2 = scmp.lt.s32.totalorder %s5847_s16, 15 }
  0x2b   : > { %v5673_v6 = vand.u32 4294901760, %v349_v3  ;;  %v346_v9 = vld [vmem:[%s9531_s1 + $0xd0] sm:$0xff]  ;;  %v5684_v10 = vand.u32 4294901760, %v348_v7  ;;  %v5686_v11 = vand.u32 4294901760, %v347_v8  ;;  %v345_v13 = vld [vmem:[%s9531_s1 + $0xc8] sm:$0xff]  ;;  %v344_v14 = vld [vmem:[%s9531_s1 + $0xc0] sm:$0xff] }
  0x2c   : > { %v5688_v12 = vand.u32 4294901760, %v346_v9  ;;  %v5699_v15 = vld [vmem:[%s9531_s1 + $0xb8] sm:$0xff]  ;;  %365 = vmatprep.subr.mxu0 %v5669_v4  ;;  %v5702_v16 = vand.u32 4294901760, %v345_v13  ;;  %v5704_v17 = vand.u32 4294901760, %v344_v14  ;;  %v5710_v19 = vsub.f32 %v351_v1, %v5669_v4  ;;  %v5715_v20 = vld [vmem:[%s9531_s1 + $0xb0] sm:$0xff]  ;;  %v5720_v21 = vld [vmem:[%s9531_s1 + $0xa8] sm:$0xff] }
  0x2d   : > { %v5707_v18 = vand.u32 4294901760, %v5699_v15  ;;  %v5725_v22 = vld [vmem:[%s9531_s1 + $0xa0] sm:$0xff]  ;;  %367 = vmatpush1.msra.mxu0 %v5671_v5  ;;  %v5729_v23 = vand.u32 4294901760, %v5715_v20  ;;  %v5732_v24 = vsub.f32 %v350_v2, %v5671_v5  ;;  %v5735_v25 = vand.u32 4294901760, %v5720_v21  ;;  %v5743_v27 = vld [vmem:[%s9531_s1 + $0x98] sm:$0xff]  ;;  %v5748_v28 = vld [vmem:[%s9531_s1 + $0x90] sm:$0xff] }
  0x2e   : > { %10348 = vst [vmem:[#allocation8_spill] sm:$0xff] %v5710_v19  ;;  %v5738_v26 = vsub.f32 %v349_v3, %v5673_v6  ;;  %v5753_v29 = vld [vmem:[%s9531_s1 + $0x88] sm:$0xff]  ;;  %369 = vmatprep.subr.mxu0 %v5673_v6  ;;  %v9551_v30 = vand.u32 4294901760, %v5710_v19  ;;  %v5758_v31 = vand.u32 4294901760, %v5725_v22  ;;  %v5761_v32 = vsub.f32 %v348_v7, %v5684_v10  ;;  %v5778_v38 = vld [vmem:[%s9531_s1 + $0x80] sm:$0xff]  ;;  %v5805_v47 = vld [vmem:[%s9531_s1 + $0x78] sm:$0xff] }
  0x2f   : > { %v5764_v33 = vand.u32 4294901760, %v5743_v27  ;;  %371 = vmatpush1.msra.mxu0 %v5684_v10  ;;  %v9549_v34 = vand.u32 4294901760, %v5732_v24  ;;  %v5770_v36 = vsub.f32 %v347_v8, %v5686_v11  ;;  %v5773_v37 = vand.u32 4294901760, %v5748_v28  ;;  %v5818_v52 = vld [vmem:[%s9531_s1 + $0x70] sm:$0xff]  ;;  %v5828_v57 = vld [vmem:[%s9531_s1 + $0x68] sm:$0xff]  ;;  %v5843_v62 = vld [vmem:[%s9531_s1 + $0x60] sm:$0xff] }
  0x30   : > { %10349 = vst [vmem:[#allocation9_spill] sm:$0xff] %v5758_v31  ;;  %v9548_v35 = vand.u32 4294901760, %v5738_v26  ;;  %373 = vmatprep.subr.mxu0 %v5686_v11  ;;  %v552_v39 = vsub.f32 %v5710_v19, %v9551_v30  ;;  %v9546_v40 = vand.u32 4294901760, %v5761_v32  ;;  %v5786_v41 = vsub.f32 %v346_v9, %v5688_v12  ;;  %v5863_v7 = vld [vmem:[%s9531_s1 + $0x58] sm:$0xff]  ;;  %s11447_s16 = smov (!%p301_p2, %s5847_s16), 15 }
  0x31   : > { %10350 = vst [vmem:[#allocation10_spill] sm:$0xff] %v5764_v33  ;;  %10351 = vst [vmem:[#allocation11_spill] sm:$0xff] %v5773_v37  ;;  %v5789_v42 = vand.u32 4294901760, %v5753_v29  ;;  %375 = vmatpush1.msra.mxu0 %v5688_v12  ;;  %v558_v43 = vsub.f32 %v5732_v24, %v9549_v34  ;;  %v9544_v45 = vand.u32 4294901760, %v5770_v36  ;;  %v5800_v46 = vsub.f32 %v345_v13, %v5702_v16  ;;  %v6005_v30 = vld [vmem:[%s9531_s1 + $0x18] sm:$0xff]  ;;  %s5414_s13 = sshll.u32 %s11447_s16, 3 }
  0x32   : > { %v564_v44 = vsub.f32 %v5738_v26, %v9548_v35  ;;  %377 = vmatprep.subr.mxu0 %v5702_v16  ;;  %v553_v48 = vand.u32 4294901760, %v552_v39  ;;  %v570_v49 = vsub.f32 %v5761_v32, %v9546_v40  ;;  %v9543_v50 = vand.u32 4294901760, %v5786_v41  ;;  %v5978_v40 = vld [vmem:[%s9531_s1 + $0x28] sm:$0xff]  ;;  %s6055_s20 = scalar_lea.vmem %s9530_s0, %s5414_s13  ;;  %s9487_s10 = scalar_lea.vmem %s9537_s7, %s5414_s13 }
  0x33   : > { %10352 = vst [vmem:[#allocation12_spill] sm:$0xff] %v5789_v42  ;;  %v5813_v51 = vand.u32 4294901760, %v5778_v38  ;;  %379 = vmatpush1.msra.mxu0 %v5704_v17  ;;  %v559_v53 = vand.u32 4294901760, %v558_v43  ;;  %v576_v55 = vsub.f32 %v5770_v36, %v9544_v45  ;;  %v9542_v56 = vand.u32 4294901760, %v5800_v46  ;;  %v5962_v45 = vld [vmem:[%s9531_s1 + $0x30] sm:$0xff] }
  0x34   : > { %v565_v54 = vand.u32 4294901760, %v564_v44  ;;  %381 = vmatprep.subr.mxu0 %v5707_v18  ;;  %554 = vmatprep.subr.mxu1 %v553_v48  ;;  %v571_v58 = vand.u32 4294901760, %v570_v49  ;;  %v582_v59 = vsub.f32 %v5786_v41, %v9543_v50  ;;  %v5835_v60 = vsub.f32 %v344_v14, %v5704_v17 }
  0x35   : > { %10353 = vst [vmem:[#allocation13_spill] sm:$0xff] %v5813_v51  ;;  %v5838_v61 = vand.u32 4294901760, %v5805_v47  ;;  %383 = vmatpush1.msra.mxu0 %v5729_v23  ;;  %560 = vmatpush1.msra.mxu1 %v559_v53  ;;  %v577_v63 = vand.u32 4294901760, %v576_v55  ;;  %v588_v1 = vsub.f32 %v5800_v46, %v9542_v56  ;;  %v5855_v2 = vsub.f32 %v5699_v15, %v5707_v18  ;;  %v5877_v15 = vld [vmem:[%s9531_s1 + $0x50] sm:$0xff] }
  0x36   : > { %v5858_v3 = vand.u32 4294901760, %v5818_v52  ;;  %385 = vmatprep.subr.mxu0 %v5735_v25  ;;  %566 = vmatprep.subr.mxu1 %v565_v54  ;;  %v583_v8 = vand.u32 4294901760, %v582_v59  ;;  %v9539_v9 = vand.u32 4294901760, %v5835_v60  ;;  %v5869_v13 = vsub.f32 %v5715_v20, %v5729_v23  ;;  %v5904_v54 = vld [vmem:[%s9531_s1 + $0x48] sm:$0xff] }
  0x37   : > { %10354 = vst [vmem:[#allocation14_spill] sm:$0xff] %v5838_v61  ;;  %v5872_v14 = vand.u32 4294901760, %v5828_v57  ;;  %387 = vmatpush1.msra.mxu0 %v5758_v31  ;;  %572 = vmatpush1.msra.mxu1 %v571_v58  ;;  %v589_v39 = vand.u32 4294901760, %v588_v1  ;;  %v9538_v43 = vand.u32 4294901760, %v5855_v2  ;;  %v5883_v44 = vsub.f32 %v5720_v21, %v5735_v25 }
  0x38   : > { %10355 = vst [vmem:[#allocation15_spill] sm:$0xff] %v5858_v3  ;;  %v5886_v20 = vand.u32 4294901760, %v5843_v62  ;;  %389 = vmatprep.subr.mxu0 %v5764_v33  ;;  %578 = vmatprep.subr.mxu1 %v577_v63  ;;  %v594_v48 = vsub.f32 %v5835_v60, %v9539_v9  ;;  %v9540_v49 = vand.u32 4294901760, %v5869_v13  ;;  %v5896_v53 = vsub.f32 %v5725_v22, %v5758_v31 }
  0x39   : > { %10356 = vst [vmem:[#allocation16_spill] sm:$0xff] %v5872_v14  ;;  %v5899_v21 = vand.u32 4294901760, %v5863_v7  ;;  %391 = vmatpush1.msra.mxu0 %v5773_v37  ;;  %584 = vmatpush1.msra.mxu1 %v583_v8  ;;  %v600_v55 = vsub.f32 %v5855_v2, %v9538_v43  ;;  %v9541_v58 = vand.u32 4294901760, %v5883_v44  ;;  %v5913_v22 = vsub.f32 %v5743_v27, %v5764_v33  ;;  %v5930_v27 = vld [vmem:[%s9531_s1 + $0x40] sm:$0xff] }
  0x3a   : > { %10357 = vst [vmem:[#allocation17_spill] sm:$0xff] %v5886_v20  ;;  %v5916_v59 = vand.u32 4294901760, %v5877_v15  ;;  %393 = vmatprep.subr.mxu0 %v5789_v42  ;;  %590 = vmatprep.subr.mxu1 %v589_v39  ;;  %v595_v63 = vand.u32 4294901760, %v594_v48  ;;  %v606_v1 = vsub.f32 %v5869_v13, %v9540_v49  ;;  %v9545_v8 = vand.u32 4294901760, %v5896_v53 }
  0x3b   : > { %10358 = vst [vmem:[#allocation18_spill] sm:$0xff] %v5899_v21  ;;  %v5925_v43 = vsub.f32 %v5748_v28, %v5773_v37  ;;  %395 = vmatpush1.msra.mxu0 %v5813_v51  ;;  %v601_v9 = vand.u32 4294901760, %v600_v55  ;;  %v612_v39 = vsub.f32 %v5883_v44, %v9541_v58  ;;  %v9547_v48 = vand.u32 4294901760, %v5913_v22  ;;  %v5943_v28 = vld [vmem:[%s9531_s1 + $0x38] sm:$0xff] }
  0x3c   : > { %10359 = vst [vmem:[#allocation19_spill] sm:$0xff] %v5916_v59  ;;  %v5938_v49 = vand.u32 4294901760, %v5904_v54  ;;  %596 = vmatpush1.msra.mxu1 %v595_v63  ;;  %397 = vmatprep.subr.mxu0 %v5838_v61  ;;  %v607_v55 = vand.u32 4294901760, %v606_v1  ;;  %v618_v58 = vsub.f32 %v5896_v53, %v9545_v8  ;;  %v5957_v50 = vsub.f32 %v5753_v29, %v5789_v42 }
  0x3d   : > { %v9550_v56 = vand.u32 4294901760, %v5925_v43  ;;  %602 = vmatprep.subr.mxu1 %v601_v9  ;;  %399 = vmatpush1.msra.mxu0 %v5858_v3  ;;  %v613_v63 = vand.u32 4294901760, %v612_v39  ;;  %v624_v1 = vsub.f32 %v5913_v22, %v9547_v48  ;;  %v5969_v8 = vand.u32 4294901760, %v5930_v27 }
  0x3e   : > { %10360 = vst [vmem:[#allocation20_spill] sm:$0xff] %v5938_v49  ;;  %v5973_v29 = vsub.f32 %v5778_v38, %v5813_v51  ;;  %608 = vmatpush1.msra.mxu1 %v607_v55  ;;  %401 = vmatprep.subr.mxu0 %v5872_v14  ;;  %v619_v9 = vand.u32 4294901760, %v618_v58  ;;  %v9554_v48 = vand.u32 4294901760, %v5957_v50  ;;  %v5986_v35 = vand.u32 4294901760, %v5943_v28  ;;  %v5991_v38 = vld [vmem:[%s9531_s1 + $0x20] sm:$0xff] }
  0x3f   : > { %10361 = vst [vmem:[#allocation21_spill] sm:$0xff] %v5969_v8  ;;  %v630_v39 = vsub.f32 %v5925_v43, %v9550_v56  ;;  %614 = vmatprep.subr.mxu1 %v613_v63  ;;  %403 = vmatpush1.msra.mxu0 %v5886_v20  ;;  %v625_v55 = vand.u32 4294901760, %v624_v1  ;;  %v5997_v34 = vsub.f32 %v5805_v47, %v5838_v61  ;;  %v6000_v56 = vand.u32 4294901760, %v5962_v45 }
  0x40   : > { %10362 = vst [vmem:[#allocation22_spill] sm:$0xff] %v5986_v35  ;;  %v9557_v58 = vand.u32 4294901760, %v5973_v29  ;;  %620 = vmatpush1.msra.mxu1 %v619_v9  ;;  %405 = vmatprep.subr.mxu0 %v5899_v21  ;;  %v636_v1 = vsub.f32 %v5957_v50, %v9554_v48  ;;  %v6014_v47 = vsub.f32 %v5818_v52, %v5858_v3  ;;  %v6017_v0 = vand.u32 4294901760, %v5978_v40  ;;  %v6034_v3 = vld [vmem:[%s9531_s1 + $0x10] sm:$0xff] }
  0x41   : > { %10363 = vst [vmem:[#allocation23_spill] sm:$0xff] %v6000_v56  ;;  %v631_v63 = vand.u32 4294901760, %v630_v39  ;;  %626 = vmatprep.subr.mxu1 %v625_v55  ;;  %407 = vmatpush1.msra.mxu0 %v5916_v59  ;;  %v6026_v48 = vsub.f32 %v5828_v57, %v5872_v14  ;;  %v6029_v52 = vand.u32 4294901760, %v5991_v38  ;;  %v6040_v39 = vsub.f32 %v5843_v62, %v5886_v20  ;;  %v6048_v14 = vld [vmem:[%s9531_s1 + $0x8] sm:$0xff] }
  0x42   : > { %10364 = vst [vmem:[#allocation24_spill] sm:$0xff] %v6017_v0  ;;  %v642_v9 = vsub.f32 %v5973_v29, %v9557_v58  ;;  %409 = vmatprep.subr.mxu0 %v5938_v49  ;;  %v637_v55 = vand.u32 4294901760, %v636_v1  ;;  %v6043_v57 = vand.u32 4294901760, %v6005_v30  ;;  %v10367_v62 = vand.u32 4294901760, %v5997_v34 }
  0x43   : > { %10365 = vst [vmem:[#allocation25_spill] sm:$0xff] %v6029_v52  ;;  %632 = vmatpush1.msra.mxu1 %v631_v63  ;;  %411 = vmatpush1.msra.mxu0 %v5969_v8  ;;  %v9576_v58 = vand.u32 4294901760, %v6026_v48  ;;  %v6064_v20 = vsub.f32 %v5863_v7, %v5899_v21  ;;  %v10369_v61 = vand.u32 4294901760, %v6014_v47  ;;  %v6072_v42 = vand.u32 4294901760, %v6034_v3  ;;  %v6081_v7 = vld [vmem:[%s9531_s1] sm:$0xff] }
  0x44   : > { %10366 = vst [vmem:[#allocation26_spill] sm:$0xff] %v6043_v57  ;;  %v643_v63 = vand.u32 4294901760, %v642_v9  ;;  %v648_v1 = vsub.f32 %v5997_v34, %v10367_v62  ;;  %638 = vmatprep.subr.mxu1 %v637_v55  ;;  %413 = vmatprep.subr.mxu0 %v5986_v35  ;;  %v6076_v62 = vsub.f32 %v5877_v15, %v5916_v59  ;;  %v6089_v21 = vand.u32 4294901760, %v6048_v14  ;;  %v312_v15 = vld [vmem:[%s6055_s20] sm:$0xff] }
  0x45   : > { %10368 = vst [vmem:[#allocation27_spill] sm:$0xff] %v6064_v20  ;;  %v654_v51 = vsub.f32 %v6014_v47, %v10369_v61  ;;  %10370 = vst [vmem:[#allocation28_spill] sm:$0xff] %v6072_v42  ;;  %415 = vmatpush1.msra.mxu0 %v6000_v56  ;;  %v660_v61 = vsub.f32 %v6026_v48, %v9576_v58  ;;  %v9581_v9 = vand.u32 4294901760, %v6064_v20  ;;  %v10372_v37 = vand.u32 4294901760, %v6040_v39 }
  0x46   : > { %644 = vmatpush1.msra.mxu1 %v643_v63  ;;  %v649_v55 = vand.u32 4294901760, %v648_v1  ;;  %10371 = vst [vmem:[#allocation29_spill] sm:$0xff] %v6089_v21  ;;  %417 = vmatprep.subr.mxu0 %v6017_v0  ;;  %v6099_v33 = vsub.f32 %v5904_v54, %v5938_v49  ;;  %v6106_v31 = vand.u32 4294901760, %v6081_v7  ;;  %v10374_v54 = vand.u32 4294901760, %v6076_v62 }
  0x47   : > { %v655_v59 = vand.u32 4294901760, %v654_v51  ;;  %v666_v63 = vsub.f32 %v6040_v39, %v10372_v37  ;;  %v661_v58 = vand.u32 4294901760, %v660_v61  ;;  %419 = vmatpush1.msra.mxu0 %v6029_v52  ;;  %v672_v51 = vsub.f32 %v6064_v20, %v9581_v9 }
  0x48   : > { %650 = vmatprep.subr.mxu1 %v649_v55  ;;  %10373 = vst [vmem:[#allocation30_spill] sm:$0xff] %v6106_v31  ;;  %v6110_v37 = vsub.f32 %v5930_v27, %v5969_v8  ;;  %421 = vmatprep.subr.mxu0 %v6043_v57  ;;  %v678_v55 = vsub.f32 %v6076_v62, %v10374_v54  ;;  %v9584_v61 = vand.u32 4294901760, %v6099_v33  ;;  %v6117_v49 = vand.u32 4294901760, %v312_v15 }
  0x49   : > { %656 = vmatpush1.msra.mxu1 %v655_v59  ;;  %v667_v1 = vand.u32 4294901760, %v666_v63  ;;  %v673_v9 = vand.u32 4294901760, %v672_v51  ;;  %423 = vmatpush1.msra.mxu0 %v6072_v42  ;;  %v6123_v59 = vsub.f32 %v5943_v28, %v5986_v35  ;;  %v6127_v27 = vsub.f32 %v5962_v45, %v6000_v56  ;;  %v313_v63 = vld [vmem:[%s6055_s20 + $0x8] sm:$0xff]  ;;  %v314_v35 = vld [vmem:[%s6055_s20 + $0x10] sm:$0xff] }
  0x4a   : > { %10375 = vst [vmem:[#allocation31_spill] sm:$0xff] %v6117_v49  ;;  %662 = vmatprep.subr.mxu1 %v661_v58  ;;  %v9587_v20 = vand.u32 4294901760, %v6110_v37  ;;  %v679_v54 = vand.u32 4294901760, %v678_v55  ;;  %425 = vmatprep.subr.mxu0 %v6089_v21  ;;  %v684_v58 = vsub.f32 %v6099_v33, %v9584_v61  ;;  %v6135_v51 = vsub.f32 %v312_v15, %v6117_v49 }
  0x4b   : > { %668 = vmatpush1.msra.mxu1 %v667_v1  ;;  %v6139_v28 = vsub.f32 %v5978_v40, %v6017_v0  ;;  %427 = vmatpush1.msra.mxu0 %v6106_v31  ;;  %v9592_v1 = vand.u32 4294901760, %v6123_v59  ;;  %v6149_v61 = vsub.f32 %v5991_v38, %v6029_v52  ;;  %v6154_v0 = vand.u32 4294901760, %v313_v63 }
  0x4c   : > { %10376 = vst [vmem:[#allocation32_spill] sm:$0xff] %v6135_v51  ;;  %674 = vmatprep.subr.mxu1 %v673_v9  ;;  %v690_v45 = vsub.f32 %v6110_v37, %v9587_v20  ;;  %v685_v15 = vand.u32 4294901760, %v684_v58  ;;  %v9594_v40 = vand.u32 4294901760, %v6135_v51  ;;  %832 = vmatprep.subr.mxu0 %v5710_v19  ;;  %v10378_v38 = vand.u32 4294901760, %v6127_v27 }
  0x4d   : > { %680 = vmatpush1.msra.mxu1 %v679_v54  ;;  %10377 = vst [vmem:[#allocation33_spill] sm:$0xff] %v6154_v0  ;;  %v696_v55 = vsub.f32 %v6123_v59, %v9592_v1  ;;  %v10379_v52 = vand.u32 4294901760, %v6139_v28  ;;  %v6170_v56 = vsub.f32 %v313_v63, %v6154_v0  ;;  %v6174_v1 = vsub.f32 %v6005_v30, %v6043_v57  ;;  %v316_v57 = vld [vmem:[%s6055_s20 + $0x20] sm:$0xff] }
  0x4e   : > { %v691_v20 = vand.u32 4294901760, %v690_v45  ;;  %v702_v54 = vsub.f32 %v6127_v27, %v10378_v38  ;;  %686 = vmatprep.subr.mxu1 %v685_v15  ;;  %v464_v9 = vsub.f32 %v6135_v51, %v9594_v40  ;;  %v10381_v15 = vand.u32 4294901760, %v6149_v61 }
  0x4f   : > { %v708_v45 = vsub.f32 %v6139_v28, %v10379_v52  ;;  %10380 = vst [vmem:[#allocation34_spill] sm:$0xff] %v6174_v1  ;;  %v697_v38 = vand.u32 4294901760, %v696_v55  ;;  %v6181_v40 = vsub.f32 %v6034_v3, %v6072_v42  ;;  %v315_v52 = vld [vmem:[%s6055_s20 + $0x18] sm:$0xff]  ;;  %v9604_v8 = vand.u32 4294901760, %v6170_v56 }
  0x50   : > { %692 = vmatpush1.msra.mxu1 %v691_v20  ;;  %v703_v58 = vand.u32 4294901760, %v702_v54  ;;  %v714_v19 = vsub.f32 %v6149_v61, %v10381_v15  ;;  %v465_v51 = vand.u32 4294901760, %v464_v9  ;;  %v9603_v30 = vand.u32 4294901760, %v6174_v1 }
  0x51   : > { %10382 = vst [vmem:[#allocation35_spill] sm:$0xff] %v6181_v40  ;;  %v709_v63 = vand.u32 4294901760, %v708_v45  ;;  %698 = vmatprep.subr.mxu1 %v697_v38  ;;  %v9607_v55 = vand.u32 4294901760, %v6181_v40  ;;  %v6191_v54 = vsub.f32 %v6048_v14, %v6089_v21  ;;  %v6195_v3 = vsub.f32 %v6081_v7, %v6106_v31 }
  0x52   : > { %v715_v20 = vand.u32 4294901760, %v714_v19  ;;  %466 = vmatmul.mubr.f32.vlgmr.msra.gmra.mxu0 %v465_v51  ;;  %704 = vmatpush1.msra.mxu1 %v703_v58  ;;  %v475_v9 = vsub.f32 %v6170_v56, %v9604_v8  ;;  %v720_v19 = vsub.f32 %v6174_v1, %v9603_v30  ;;  %v6203_v45 = vand.u32 4294901760, %v314_v35 }
  0x53   : > { %10383 = vst [vmem:[#allocation36_spill] sm:$0xff] %v6191_v54  ;;  %10384 = vst [vmem:[#allocation37_spill] sm:$0xff] %v6195_v3  ;;  %v6205_v38 = vand.u32 4294901760, %v315_v52  ;;  %835 = vmatpush1.msra.mxu0 %v5732_v24  ;;  %710 = vmatprep.subr.mxu1 %v709_v63  ;;  %v726_v14 = vsub.f32 %v6181_v40, %v9607_v55  ;;  %v9612_v7 = vand.u32 4294901760, %v6191_v54  ;;  %v6213_v58 = vand.u32 4294901760, %v316_v57 }
  0x54   : > { %10385 = vst [vmem:[#allocation38_spill] sm:$0xff] %v6203_v45  ;;  %838 = vmatprep.subr.mxu0 %v5738_v26  ;;  %v10388_v15 = vmov 0.0   ;;  %v476_v30 = vand.u32 4294901760, %v475_v9  ;;  %v721_v8 = vand.u32 4294901760, %v720_v19  ;;  %v6218_v31 = vsub.f32 %v314_v35, %v6203_v45  ;;  %716 = vmatpush1.msra.mxu1 %v715_v20 }
  0x55   : > { %10386 = vst [vmem:[#allocation39_spill] sm:$0xff] %v6205_v38  ;;  %10387 = vst [vmem:[#allocation40_spill] sm:$0xff] %v6213_v58  ;;  %471 = vmatprep.mubr.f32.mxu0 %v10388_v15  ;;  %v6221_v63 = vsub.f32 %v315_v52, %v6205_v38  ;;  %841 = vmatpush1.msra.mxu0 %v5761_v32  ;;  %v727_v55 = vand.u32 4294901760, %v726_v14  ;;  %v732_v51 = vsub.f32 %v6191_v54, %v9612_v7  ;;  %v317_v52 = vld [vmem:[%s6055_s20 + $0x28] sm:$0xff] }
  0x56   : > { %v10389_v21 = vand.u32 4294901760, %v6195_v3  ;;  %477 = vmatmul.mubr.f32.gmra.mxu0 %v476_v30  ;;  %722 = vmatprep.subr.mxu1 %v721_v8  ;;  %v9616_v35 = vand.u32 4294901760, %v6218_v31  ;;  %v6235_v14 = vsub.f32 %v316_v57, %v6213_v58 }
  0x57   : > { %v9615_v9 = vand.u32 4294901760, %v6221_v63  ;;  %844 = vmatprep.subr.mxu0 %v5770_v36  ;;  %728 = vmatpush1.msra.mxu1 %v727_v55  ;;  %v733_v20 = vand.u32 4294901760, %v732_v51  ;;  %v318_v55 = vld [vmem:[%s6055_s20 + $0x30] sm:$0xff] }
  0x58   : > { %v738_v42 = vsub.f32 %v6195_v3, %v10389_v21  ;;  %847 = vmatpush1.msra.mxu0 %v5786_v41  ;;  %482 = vmatprep.mubr.f32.mxu0 %v10388_v15  ;;  %v486_v21 = vsub.f32 %v6218_v31, %v9616_v35  ;;  %v9613_v30 = vand.u32 4294901760, %v6235_v14  ;;  %v10395_v35 = vld [vmem:[#allocation10_spill] sm:$0xff] }
  0x59   : > { %734 = vmatprep.subr.mxu1 %v733_v20  ;;  %850 = vmatprep.subr.mxu0 %v5800_v46  ;;  %v497_v8 = vsub.f32 %v6221_v63, %v9615_v9  ;;  %v10393_v9 = vld [vmem:[#allocation9_spill] sm:$0xff] }
  0x5a   : > { %v739_v19 = vand.u32 4294901760, %v738_v42  ;;  %v6246_v42 = vand.u32 4294901760, %v317_v52  ;;  %853 = vmatpush1.msra.mxu0 %v5835_v60  ;;  %v487_v57 = vand.u32 4294901760, %v486_v21  ;;  %v6266_v21 = vand.u32 4294901760, %v318_v55 }
  0x5b   : > { %856 = vmatprep.subr.mxu0 %v5855_v2  ;;  %v498_v51 = vand.u32 4294901760, %v497_v8  ;;  %v319_v8 = vld [vmem:[%s6055_s20 + $0x38] sm:$0xff] }
  0x5c   : > { %10390 = vst [vmem:[#allocation41_spill] sm:$0xff] %v6246_v42  ;;  %740 = vmatpush1.msra.mxu1 %v739_v19  ;;  %488 = vmatmul.mubr.f32.gmra.mxu0 %v487_v57  ;;  %v6257_v20 = vsub.f32 %v317_v52, %v6246_v42  ;;  %v508_v19 = vsub.f32 %v6235_v14, %v9613_v30  ;;  %10391 = vst [vmem:[#allocation42_spill] sm:$0xff] %v6266_v21  ;;  %v6287_v30 = vand.u32 4294901760, %v319_v8 }
  0x5d   : > { %775 = vmatmul.mubr.f32.vlgmr.msra.gmra.mxu1 %v6117_v49  ;;  %1024 = vmatprep.subr.mxu1 %v5669_v4  ;;  %v6278_v7 = vsub.f32 %v318_v55, %v6266_v21  ;;  %v10400_v49 = vld [vmem:[#allocation15_spill] sm:$0xff] }
  0x5e   : > { %859 = vmatpush1.msra.mxu0 %v5869_v13  ;;  %1026 = vmatpush1.msra.mxu1 %v5671_v5  ;;  %v9614_v52 = vand.u32 4294901760, %v6257_v20  ;;  %v509_v57 = vand.u32 4294901760, %v508_v19 }
  0x5f   : > { %862 = vmatprep.subr.mxu0 %v5883_v44  ;;  %1028 = vmatprep.subr.mxu1 %v5673_v6  ;;  %10392 = vst [vmem:[#allocation43_spill] sm:$0xff] %v6278_v7  ;;  %v9621_v55 = vand.u32 4294901760, %v6278_v7 }
  0x60   : > { %493 = vmatprep.mubr.f32.mxu0 %v10388_v15  ;;  %780 = vmatprep.mubr.f32.mxu1 %v10388_v15 }
  0x61   : > { %865 = vmatpush1.msra.mxu0 %v5896_v53  ;;  %1030 = vmatpush1.msra.mxu1 %v5684_v10 }
  0x62   : > { %499 = vmatmul.mubr.f32.gmra.mxu0 %v498_v51  ;;  %782 = vmatmul.mubr.f32.gmra.mxu1 %v6154_v0  ;;  %v519_v51 = vsub.f32 %v6257_v20, %v9614_v52  ;;  %v6298_v52 = vsub.f32 %v319_v8, %v6287_v30 }
  0x63   : > { %868 = vmatprep.subr.mxu0 %v5913_v22  ;;  %1032 = vmatprep.subr.mxu1 %v5686_v11 }
  0x64   : > { %871 = vmatpush1.msra.mxu0 %v5925_v43  ;;  %1034 = vmatpush1.msra.mxu1 %v5688_v12  ;;  %v520_v19 = vand.u32 4294901760, %v519_v51  ;;  %v9628_v8 = vand.u32 4294901760, %v6298_v52  ;;  %v10394_v51 = vld [vmem:[#allocation27_spill] sm:$0xff] }
  0x65   : > { %874 = vmatprep.subr.mxu0 %v5957_v50  ;;  %1036 = vmatprep.subr.mxu1 %v5702_v16 }
  0x66   : > { %504 = vmatprep.mubr.f32.mxu0 %v10388_v15  ;;  %787 = vmatprep.mubr.f32.mxu1 %v10388_v15 }
  0x67   : > { %877 = vmatpush1.msra.mxu0 %v5973_v29  ;;  %1038 = vmatpush1.msra.mxu1 %v5704_v17 }
  0x68   : > { %510 = vmatmul.mubr.f32.gmra.mxu0 %v509_v57  ;;  %789 = vmatmul.mubr.f32.gmra.mxu1 %v6203_v45  ;;  %v530_v57 = vsub.f32 %v6278_v7, %v9621_v55  ;;  %v10396_v45 = vld [vmem:[#allocation11_spill] sm:$0xff]  ;;  %v10397_v55 = vld [vmem:[#allocation12_spill] sm:$0xff] }
  0x69   : > { %880 = vmatprep.subr.mxu0 %v5997_v34  ;;  %1040 = vmatprep.subr.mxu1 %v5707_v18 }
  0x6a   : > { %883 = vmatpush1.msra.mxu0 %v6014_v47  ;;  %1042 = vmatpush1.msra.mxu1 %v5729_v23  ;;  %v531_v0 = vand.u32 4294901760, %v530_v57  ;;  %v10399_v57 = vld [vmem:[#allocation14_spill] sm:$0xff] }
  0x6b   : > { %886 = vmatprep.subr.mxu0 %v6026_v48  ;;  %1044 = vmatprep.subr.mxu1 %v5735_v25 }
  0x6c   : > { %515 = vmatprep.mubr.f32.mxu0 %v10388_v15  ;;  %794 = vmatprep.mubr.f32.mxu1 %v10388_v15 }
  0x6d   : > { %889 = vmatpush1.msra.mxu0 %v6040_v39  ;;  %1046 = vmatpush1.msra.mxu1 %v10393_v9 }
  0x6e   : > { %521 = vmatmul.mubr.f32.gmra.mxu0 %v520_v19  ;;  %796 = vmatmul.mubr.f32.gmra.mxu1 %v6205_v38  ;;  %v541_v19 = vsub.f32 %v6298_v52, %v9628_v8  ;;  %v10398_v38 = vld [vmem:[#allocation13_spill] sm:$0xff]  ;;  %v10403_v8 = vld [vmem:[#allocation18_spill] sm:$0xff] }
  0x6f   : > { %892 = vmatprep.subr.mxu0 %v10394_v51  ;;  %1048 = vmatprep.subr.mxu1 %v10395_v35 }
  0x70   : > { %895 = vmatpush1.msra.mxu0 %v6076_v62  ;;  %1050 = vmatpush1.msra.mxu1 %v10396_v45  ;;  %v542_v7 = vand.u32 4294901760, %v541_v19  ;;  %v10404_v19 = vld [vmem:[#allocation19_spill] sm:$0xff] }
  0x71   : > { %898 = vmatprep.subr.mxu0 %v6099_v33  ;;  %1052 = vmatprep.subr.mxu1 %v10397_v55  ;;  %v10401_v55 = vld [vmem:[#allocation16_spill] sm:$0xff] }
  0x72   : > { %526 = vmatprep.mubr.f32.mxu0 %v10388_v15  ;;  %801 = vmatprep.mubr.f32.mxu1 %v10388_v15 }
  0x73   : > { %901 = vmatpush1.msra.mxu0 %v6110_v37  ;;  %1054 = vmatpush1.msra.mxu1 %v10398_v38 }
  0x74   : > { %532 = vmatmul.mubr.f32.gmra.mxu0 %v531_v0  ;;  %803 = vmatmul.mubr.f32.gmra.mxu1 %v6213_v58  ;;  %v10402_v0 = vld [vmem:[#allocation17_spill] sm:$0xff]  ;;  %v10405_v58 = vld [vmem:[#allocation20_spill] sm:$0xff] }
  0x75   : > { %904 = vmatprep.subr.mxu0 %v6123_v59  ;;  %1056 = vmatprep.subr.mxu1 %v10399_v57 }
  0x76   : > { %907 = vmatpush1.msra.mxu0 %v6127_v27  ;;  %1058 = vmatpush1.msra.mxu1 %v10400_v49 }
  0x77   : > { %910 = vmatprep.subr.mxu0 %v6139_v28  ;;  %1060 = vmatprep.subr.mxu1 %v10401_v55 }
  0x78   : > { %537 = vmatprep.mubr.f32.mxu0 %v10388_v15  ;;  %808 = vmatprep.mubr.f32.mxu1 %v10388_v15 }
  0x79   : > { %913 = vmatpush1.msra.mxu0 %v6149_v61  ;;  %1062 = vmatpush1.msra.mxu1 %v10402_v0 }
  0x7a   : > { %543 = vmatmul.mubr.f32.gmra.mxu0 %v542_v7  ;;  %810 = vmatmul.mubr.f32.gmra.mxu1 %v6246_v42  ;;  %v10406_v7 = vld [vmem:[#allocation21_spill] sm:$0xff]  ;;  %v10407_v42 = vld [vmem:[#allocation32_spill] sm:$0xff] }
  0x7b   : > { %916 = vmatprep.subr.mxu0 %v6174_v1  ;;  %1064 = vmatprep.subr.mxu1 %v10403_v8  ;;  %v10408_v8 = vld [vmem:[#allocation22_spill] sm:$0xff]  ;;  %v10413_v1 = vld [vmem:[#allocation24_spill] sm:$0xff] }
  0x7c   : > { %919 = vmatpush1.msra.mxu0 %v6181_v40  ;;  %1066 = vmatpush1.msra.mxu1 %v10404_v19  ;;  %v10409_v40 = vld [vmem:[#allocation8_spill] sm:$0xff] }
  0x7d   : > { %922 = vmatprep.subr.mxu0 %v6191_v54  ;;  %1068 = vmatprep.subr.mxu1 %v10405_v58  ;;  %v10410_v19 = vand.u32 4294901760, %v10409_v40  ;;  %v10411_v54 = vld [vmem:[#allocation23_spill] sm:$0xff]  ;;  %v10412_v58 = vand.u32 4294901760, %v5732_v24  ;;  %v10417_v24 = vld [vmem:[#allocation26_spill] sm:$0xff]  ;;  %v10418_v40 = vand.u32 4294901760, %v5770_v36  ;;  %v10425_v36 = vand.u32 4294901760, %v10407_v42 }
  0x7e   : > { %815 = vmatprep.mubr.f32.mxu1 %v10388_v15  ;;  %925 = vmatpush1.msra.mxu0 %v6195_v3  ;;  %v10414_v3 = vand.u32 4294901760, %v5738_v26  ;;  %v10419_v26 = vld [vmem:[#allocation28_spill] sm:$0xff] }
  0x7f   : > { %958 = vmatprep.mubr.f32.mxu0 %v10388_v15  ;;  %1070 = vmatpush1.msra.mxu1 %v10406_v7 }
  0x80   : > { %817 = vmatmul.mubr.f32.gmra.mxu1 %v6266_v21  ;;  %961 = vmatmul.mubr.f32.vlgmr.msra.gmra.mxu0 %v10407_v42  ;;  %v10415_v21 = vld [vmem:[#allocation25_spill] sm:$0xff] }
  0x81   : > { %1072 = vmatprep.subr.mxu1 %v10408_v8  ;;  %1195 = vmatprep.subr.mxu0 %v10410_v19  ;;  %v10416_v8 = vand.u32 4294901760, %v5761_v32  ;;  %v10422_v19 = vand.u32 4294901760, %v5800_v46  ;;  %v10423_v32 = vld [vmem:[#allocation30_spill] sm:$0xff]  ;;  %v10427_v46 = vand.u32 4294901760, %v5869_v13  ;;  %v10446_v13 = vld [vmem:[#allocation43_spill] sm:$0xff] }
  0x82   : > { %1074 = vmatpush1.msra.mxu1 %v10411_v54  ;;  %1199 = vmatpush1.msra.mxu0 %v10412_v58  ;;  %v10421_v58 = vld [vmem:[#allocation29_spill] sm:$0xff] }
  0x83   : > { %1076 = vmatprep.subr.mxu1 %v10413_v1  ;;  %1203 = vmatprep.subr.mxu0 %v10414_v3  ;;  %v10420_v3 = vand.u32 4294901760, %v5786_v41  ;;  %v10426_v41 = vand.u32 4294901760, %v5855_v2  ;;  %v10433_v2 = vand.u32 4294901760, %v5957_v50  ;;  %v10438_v50 = vand.u32 4294901760, %v6026_v48 }
  0x84   : > { %822 = vmatprep.mubr.f32.mxu1 %v10388_v15  ;;  %966 = vmatprep.mubr.f32.mxu0 %v10388_v15  ;;  %v10452_v48 = vand.u32 4294901760, %v6257_v20 }
  0x85   : > { %1078 = vmatpush1.msra.mxu1 %v10415_v21  ;;  %1207 = vmatpush1.msra.mxu0 %v10416_v8  ;;  %v10424_v8 = vand.u32 4294901760, %v5835_v60  ;;  %v10429_v60 = vand.u32 4294901760, %v5896_v53  ;;  %v10450_v53 = vand.u32 4294901760, %v6139_v28 }
  0x86   : > { %824 = vmatmul.mubr.f32.gmra.mxu1 %v6287_v30  ;;  %969 = vmatmul.mubr.f32.gmra.mxu0 %v6170_v56 }
  0x87   : > { %1080 = vmatprep.subr.mxu1 %v10417_v24  ;;  %1211 = vmatprep.subr.mxu0 %v10418_v40  ;;  %v10428_v40 = vand.u32 4294901760, %v5883_v44  ;;  %v10448_v44 = vand.u32 4294901760, %v6123_v59 }
  0x88   : > { %1082 = vmatpush1.msra.mxu1 %v10419_v26  ;;  %1215 = vmatpush1.msra.mxu0 %v10420_v3 }
  0x89   : > { %1084 = vmatprep.subr.mxu1 %v10421_v58  ;;  %1219 = vmatprep.subr.mxu0 %v10422_v19 }
  0x8a   : > { %974 = vmatprep.mubr.f32.mxu0 %v10388_v15  ;;  %1086 = vmatpush1.msra.mxu1 %v10423_v32 }
  0x8b   : > { %1119 = vmatprep.mubr.f32.mxu1 %v10388_v15  ;;  %1223 = vmatpush1.msra.mxu0 %v10424_v8 }
  0x8c   : > { %977 = vmatmul.mubr.f32.gmra.mxu0 %v6218_v31  ;;  %1123 = vmatmul.mubr.f32.vlgmr.msra.gmra.mxu1 %v10425_v36  ;;  %v10472_v36 = vld [vmem:[#allocation22_spill] sm:$0xff] }
  0x8d   : > { %1227 = vmatprep.subr.mxu0 %v10426_v41  ;;  %1410 = vmatprep.subr.mxu1 %v5669_v4  ;;  %v10430_v4 = vand.u32 4294901760, %v6170_v56  ;;  %v10445_v56 = vand.u32 4294901760, %v6110_v37  ;;  %v10456_v37 = vld [vmem:[#allocation35_spill] sm:$0xff]  ;;  %v1636_v41 = vld [vmem:[#allocation2 + $0xd0] sm:$0xff] }
  0x8e   : > { %1231 = vmatpush1.msra.mxu0 %v10427_v46  ;;  %1412 = vmatpush1.msra.mxu1 %v5671_v5  ;;  %v10431_v5 = vand.u32 4294901760, %v5913_v22  ;;  %v10451_v22 = vand.u32 4294901760, %v6149_v61  ;;  %v10457_v59 = vand.u32 4294901760, %v10456_v37  ;;  %v1631_v37 = vld [vmem:[#allocation2 + $0xa8] sm:$0xff] }
  0x8f   : > { %1235 = vmatprep.subr.mxu0 %v10428_v40  ;;  %1414 = vmatprep.subr.mxu1 %v5673_v6  ;;  %v10432_v6 = vand.u32 4294901760, %v5925_v43  ;;  %v10447_v43 = vand.u32 4294901760, %v6235_v14 }
  0x90   : > { %982 = vmatprep.mubr.f32.mxu0 %v10388_v15  ;;  %1128 = vmatprep.mubr.f32.mxu1 %v10388_v15 }
  0x91   : > { %1239 = vmatpush1.msra.mxu0 %v10429_v60  ;;  %1416 = vmatpush1.msra.mxu1 %v5684_v10  ;;  %v10434_v10 = vand.u32 4294901760, %v5973_v29 }
  0x92   : > { %985 = vmatmul.mubr.f32.gmra.mxu0 %v6221_v63  ;;  %1132 = vmatmul.mubr.f32.gmra.mxu1 %v10430_v4 }
  0x93   : > { %1243 = vmatprep.subr.mxu0 %v10431_v5  ;;  %1418 = vmatprep.subr.mxu1 %v5686_v11  ;;  %v10435_v11 = vand.u32 4294901760, %v6218_v31  ;;  %v10443_v31 = vand.u32 4294901760, %v6099_v33  ;;  %v10449_v33 = vand.u32 4294901760, %v6127_v27  ;;  %v10458_v27 = vld [vmem:[#allocation19_spill] sm:$0xff] }
  0x94   : > { %1247 = vmatpush1.msra.mxu0 %v10432_v6  ;;  %1420 = vmatpush1.msra.mxu1 %v5688_v12  ;;  %v10436_v12 = vand.u32 4294901760, %v5997_v34  ;;  %v10444_v34 = vld [vmem:[#allocation12_spill] sm:$0xff]  ;;  %v10477_v6 = vld [vmem:[#allocation33_spill] sm:$0xff] }
  0x95   : > { %1251 = vmatprep.subr.mxu0 %v10433_v2  ;;  %1422 = vmatprep.subr.mxu1 %v5702_v16  ;;  %v10437_v16 = vand.u32 4294901760, %v6014_v47  ;;  %v10455_v47 = vld [vmem:[#allocation18_spill] sm:$0xff] }
  0x96   : > { %990 = vmatprep.mubr.f32.mxu0 %v10388_v15  ;;  %1137 = vmatprep.mubr.f32.mxu1 %v10388_v15 }
  0x97   : > { %1255 = vmatpush1.msra.mxu0 %v10434_v10  ;;  %1424 = vmatpush1.msra.mxu1 %v5704_v17  ;;  %v10439_v17 = vand.u32 4294901760, %v6040_v39  ;;  %v1641_v39 = vld [vmem:[#allocation2 + $0xf8] sm:$0xff] }
  0x98   : > { %993 = vmatmul.mubr.f32.gmra.mxu0 %v6235_v14  ;;  %1141 = vmatmul.mubr.f32.gmra.mxu1 %v10435_v11  ;;  %v6472_v61 = vand.u32 4294901760, %v1641_v39 }
  0x99   : > { %1259 = vmatprep.subr.mxu0 %v10436_v12  ;;  %1426 = vmatprep.subr.mxu1 %v5707_v18  ;;  %v10440_v18 = vand.u32 4294901760, %v6221_v63  ;;  %v10463_v63 = vld [vmem:[#allocation20_spill] sm:$0xff] }
  0x9a   : > { %1263 = vmatpush1.msra.mxu0 %v10437_v16  ;;  %1428 = vmatpush1.msra.mxu1 %v5729_v23  ;;  %v10441_v23 = vand.u32 4294901760, %v10394_v51  ;;  %10459 = vst [vmem:[#allocation9_spill] sm:$0xff] %v6472_v61  ;;  %v6483_v14 = vsub.f32 %v1641_v39, %v6472_v61  ;;  %v10468_v51 = vand.u32 4294901760, %v10446_v13 }
  0x9b   : > { %1267 = vmatprep.subr.mxu0 %v10438_v50  ;;  %1430 = vmatprep.subr.mxu1 %v5735_v25  ;;  %v10442_v25 = vand.u32 4294901760, %v6076_v62  ;;  %v1640_v62 = vld [vmem:[#allocation2 + $0xf0] sm:$0xff]  ;;  %v1635_v50 = vld [vmem:[#allocation2 + $0xc8] sm:$0xff] }
  0x9c   : > { %998 = vmatprep.mubr.f32.mxu0 %v10388_v15  ;;  %1146 = vmatprep.mubr.f32.mxu1 %v10388_v15  ;;  %v6474_v28 = vand.u32 4294901760, %v1640_v62  ;;  %10466 = vst [vmem:[#allocation10_spill] sm:$0xff] %v6483_v14 }
  0x9d   : > { %1271 = vmatpush1.msra.mxu0 %v10439_v17  ;;  %1432 = vmatpush1.msra.mxu1 %v10393_v9 }
  0x9e   : > { %1001 = vmatmul.mubr.f32.gmra.mxu0 %v6257_v20  ;;  %1150 = vmatmul.mubr.f32.gmra.mxu1 %v10440_v18  ;;  %10460 = vst [vmem:[#allocation27_spill] sm:$0xff] %v6474_v28  ;;  %v6486_v42 = vsub.f32 %v1640_v62, %v6474_v28  ;;  %v1639_v20 = vld [vmem:[#allocation2 + $0xe8] sm:$0xff]  ;;  %v6540_v18 = vand.u32 4294901760, %v1635_v50 }
  0x9f   : > { %1275 = vmatprep.subr.mxu0 %v10441_v23  ;;  %1434 = vmatprep.subr.mxu1 %v10395_v35  ;;  %v10464_v35 = vld [vmem:[#allocation37_spill] sm:$0xff]  ;;  %v6495_v19 = vand.u32 4294901760, %v1639_v20 }
  0xa0   : > { %1279 = vmatpush1.msra.mxu0 %v10442_v25  ;;  %1436 = vmatpush1.msra.mxu1 %v10396_v45  ;;  %v10461_v45 = vld [vmem:[#allocation36_spill] sm:$0xff]  ;;  %v10465_v9 = vand.u32 4294901760, %v10464_v35  ;;  %10467 = vst [vmem:[#allocation11_spill] sm:$0xff] %v6486_v42  ;;  %v9656_v3 = vand.u32 4294901760, %v6486_v42  ;;  %10481 = vst [vmem:[#allocation23_spill] sm:$0xff] %v6540_v18 }
  0xa1   : > { %1283 = vmatprep.subr.mxu0 %v10443_v31  ;;  %1438 = vmatprep.subr.mxu1 %v10444_v34  ;;  %10470 = vst [vmem:[#allocation13_spill] sm:$0xff] %v6495_v19  ;;  %v6507_v40 = vsub.f32 %v1639_v20, %v6495_v19  ;;  %v1633_v31 = vld [vmem:[#allocation2 + $0xb8] sm:$0xff]  ;;  %v1632_v34 = vld [vmem:[#allocation2 + $0xb0] sm:$0xff] }
  0xa2   : > { %1006 = vmatprep.mubr.f32.mxu0 %v10388_v15  ;;  %1155 = vmatprep.mubr.f32.mxu1 %v10388_v15  ;;  %v1952_v4 = vsub.f32 %v6486_v42, %v9656_v3 }
  0xa3   : > { %1287 = vmatpush1.msra.mxu0 %v10445_v56  ;;  %1440 = vmatpush1.msra.mxu1 %v10398_v38  ;;  %v10462_v38 = vand.u32 4294901760, %v10461_v45  ;;  %10473 = vst [vmem:[#allocation15_spill] sm:$0xff] %v6507_v40  ;;  %v9654_v2 = vand.u32 4294901760, %v6507_v40  ;;  %v10483_v56 = vld [vmem:[#allocation38_spill] sm:$0xff] }
  0xa4   : > { %1009 = vmatmul.mubr.f32.gmra.mxu0 %v10446_v13  ;;  %1159 = vmatmul.mubr.f32.gmra.mxu1 %v10447_v43  ;;  %v1953_v23 = vand.u32 4294901760, %v1952_v4  ;;  %v6556_v43 = vsub.f32 %v1635_v50, %v6540_v18 }
  0xa5   : > { %1291 = vmatprep.subr.mxu0 %v10448_v44  ;;  %1442 = vmatprep.subr.mxu1 %v10399_v57  ;;  %v10469_v57 = vld [vmem:[#allocation31_spill] sm:$0xff]  ;;  %v1958_v17 = vsub.f32 %v6507_v40, %v9654_v2  ;;  %v1616_v2 = vld [vmem:[#allocation2 + $0x30] sm:$0xff] }
  0xa6   : > { %1295 = vmatpush1.msra.mxu0 %v10449_v33  ;;  %1444 = vmatpush1.msra.mxu1 %v10400_v49  ;;  %v10453_v49 = vld [vmem:[#allocation34_spill] sm:$0xff]  ;;  %10484 = vst [vmem:[#allocation25_spill] sm:$0xff] %v6556_v43  ;;  %v6566_v33 = vand.u32 4294901760, %v1633_v31 }
  0xa7   : > { %1299 = vmatprep.subr.mxu0 %v10450_v53  ;;  %1446 = vmatprep.subr.mxu1 %v10401_v55  ;;  %v10454_v29 = vand.u32 4294901760, %v10453_v49  ;;  %v1638_v55 = vld [vmem:[#allocation2 + $0xe0] sm:$0xff]  ;;  %v1959_v13 = vand.u32 4294901760, %v1958_v17  ;;  %v6568_v53 = vand.u32 4294901760, %v1632_v34 }
  0xa8   : > { %1014 = vmatprep.mubr.f32.mxu0 %v10388_v15  ;;  %1164 = vmatprep.mubr.f32.mxu1 %v10388_v15  ;;  %v6497_v8 = vand.u32 4294901760, %v1638_v55  ;;  %10486 = vst [vmem:[#allocation28_spill] sm:$0xff] %v6566_v33  ;;  %v6574_v39 = vsub.f32 %v1633_v31, %v6566_v33 }
  0xa9   : > { %1303 = vmatpush1.msra.mxu0 %v10451_v22  ;;  %1448 = vmatpush1.msra.mxu1 %v10402_v0  ;;  %v9658_v0 = vand.u32 4294901760, %v6483_v14  ;;  %10487 = vst [vmem:[#allocation29_spill] sm:$0xff] %v6568_v53  ;;  %v6578_v62 = vsub.f32 %v1632_v34, %v6568_v53  ;;  %v1627_v34 = vld [vmem:[#allocation2 + $0x88] sm:$0xff] }
  0xaa   : > { %1017 = vmatmul.mubr.f32.gmra.mxu0 %v6298_v52  ;;  %1168 = vmatmul.mubr.f32.gmra.mxu1 %v10452_v48  ;;  %10471 = vst [vmem:[#allocation14_spill] sm:$0xff] %v6497_v8  ;;  %v6516_v5 = vsub.f32 %v1638_v55, %v6497_v8  ;;  %v9648_v48 = vand.u32 4294901760, %v6556_v43  ;;  %10488 = vst [vmem:[#allocation30_spill] sm:$0xff] %v6574_v39  ;;  %v1629_v55 = vld [vmem:[#allocation2 + $0x98] sm:$0xff] }
  0xab   : > { %1307 = vmatprep.subr.mxu0 %v10454_v29  ;;  %1450 = vmatprep.subr.mxu1 %v10455_v47  ;;  %v1946_v46 = vsub.f32 %v6483_v14, %v9658_v0  ;;  %10489 = vst [vmem:[#allocation12_spill] sm:$0xff] %v6578_v62  ;;  %v9643_v20 = vand.u32 4294901760, %v6578_v62 }
  0xac   : > { %1311 = vmatpush1.msra.mxu0 %v10457_v59  ;;  %1452 = vmatpush1.msra.mxu1 %v10458_v27  ;;  %10475 = vst [vmem:[#allocation17_spill] sm:$0xff] %v6516_v5  ;;  %v9653_v12 = vand.u32 4294901760, %v6516_v5  ;;  %v1630_v59 = vld [vmem:[#allocation2 + $0xa0] sm:$0xff]  ;;  %v10490_v27 = vld [vmem:[#allocation39_spill] sm:$0xff]  ;;  %v1982_v45 = vsub.f32 %v6556_v43, %v9648_v48 }
  0xad   : > { %1315 = vmatprep.subr.mxu0 %v10462_v38  ;;  %1454 = vmatprep.subr.mxu1 %v10463_v63  ;;  %v1947_v11 = vand.u32 4294901760, %v1946_v46  ;;  %v6587_v63 = vand.u32 4294901760, %v1631_v37  ;;  %v6589_v35 = vand.u32 4294901760, %v1630_v59  ;;  %v2000_v4 = vsub.f32 %v6578_v62, %v9643_v20  ;;  %v1620_v20 = vld [vmem:[#allocation2 + $0x50] sm:$0xff] }
  0xae   : > { %1173 = vmatprep.mubr.f32.mxu1 %v10388_v15  ;;  %1319 = vmatpush1.msra.mxu0 %v10465_v9  ;;  %v9645_v9 = vand.u32 4294901760, %v6574_v39 }
  0xaf   : > { %1352 = vmatprep.mubr.f32.mxu0 %v10388_v15  ;;  %1456 = vmatpush1.msra.mxu1 %v10406_v7  ;;  %v1637_v7 = vld [vmem:[#allocation2 + $0xd8] sm:$0xff]  ;;  %10491 = vst [vmem:[#allocation43_spill] sm:$0xff] %v6587_v63  ;;  %10492 = vst [vmem:[#allocation34_spill] sm:$0xff] %v6589_v35 }
  0xb0   : > { %1177 = vmatmul.mubr.f32.gmra.mxu1 %v10468_v51  ;;  %1354 = vmatmul.mubr.f32.vlgmr.msra.gmra.mxu0 %v10469_v57  ;;  %v6509_v60 = vand.u32 4294901760, %v1637_v7  ;;  %v1628_v51 = vld [vmem:[#allocation2 + $0x90] sm:$0xff]  ;;  %v1994_v46 = vsub.f32 %v6574_v39, %v9645_v9 }
  0xb1   : > { %1458 = vmatprep.subr.mxu1 %v10472_v36  ;;  %1182 = vmatprep.mubr.f32.mxu1 %v10388_v15 }
  0xb2   : > { %1460 = vmatpush1.msra.mxu1 %v10411_v54  ;;  %1359 = vmatprep.mubr.f32.mxu0 %v10388_v15  ;;  %10474 = vst [vmem:[#allocation16_spill] sm:$0xff] %v6509_v60  ;;  %v6518_v54 = vand.u32 4294901760, %v1636_v41  ;;  %v6525_v10 = vsub.f32 %v1637_v7, %v6509_v60  ;;  %v6597_v7 = vsub.f32 %v1631_v37, %v6587_v63  ;;  %v1995_v17 = vand.u32 4294901760, %v1994_v46  ;;  %v1625_v37 = vld [vmem:[#allocation2 + $0x78] sm:$0xff] }
  0xb3   : > { %1462 = vmatprep.subr.mxu1 %v10413_v1  ;;  %1687 = vmatprep.subr.mxu0 %v6472_v61  ;;  %v10479_v1 = vand.u32 4294901760, %v6298_v52 }
  0xb4   : > { %10476 = vst [vmem:[#allocation21_spill] sm:$0xff] %v6518_v54  ;;  %1464 = vmatpush1.msra.mxu1 %v10415_v21  ;;  %1361 = vmatmul.mubr.f32.gmra.mxu0 %v10477_v6  ;;  %10478 = vst [vmem:[#allocation32_spill] sm:$0xff] %v6525_v10  ;;  %v6532_v16 = vsub.f32 %v1636_v41, %v6518_v54  ;;  %v1634_v21 = vld [vmem:[#allocation2 + $0xc0] sm:$0xff]  ;;  %v9652_v52 = vand.u32 4294901760, %v6525_v10  ;;  %v6600_v41 = vsub.f32 %v1630_v59, %v6589_v35  ;;  %v1624_v59 = vld [vmem:[#allocation2 + $0x70] sm:$0xff] }
  0xb5   : > { %1186 = vmatmul.mubr.f32.gmra.mxu1 %v10479_v1  ;;  %1466 = vmatprep.subr.mxu1 %v10417_v24  ;;  %v6542_v24 = vand.u32 4294901760, %v1634_v21  ;;  %10493 = vst [vmem:[#allocation18_spill] sm:$0xff] %v6597_v7  ;;  %v6611_v1 = vand.u32 4294901760, %v1628_v51  ;;  %v9642_v50 = vand.u32 4294901760, %v6597_v7 }
  0xb6   : > { %10480 = vst [vmem:[#allocation8_spill] sm:$0xff] %v6532_v16  ;;  %1468 = vmatpush1.msra.mxu1 %v10419_v26  ;;  %1366 = vmatprep.mubr.f32.mxu0 %v10388_v15  ;;  %v1964_v26 = vsub.f32 %v6516_v5, %v9653_v12  ;;  %v9651_v25 = vand.u32 4294901760, %v6532_v16  ;;  %10494 = vst [vmem:[#allocation35_spill] sm:$0xff] %v6600_v41 }
  0xb7   : > { %10482 = vst [vmem:[#allocation24_spill] sm:$0xff] %v6542_v24  ;;  %1470 = vmatprep.subr.mxu1 %v10421_v58  ;;  %1505 = vmatprep.mubr.f32.mxu1 %v10388_v15  ;;  %v1970_v58 = vsub.f32 %v6525_v10, %v9652_v52  ;;  %v6559_v44 = vsub.f32 %v1634_v21, %v6542_v24  ;;  %10496 = vst [vmem:[#allocation36_spill] sm:$0xff] %v6611_v1  ;;  %v9641_v21 = vand.u32 4294901760, %v6600_v41  ;;  %v1618_v52 = vld [vmem:[#allocation2 + $0x40] sm:$0xff] }
  0xb8   : > { %1472 = vmatpush1.msra.mxu1 %v10423_v32  ;;  %1368 = vmatmul.mubr.f32.gmra.mxu0 %v10483_v56  ;;  %v1976_v32 = vsub.f32 %v6532_v16, %v9651_v25  ;;  %v1965_v22 = vand.u32 4294901760, %v1964_v26  ;;  %v6622_v31 = vsub.f32 %v1628_v51, %v6611_v1  ;;  %v1619_v25 = vld [vmem:[#allocation2 + $0x48] sm:$0xff] }
  0xb9   : > { %10485 = vst [vmem:[#allocation26_spill] sm:$0xff] %v6559_v44  ;;  %1507 = vmatmul.mubr.f32.vlgmr.msra.gmra.mxu1 %v10469_v57  ;;  %1373 = vmatprep.mubr.f32.mxu0 %v10388_v15  ;;  %v9647_v49 = vand.u32 4294901760, %v6559_v44  ;;  %v1971_v29 = vand.u32 4294901760, %v1970_v58  ;;  %v1983_v57 = vand.u32 4294901760, %v1982_v45  ;;  %v2006_v58 = vsub.f32 %v6597_v7, %v9642_v50  ;;  %v10502_v45 = vld [vmem:[#allocation41_spill] sm:$0xff]  ;;  %v10509_v50 = vld [vmem:[#allocation42_spill] sm:$0xff] }
  0xba   : > { %1512 = vmatprep.mubr.f32.mxu1 %v10388_v15  ;;  %1948 = vmatprep.subr.mxu1 %v1947_v11  ;;  %v1977_v47 = vand.u32 4294901760, %v1976_v32  ;;  %v10497_v11 = vld [vmem:[#allocation40_spill] sm:$0xff]  ;;  %10499 = vst [vmem:[#allocation37_spill] sm:$0xff] %v6622_v31  ;;  %v6631_v32 = vand.u32 4294901760, %v1627_v34 }
  0xbb   : > { %1954 = vmatpush1.msra.mxu1 %v1953_v23  ;;  %1689 = vmatpush1.msra.mxu0 %v6474_v28  ;;  %v1988_v38 = vsub.f32 %v6559_v44, %v9647_v49  ;;  %v2001_v23 = vand.u32 4294901760, %v2000_v4  ;;  %v6653_v4 = vand.u32 4294901760, %v1625_v37 }
  0xbc   : > { %1375 = vmatmul.mubr.f32.gmra.mxu0 %v10490_v27  ;;  %1960 = vmatprep.subr.mxu1 %v1959_v13  ;;  %v1626_v13 = vld [vmem:[#allocation2 + $0x80] sm:$0xff]  ;;  %10500 = vst [vmem:[#allocation31_spill] sm:$0xff] %v6631_v32  ;;  %v6640_v51 = vsub.f32 %v1627_v34, %v6631_v32 }
  0xbd   : > { %1514 = vmatmul.mubr.f32.gmra.mxu1 %v10477_v6  ;;  %1380 = vmatprep.mubr.f32.mxu0 %v10388_v15  ;;  %v1989_v36 = vand.u32 4294901760, %v1988_v38  ;;  %v6609_v6 = vand.u32 4294901760, %v1629_v55  ;;  %v2007_v38 = vand.u32 4294901760, %v2006_v58  ;;  %10505 = vst [vmem:[#allocation39_spill] sm:$0xff] %v6653_v4 }
  0xbe   : > { %1519 = vmatprep.mubr.f32.mxu1 %v10388_v15  ;;  %1966 = vmatpush1.msra.mxu1 %v1965_v22  ;;  %v6633_v22 = vand.u32 4294901760, %v1626_v13  ;;  %10503 = vst [vmem:[#allocation33_spill] sm:$0xff] %v6640_v51  ;;  %v9644_v34 = vand.u32 4294901760, %v6640_v51 }
  0xbf   : > { %1972 = vmatprep.subr.mxu1 %v1971_v29  ;;  %1691 = vmatprep.subr.mxu0 %v6495_v19  ;;  %10495 = vst [vmem:[#allocation19_spill] sm:$0xff] %v6609_v6  ;;  %v6619_v26 = vsub.f32 %v1629_v55, %v6609_v6 }
  0xc0   : > { %1382 = vmatmul.mubr.f32.gmra.mxu0 %v10497_v11  ;;  %1978 = vmatpush1.msra.mxu1 %v1977_v47  ;;  %10501 = vst [vmem:[#allocation22_spill] sm:$0xff] %v6633_v22  ;;  %v9639_v47 = vand.u32 4294901760, %v6622_v31 }
  0xc1   : > { %1521 = vmatmul.mubr.f32.gmra.mxu1 %v10483_v56  ;;  %1387 = vmatprep.mubr.f32.mxu0 %v10388_v15  ;;  %10498 = vst [vmem:[#allocation20_spill] sm:$0xff] %v6619_v26  ;;  %v2012_v56 = vsub.f32 %v6600_v41, %v9641_v21  ;;  %v9640_v29 = vand.u32 4294901760, %v6619_v26  ;;  %v1622_v21 = vld [vmem:[#allocation2 + $0x60] sm:$0xff]  ;;  %v1669_v41 = vld [vmem:[#allocation2 + $0x1d8] sm:$0xff] }
  0xc2   : > { %1526 = vmatprep.mubr.f32.mxu1 %v10388_v15  ;;  %1984 = vmatprep.subr.mxu1 %v1983_v57  ;;  %v6643_v57 = vsub.f32 %v1626_v13, %v6633_v22  ;;  %v2024_v46 = vsub.f32 %v6622_v31, %v9639_v47 }
  0xc3   : > { %1990 = vmatpush1.msra.mxu1 %v1989_v36  ;;  %1693 = vmatpush1.msra.mxu0 %v6497_v8  ;;  %v2013_v55 = vand.u32 4294901760, %v2012_v56  ;;  %v2018_v36 = vsub.f32 %v6619_v26, %v9640_v29  ;;  %v6662_v56 = vsub.f32 %v1625_v37, %v6653_v4  ;;  %v1623_v29 = vld [vmem:[#allocation2 + $0x68] sm:$0xff]  ;;  %v6676_v37 = vand.u32 4294901760, %v1622_v21 }
  0xc4   : > { %1389 = vmatmul.mubr.f32.gmra.mxu0 %v10502_v45  ;;  %1996 = vmatprep.subr.mxu1 %v1995_v17  ;;  %10504 = vst [vmem:[#allocation38_spill] sm:$0xff] %v6643_v57  ;;  %v6655_v17 = vand.u32 4294901760, %v1624_v59  ;;  %v2025_v58 = vand.u32 4294901760, %v2024_v46  ;;  %v1621_v46 = vld [vmem:[#allocation2 + $0x58] sm:$0xff] }
  0xc5   : > { %1528 = vmatmul.mubr.f32.gmra.mxu1 %v10490_v27  ;;  %1394 = vmatprep.mubr.f32.mxu0 %v10388_v15  ;;  %v9646_v27 = vand.u32 4294901760, %v6643_v57  ;;  %v2019_v13 = vand.u32 4294901760, %v2018_v36  ;;  %10507 = vst [vmem:[#allocation41_spill] sm:$0xff] %v6662_v56  ;;  %v6674_v36 = vand.u32 4294901760, %v1623_v29  ;;  %10511 = vst [vmem:[#allocation45_spill] sm:$0xff] %v6676_v37  ;;  %v6687_v49 = vsub.f32 %v1622_v21, %v6676_v37 }
  0xc6   : > { %10506 = vst [vmem:[#allocation40_spill] sm:$0xff] %v6655_v17  ;;  %1533 = vmatprep.mubr.f32.mxu1 %v10388_v15  ;;  %2002 = vmatpush1.msra.mxu1 %v2001_v23  ;;  %v6665_v47 = vsub.f32 %v1624_v59, %v6655_v17  ;;  %v2030_v23 = vsub.f32 %v6640_v51, %v9644_v34  ;;  %v9649_v59 = vand.u32 4294901760, %v6662_v56 }
  0xc7   : > { %2008 = vmatprep.subr.mxu1 %v2007_v38  ;;  %1695 = vmatprep.subr.mxu0 %v6509_v60  ;;  %v2036_v38 = vsub.f32 %v6643_v57, %v9646_v27  ;;  %10510 = vst [vmem:[#allocation42_spill] sm:$0xff] %v6674_v36  ;;  %v6684_v27 = vsub.f32 %v1623_v29, %v6674_v36  ;;  %10513 = vst [vmem:[#allocation47_spill] sm:$0xff] %v6687_v49  ;;  %v9657_v29 = vand.u32 4294901760, %v6687_v49  ;;  %v1672_v57 = vld [vmem:[#allocation2 + $0x1f0] sm:$0xff] }
  0xc8   : > { %10508 = vst [vmem:[#allocation44_spill] sm:$0xff] %v6665_v47  ;;  %1396 = vmatmul.mubr.f32.gmra.mxu0 %v10509_v50  ;;  %2014 = vmatpush1.msra.mxu1 %v2013_v55  ;;  %v9650_v55 = vand.u32 4294901760, %v6665_v47  ;;  %v2031_v34 = vand.u32 4294901760, %v2030_v23  ;;  %v6698_v23 = vand.u32 4294901760, %v1620_v20 }
  0xc9   : > { %1535 = vmatmul.mubr.f32.gmra.mxu1 %v10497_v11  ;;  %1401 = vmatprep.mubr.f32.mxu0 %v10388_v15  ;;  %v2037_v9 = vand.u32 4294901760, %v2036_v38  ;;  %10512 = vst [vmem:[#allocation46_spill] sm:$0xff] %v6684_v27  ;;  %v2042_v11 = vsub.f32 %v6662_v56, %v9649_v59  ;;  %v9655_v21 = vand.u32 4294901760, %v6684_v27 }
  0xca   : > { %1540 = vmatprep.mubr.f32.mxu1 %v10388_v15  ;;  %2020 = vmatprep.subr.mxu1 %v2019_v13  ;;  %v2048_v48 = vsub.f32 %v6665_v47, %v9650_v55  ;;  %v6696_v13 = vand.u32 4294901760, %v1621_v46  ;;  %10515 = vst [vmem:[#allocation49_spill] sm:$0xff] %v6698_v23  ;;  %v6709_v55 = vsub.f32 %v1620_v20, %v6698_v23 }
  0xcb   : > { %1697 = vmatpush1.msra.mxu0 %v6518_v54  ;;  %2026 = vmatpush1.msra.mxu1 %v2025_v58  ;;  %v2043_v58 = vand.u32 4294901760, %v2042_v11  ;;  %v2054_v12 = vsub.f32 %v6684_v27, %v9655_v21  ;;  %v1617_v11 = vld [vmem:[#allocation2 + $0x38] sm:$0xff]  ;;  %v1612_v27 = vld [vmem:[#allocation2 + $0x10] sm:$0xff] }
  0xcc   : > { %10514 = vst [vmem:[#allocation48_spill] sm:$0xff] %v6696_v13  ;;  %1403 = vmatmul.mubr.f32.gmra.mxu0 %v6287_v30  ;;  %1699 = vmatprep.subr.mxu0 %v6540_v18  ;;  %v2049_v38 = vand.u32 4294901760, %v2048_v48  ;;  %v6706_v59 = vsub.f32 %v1621_v46, %v6696_v13  ;;  %10517 = vst [vmem:[#allocation51_spill] sm:$0xff] %v6709_v55  ;;  %v2060_v48 = vsub.f32 %v6687_v49, %v9657_v29 }
  0xcd   : > { %1542 = vmatmul.mubr.f32.gmra.mxu1 %v10502_v45  ;;  %2032 = vmatprep.subr.mxu1 %v2031_v34  ;;  %v6719_v45 = vand.u32 4294901760, %v1619_v25  ;;  %v6721_v34 = vand.u32 4294901760, %v1618_v52  ;;  %v9664_v46 = vand.u32 4294901760, %v6709_v55  ;;  %v2055_v21 = vand.u32 4294901760, %v2054_v12 }
  0xce   : > { %10516 = vst [vmem:[#allocation50_spill] sm:$0xff] %v6706_v59  ;;  %1547 = vmatprep.mubr.f32.mxu1 %v10388_v15  ;;  %1701 = vmatpush1.msra.mxu0 %v6542_v24  ;;  %v9659_v20 = vand.u32 4294901760, %v6706_v59  ;;  %v2061_v3 = vand.u32 4294901760, %v2060_v48  ;;  %v6741_v12 = vand.u32 4294901760, %v1617_v11  ;;  %v6743_v48 = vand.u32 4294901760, %v1616_v2 }
  0xcf   : > { %10518 = vst [vmem:[#allocation52_spill] sm:$0xff] %v6719_v45  ;;  %10519 = vst [vmem:[#allocation53_spill] sm:$0xff] %v6721_v34  ;;  %2038 = vmatpush1.msra.mxu1 %v2037_v9  ;;  %1703 = vmatprep.subr.mxu0 %v6566_v33  ;;  %v6728_v29 = vsub.f32 %v1619_v25, %v6719_v45  ;;  %v6731_v0 = vsub.f32 %v1618_v52, %v6721_v34 }
  0xd0   : > { %2044 = vmatprep.subr.mxu1 %v2043_v58  ;;  %1705 = vmatpush1.msra.mxu0 %v6568_v53  ;;  %v2066_v9 = vsub.f32 %v6706_v59, %v9659_v20  ;;  %v2072_v58 = vsub.f32 %v6709_v55, %v9664_v46  ;;  %10522 = vst [vmem:[#allocation56_spill] sm:$0xff] %v6741_v12  ;;  %10523 = vst [vmem:[#allocation57_spill] sm:$0xff] %v6743_v48  ;;  %v1614_v55 = vld [vmem:[#allocation2 + $0x20] sm:$0xff] }
  0xd1   : > { %10520 = vst [vmem:[#allocation54_spill] sm:$0xff] %v6728_v29  ;;  %10521 = vst [vmem:[#allocation55_spill] sm:$0xff] %v6731_v0  ;;  %1549 = vmatmul.mubr.f32.gmra.mxu1 %v10509_v50  ;;  %1707 = vmatprep.subr.mxu0 %v6587_v63  ;;  %v9669_v52 = vand.u32 4294901760, %v6728_v29  ;;  %v9670_v25 = vand.u32 4294901760, %v6731_v0  ;;  %v1615_v50 = vld [vmem:[#allocation2 + $0x28] sm:$0xff]  ;;  %v6750_v49 = vsub.f32 %v1617_v11, %v6741_v12  ;;  %v1613_v11 = vld [vmem:[#allocation2 + $0x18] sm:$0xff] }
  0xd2   : > { %1554 = vmatprep.mubr.f32.mxu1 %v10388_v15  ;;  %2050 = vmatpush1.msra.mxu1 %v2049_v38  ;;  %v2067_v20 = vand.u32 4294901760, %v2066_v9  ;;  %v2073_v59 = vand.u32 4294901760, %v2072_v58  ;;  %v6753_v46 = vsub.f32 %v1616_v2, %v6743_v48  ;;  %v6762_v38 = vand.u32 4294901760, %v1615_v50 }
  0xd3   : > { %2056 = vmatprep.subr.mxu1 %v2055_v21  ;;  %1709 = vmatpush1.msra.mxu0 %v6589_v35  ;;  %10524 = vst [vmem:[#allocation58_spill] sm:$0xff] %v6750_v49  ;;  %v2078_v15 = vsub.f32 %v6728_v29, %v9669_v52  ;;  %v2084_v21 = vsub.f32 %v6731_v0, %v9670_v25  ;;  %v6764_v9 = vand.u32 4294901760, %v1614_v55  ;;  %v6769_v58 = vand.u32 4294901760, %v1613_v11 }
  0xd4   : > { %10525 = vst [vmem:[#allocation59_spill] sm:$0xff] %v6753_v46  ;;  %2062 = vmatpush1.msra.mxu1 %v2061_v3  ;;  %1711 = vmatprep.subr.mxu0 %v6609_v6  ;;  %10526 = vst [vmem:[#allocation60_spill] sm:$0xff] %v6762_v38  ;;  %v9679_v3 = vand.u32 4294901760, %v6750_v49  ;;  %v9682_v2 = vand.u32 4294901760, %v6753_v46  ;;  %v6773_v0 = vsub.f32 %v1615_v50, %v6762_v38  ;;  %v1610_v50 = vld [vmem:[#allocation2] sm:$0xff] }
  0xd5   : > { %10527 = vst [vmem:[#allocation61_spill] sm:$0xff] %v6764_v9  ;;  %1556 = vmatmul.mubr.f32.gmra.mxu1 %v6287_v30  ;;  %2068 = vmatprep.subr.mxu1 %v2067_v20  ;;  %10528 = vst [vmem:[#allocation62_spill] sm:$0xff] %v6769_v58  ;;  %v2079_v52 = vand.u32 4294901760, %v2078_v15  ;;  %v2085_v25 = vand.u32 4294901760, %v2084_v21  ;;  %v6776_v29 = vsub.f32 %v1614_v55, %v6764_v9  ;;  %v1611_v30 = vld [vmem:[#allocation2 + $0x8] sm:$0xff]  ;;  %v6788_v15 = vand.u32 4294901760, %v1612_v27 }
  0xd6   : > { %1713 = vmatpush1.msra.mxu0 %v6611_v1  ;;  %2074 = vmatpush1.msra.mxu1 %v2073_v59  ;;  %10529 = vst [vmem:[#allocation63_spill] sm:$0xff] %v6773_v0  ;;  %v2090_v20 = vsub.f32 %v6750_v49, %v9679_v3  ;;  %v2096_v47 = vsub.f32 %v6753_v46, %v9682_v2  ;;  %v9691_v55 = vand.u32 4294901760, %v6773_v0  ;;  %v6793_v56 = vand.u32 4294901760, %v1611_v30  ;;  %v1673_v49 = vld [vmem:[#allocation2 + $0x1f8] sm:$0xff] }
  0xd7   : > { %10530 = vst [vmem:[#allocation64_spill] sm:$0xff] %v6776_v29  ;;  %1715 = vmatprep.subr.mxu0 %v6631_v32  ;;  %v6786_v59 = vsub.f32 %v1613_v11, %v6769_v58  ;;  %10532 = vst [vmem:[#allocation66_spill] sm:$0xff] %v6788_v15  ;;  %2080 = vmatprep.subr.mxu1 %v2079_v52  ;;  %v6795_v3 = vand.u32 4294901760, %v1610_v50  ;;  %v6800_v52 = vsub.f32 %v1612_v27, %v6788_v15 }
  0xd8   : > { %1717 = vmatpush1.msra.mxu0 %v6633_v22  ;;  %10533 = vst [vmem:[#allocation67_spill] sm:$0xff] %v6793_v56  ;;  %2086 = vmatpush1.msra.mxu1 %v2085_v25  ;;  %v2091_v11 = vand.u32 4294901760, %v2090_v20  ;;  %v2097_v2 = vand.u32 4294901760, %v2096_v47  ;;  %v2102_v21 = vsub.f32 %v6773_v0, %v9691_v55  ;;  %v10536_v51 = vand.u32 4294901760, %v6776_v29 }
  0xd9   : > { %10531 = vst [vmem:[#allocation65_spill] sm:$0xff] %v6786_v59  ;;  %10534 = vst [vmem:[#allocation68_spill] sm:$0xff] %v6795_v3  ;;  %1719 = vmatprep.subr.mxu0 %v6653_v4  ;;  %v9700_v46 = vand.u32 4294901760, %v6786_v59  ;;  %v6810_v31 = vsub.f32 %v1611_v30, %v6793_v56  ;;  %v6813_v47 = vsub.f32 %v1610_v50, %v6795_v3  ;;  %v9705_v20 = vand.u32 4294901760, %v6800_v52 }
  0xda   : > { %10535 = vst [vmem:[#allocation69_spill] sm:$0xff] %v6800_v52  ;;  %1721 = vmatpush1.msra.mxu0 %v6655_v17  ;;  %v2108_v25 = vsub.f32 %v6776_v29, %v10536_v51  ;;  %2092 = vmatprep.subr.mxu1 %v2091_v11  ;;  %v6820_v55 = vand.u32 4294901760, %v1673_v49  ;;  %v6822_v0 = vand.u32 4294901760, %v1672_v57  ;;  %v1671_v51 = vld [vmem:[#allocation2 + $0x1e8] sm:$0xff]  ;;  %v1670_v29 = vld [vmem:[#allocation2 + $0x1e0] sm:$0xff]  ;;  %v2103_v30 = vand.u32 4294901760, %v2102_v21 }
  0xdb   : > { %10537 = vst [vmem:[#allocation70_spill] sm:$0xff] %v6810_v31  ;;  %10538 = vst [vmem:[#allocation71_spill] sm:$0xff] %v6813_v47  ;;  %1723 = vmatprep.subr.mxu0 %v6674_v36  ;;  %v2114_v27 = vsub.f32 %v6786_v59, %v9700_v46  ;;  %2098 = vmatpush1.msra.mxu1 %v2097_v2  ;;  %v9710_v11 = vand.u32 4294901760, %v6810_v31  ;;  %v9715_v26 = vand.u32 4294901760, %v6813_v47 }
  0xdc   : > { %10539 = vst [vmem:[#allocation72_spill] sm:$0xff] %v6820_v55  ;;  %10540 = vst [vmem:[#allocation73_spill] sm:$0xff] %v6822_v0  ;;  %1725 = vmatpush1.msra.mxu0 %v6676_v37  ;;  %v2109_v50 = vand.u32 4294901760, %v2108_v25  ;;  %v2120_v59 = vsub.f32 %v6800_v52, %v9705_v20  ;;  %v6832_v36 = vsub.f32 %v1673_v49, %v6820_v55  ;;  %2104 = vmatprep.subr.mxu1 %v2103_v30  ;;  %v1668_v49 = vld [vmem:[#allocation2 + $0x1d0] sm:$0xff] }
  0xdd   : > { %1727 = vmatprep.subr.mxu0 %v6696_v13  ;;  %v2115_v46 = vand.u32 4294901760, %v2114_v27  ;;  %v6835_v2 = vsub.f32 %v1672_v57, %v6822_v0  ;;  %v2126_v21 = vsub.f32 %v6810_v31, %v9710_v11  ;;  %v2132_v25 = vsub.f32 %v6813_v47, %v9715_v26  ;;  %v1667_v11 = vld [vmem:[#allocation2 + $0x1c8] sm:$0xff]  ;;  %v1666_v31 = vld [vmem:[#allocation2 + $0x1c0] sm:$0xff] }
  0xde   : > { %10541 = vst [vmem:[#allocation74_spill] sm:$0xff] %v6832_v36  ;;  %1729 = vmatpush1.msra.mxu0 %v6698_v23  ;;  %v6844_v27 = vand.u32 4294901760, %v1671_v51  ;;  %v6846_v20 = vand.u32 4294901760, %v1670_v29  ;;  %2110 = vmatpush1.msra.mxu1 %v2109_v50  ;;  %v2121_v52 = vand.u32 4294901760, %v2120_v59  ;;  %v9720_v57 = vand.u32 4294901760, %v6832_v36 }
  0xdf   : > { %10542 = vst [vmem:[#allocation75_spill] sm:$0xff] %v6835_v2  ;;  %1731 = vmatprep.subr.mxu0 %v6719_v45  ;;  %v9723_v30 = vand.u32 4294901760, %v6835_v2  ;;  %v6851_v23 = vand.u32 4294901760, %v1669_v41  ;;  %2116 = vmatprep.subr.mxu1 %v2115_v46  ;;  %v2127_v13 = vand.u32 4294901760, %v2126_v21  ;;  %v2133_v26 = vand.u32 4294901760, %v2132_v25 }
  0xe0   : > { %10543 = vst [vmem:[#allocation76_spill] sm:$0xff] %v6844_v27  ;;  %10544 = vst [vmem:[#allocation77_spill] sm:$0xff] %v6846_v20  ;;  %1733 = vmatpush1.msra.mxu0 %v6721_v34  ;;  %v6855_v47 = vsub.f32 %v1671_v51, %v6844_v27  ;;  %v6858_v59 = vsub.f32 %v1670_v29, %v6846_v20  ;;  %2122 = vmatpush1.msra.mxu1 %v2121_v52  ;;  %v6870_v25 = vand.u32 4294901760, %v1668_v49 }
  0xe1   : > { %10545 = vst [vmem:[#allocation78_spill] sm:$0xff] %v6851_v23  ;;  %1735 = vmatprep.subr.mxu0 %v6741_v12  ;;  %v2138_v50 = vsub.f32 %v6832_v36, %v9720_v57  ;;  %v2144_v46 = vsub.f32 %v6835_v2, %v9723_v30  ;;  %v6868_v21 = vsub.f32 %v1669_v41, %v6851_v23  ;;  %v6875_v51 = vand.u32 4294901760, %v1667_v11  ;;  %v1665_v57 = vld [vmem:[#allocation2 + $0x1b8] sm:$0xff]  ;;  %v1664_v36 = vld [vmem:[#allocation2 + $0x1b0] sm:$0xff] }
  0xe2   : > { %10546 = vst [vmem:[#allocation79_spill] sm:$0xff] %v6855_v47  ;;  %10547 = vst [vmem:[#allocation80_spill] sm:$0xff] %v6858_v59  ;;  %2128 = vmatprep.subr.mxu1 %v2127_v13  ;;  %1737 = vmatpush1.msra.mxu0 %v6743_v48  ;;  %v9730_v29 = vand.u32 4294901760, %v6855_v47  ;;  %v6877_v12 = vand.u32 4294901760, %v1666_v31  ;;  %v6882_v13 = vsub.f32 %v1668_v49, %v6870_v25  ;;  %v10553_v48 = vand.u32 4294901760, %v6858_v59 }
  0xe3   : > { %10548 = vst [vmem:[#allocation81_spill] sm:$0xff] %v6868_v21  ;;  %10549 = vst [vmem:[#allocation82_spill] sm:$0xff] %v6870_v25  ;;  %2134 = vmatpush1.msra.mxu1 %v2133_v26  ;;  %v2139_v30 = vand.u32 4294901760, %v2138_v50  ;;  %v2145_v2 = vand.u32 4294901760, %v2144_v46  ;;  %1739 = vmatprep.subr.mxu0 %v6762_v38  ;;  %v9741_v41 = vand.u32 4294901760, %v6868_v21  ;;  %v6892_v26 = vsub.f32 %v1667_v11, %v6875_v51 }
  0xe4   : > { %10550 = vst [vmem:[#allocation83_spill] sm:$0xff] %v6875_v51  ;;  %10551 = vst [vmem:[#allocation84_spill] sm:$0xff] %v6877_v12  ;;  %v2150_v52 = vsub.f32 %v6855_v47, %v9730_v29  ;;  %1741 = vmatpush1.msra.mxu0 %v6764_v9  ;;  %v2156_v34 = vsub.f32 %v6858_v59, %v10553_v48  ;;  %v6895_v50 = vsub.f32 %v1666_v31, %v6877_v12  ;;  %v1663_v48 = vld [vmem:[#allocation2 + $0x1a8] sm:$0xff]  ;;  %v1662_v59 = vld [vmem:[#allocation2 + $0x1a0] sm:$0xff] }
  0xe5   : > { %10552 = vst [vmem:[#allocation85_spill] sm:$0xff] %v6882_v13  ;;  %10554 = vst [vmem:[#allocation86_spill] sm:$0xff] %v6892_v26  ;;  %2140 = vmatprep.subr.mxu1 %v2139_v30  ;;  %1743 = vmatprep.subr.mxu0 %v6769_v58  ;;  %v2162_v49 = vsub.f32 %v6868_v21, %v9741_v41  ;;  %v9744_v46 = vand.u32 4294901760, %v6882_v13  ;;  %v6902_v29 = vand.u32 4294901760, %v1665_v57  ;;  %v6904_v47 = vand.u32 4294901760, %v1664_v36  ;;  %v1661_v58 = vld [vmem:[#allocation2 + $0x198] sm:$0xff] }
  0xe6   : > { %10555 = vst [vmem:[#allocation87_spill] sm:$0xff] %v6895_v50  ;;  %2146 = vmatpush2.msra.mxu1 %v2145_v2  ;;  %v2151_v11 = vand.u32 4294901760, %v2150_v52  ;;  %v2157_v9 = vand.u32 4294901760, %v2156_v34  ;;  %1745 = vmatpush1.msra.mxu0 %v6788_v15  ;;  %v9747_v31 = vand.u32 4294901760, %v6892_v26  ;;  %v9754_v30 = vand.u32 4294901760, %v6895_v50 }
  0xe7   : > { %10556 = vst [vmem:[#allocation88_spill] sm:$0xff] %v6902_v29  ;;  %10557 = vst [vmem:[#allocation89_spill] sm:$0xff] %v6904_v47  ;;  %v2163_v38 = vand.u32 4294901760, %v2162_v49  ;;  %v2168_v41 = vsub.f32 %v6882_v13, %v9744_v46  ;;  %1747 = vmatprep.subr.mxu0 %v6793_v56  ;;  %v6914_v21 = vsub.f32 %v1665_v57, %v6902_v29  ;;  %v6926_v49 = vand.u32 4294901760, %v1663_v48  ;;  %v1660_v57 = vld [vmem:[#allocation2 + $0x190] sm:$0xff] }
  0xe8   : > { %v6917_v2 = vsub.f32 %v1664_v36, %v6904_v47  ;;  %2152 = vmatprep.subr.mxu1 %v2151_v11  ;;  %v2174_v34 = vsub.f32 %v6892_v26, %v9747_v31  ;;  %1749 = vmatpush1.msra.mxu0 %v6795_v3  ;;  %v2180_v52 = vsub.f32 %v6895_v50, %v9754_v30  ;;  %v6928_v46 = vand.u32 4294901760, %v1662_v59  ;;  %v1659_v26 = vld [vmem:[#allocation2 + $0x188] sm:$0xff]  ;;  %v1658_v3 = vld [vmem:[#allocation2 + $0x180] sm:$0xff] }
  0xe9   : > { %10558 = vst [vmem:[#allocation90_spill] sm:$0xff] %v6914_v21  ;;  %10560 = vst [vmem:[#allocation92_spill] sm:$0xff] %v6926_v49  ;;  %2158 = vmatpush2.msra.mxu1 %v2157_v9  ;;  %v2169_v13 = vand.u32 4294901760, %v2168_v41  ;;  %1751 = vmatprep.subr.mxu0 %v6820_v55  ;;  %v9759_v36 = vand.u32 4294901760, %v6914_v21  ;;  %v6933_v31 = vand.u32 4294901760, %v1661_v58  ;;  %v6937_v50 = vsub.f32 %v1663_v48, %v6926_v49 }
  0xea   : > { %10559 = vst [vmem:[#allocation91_spill] sm:$0xff] %v6917_v2  ;;  %10561 = vst [vmem:[#allocation93_spill] sm:$0xff] %v6928_v46  ;;  %v9760_v11 = vand.u32 4294901760, %v6917_v2  ;;  %2164 = vmatprep.subr.mxu1 %v2163_v38  ;;  %v2175_v56 = vand.u32 4294901760, %v2174_v34  ;;  %v2181_v30 = vand.u32 4294901760, %v2180_v52  ;;  %1753 = vmatpush2.msra.mxu0 %v6822_v0  ;;  %v6940_v9 = vsub.f32 %v1662_v59, %v6928_v46 }
  0xeb   : > { %10562 = vst [vmem:[#allocation94_spill] sm:$0xff] %v6933_v31  ;;  %10563 = vst [vmem:[#allocation95_spill] sm:$0xff] %v6937_v50  ;;  %2170 = vmatpush2.msra.mxu1 %v2169_v13  ;;  %v2186_v41 = vsub.f32 %v6914_v21, %v9759_v36  ;;  %1755 = vmatprep.subr.mxu0 %v6844_v27  ;;  %v6950_v38 = vsub.f32 %v1661_v58, %v6933_v31  ;;  %v6952_v34 = vand.u32 4294901760, %v1660_v57  ;;  %v1657_v36 = vld [vmem:[#allocation2 + $0x178] sm:$0xff] }
  0xec   : > { %10564 = vst [vmem:[#allocation96_spill] sm:$0xff] %v6940_v9  ;;  %v2192_v55 = vsub.f32 %v6917_v2, %v9760_v11  ;;  %2176 = vmatprep.subr.mxu1 %v2175_v56  ;;  %v9769_v59 = vand.u32 4294901760, %v6937_v50  ;;  %1757 = vmatpush2.msra.mxu0 %v6846_v20  ;;  %v6957_v48 = vand.u32 4294901760, %v1659_v26  ;;  %v6959_v52 = vand.u32 4294901760, %v1658_v3  ;;  %v1656_v11 = vld [vmem:[#allocation2 + $0x170] sm:$0xff] }
  0xed   : > { %10565 = vst [vmem:[#allocation97_spill] sm:$0xff] %v6950_v38  ;;  %10566 = vst [vmem:[#allocation98_spill] sm:$0xff] %v6952_v34  ;;  %2182 = vmatpush2.msra.mxu1 %v2181_v30  ;;  %v2187_v2 = vand.u32 4294901760, %v2186_v41  ;;  %1759 = vmatprep.subr.mxu0 %v6851_v23  ;;  %v9776_v58 = vand.u32 4294901760, %v6950_v38  ;;  %v6964_v56 = vsub.f32 %v1660_v57, %v6952_v34  ;;  %v10570_v20 = vand.u32 4294901760, %v6940_v9 }
  0xee   : > { %10567 = vst [vmem:[#allocation99_spill] sm:$0xff] %v6957_v48  ;;  %10568 = vst [vmem:[#allocation100_spill] sm:$0xff] %v6959_v52  ;;  %v2193_v21 = vand.u32 4294901760, %v2192_v55  ;;  %v2198_v13 = vsub.f32 %v6937_v50, %v9769_v59  ;;  %1761 = vmatpush2.msra.mxu0 %v6870_v25  ;;  %v6974_v30 = vsub.f32 %v1659_v26, %v6957_v48  ;;  %v6984_v59 = vand.u32 4294901760, %v1657_v36  ;;  %v1654_v50 = vld [vmem:[#allocation2 + $0x160] sm:$0xff] }
  0xef   : > { %10569 = vst [vmem:[#allocation101_spill] sm:$0xff] %v6964_v56  ;;  %v2204_v27 = vsub.f32 %v6940_v9, %v10570_v20  ;;  %v6977_v55 = vsub.f32 %v1658_v3, %v6959_v52  ;;  %2188 = vmatprep.subr.mxu1 %v2187_v2  ;;  %v2210_v57 = vsub.f32 %v6950_v38, %v9776_v58  ;;  %v9783_v41 = vand.u32 4294901760, %v6964_v56  ;;  %v1655_v9 = vld [vmem:[#allocation2 + $0x168] sm:$0xff]  ;;  %v1653_v58 = vld [vmem:[#allocation2 + $0x158] sm:$0xff] }
  0xf0   : > { %10571 = vst [vmem:[#allocation102_spill] sm:$0xff] %v6974_v30  ;;  %1763 = vmatprep.subr.mxu0 %v6875_v51  ;;  %10573 = vst [vmem:[#allocation104_spill] sm:$0xff] %v6984_v59  ;;  %v6986_v20 = vand.u32 4294901760, %v1656_v11  ;;  %2194 = vmatpush2.msra.mxu1 %v2193_v21  ;;  %v2199_v26 = vand.u32 4294901760, %v2198_v13  ;;  %v9786_v3 = vand.u32 4294901760, %v6974_v30  ;;  %v6996_v23 = vsub.f32 %v1657_v36, %v6984_v59  ;;  %v1652_v36 = vld [vmem:[#allocation2 + $0x150] sm:$0xff] }
  0xf1   : > { %10572 = vst [vmem:[#allocation103_spill] sm:$0xff] %v6977_v55  ;;  %v2205_v25 = vand.u32 4294901760, %v2204_v27  ;;  %1765 = vmatpush2.msra.mxu0 %v6877_v12  ;;  %v9791_v2 = vand.u32 4294901760, %v6977_v55  ;;  %v2211_v38 = vand.u32 4294901760, %v2210_v57  ;;  %v2216_v51 = vsub.f32 %v6964_v56, %v9783_v41 }
  0xf2   : > { %10574 = vst [vmem:[#allocation105_spill] sm:$0xff] %v6986_v20  ;;  %1767 = vmatprep.subr.mxu0 %v6902_v29  ;;  %10575 = vst [vmem:[#allocation106_spill] sm:$0xff] %v6996_v23  ;;  %v6999_v21 = vsub.f32 %v1656_v11, %v6986_v20  ;;  %2200 = vmatprep.subr.mxu1 %v2199_v26  ;;  %v2222_v27 = vsub.f32 %v6974_v30, %v9786_v3  ;;  %v7008_v57 = vand.u32 4294901760, %v1655_v9  ;;  %v1651_v30 = vld [vmem:[#allocation2 + $0x148] sm:$0xff]  ;;  %v1650_v29 = vld [vmem:[#allocation2 + $0x140] sm:$0xff] }
  0xf3   : > { %v2228_v13 = vsub.f32 %v6977_v55, %v9791_v2  ;;  %1769 = vmatpush2.msra.mxu0 %v6904_v47  ;;  %v7010_v41 = vand.u32 4294901760, %v1654_v50  ;;  %2206 = vmatpush2.msra.mxu1 %v2205_v25  ;;  %v2217_v56 = vand.u32 4294901760, %v2216_v51  ;;  %v9798_v11 = vand.u32 4294901760, %v6996_v23 }
  0xf4   : > { %10576 = vst [vmem:[#allocation107_spill] sm:$0xff] %v6999_v21  ;;  %10577 = vst [vmem:[#allocation108_spill] sm:$0xff] %v7008_v57  ;;  %v9799_v26 = vand.u32 4294901760, %v6999_v21  ;;  %1771 = vmatprep.subr.mxu0 %v6926_v49  ;;  %v7015_v3 = vand.u32 4294901760, %v1653_v58  ;;  %2212 = vmatprep.subr.mxu1 %v2211_v38  ;;  %v2223_v2 = vand.u32 4294901760, %v2222_v27  ;;  %v7018_v47 = vsub.f32 %v1655_v9, %v7008_v57 }
  0xf5   : > { %10578 = vst [vmem:[#allocation109_spill] sm:$0xff] %v7010_v41  ;;  %v2229_v55 = vand.u32 4294901760, %v2228_v13  ;;  %1773 = vmatpush2.msra.mxu0 %v6928_v46  ;;  %v7022_v25 = vsub.f32 %v1654_v50, %v7010_v41  ;;  %2218 = vmatpush2.msra.mxu1 %v2217_v56  ;;  %v2234_v51 = vsub.f32 %v6996_v23, %v9798_v11  ;;  %v7034_v9 = vand.u32 4294901760, %v1652_v36  ;;  %v1649_v11 = vld [vmem:[#allocation2 + $0x138] sm:$0xff] }
  0xf6   : > { %10579 = vst [vmem:[#allocation110_spill] sm:$0xff] %v7015_v3  ;;  %10580 = vst [vmem:[#allocation111_spill] sm:$0xff] %v7018_v47  ;;  %v2240_v49 = vsub.f32 %v6999_v21, %v9799_v26  ;;  %1775 = vmatprep.subr.mxu0 %v6933_v31  ;;  %v7032_v38 = vsub.f32 %v1653_v58, %v7015_v3  ;;  %2224 = vmatprep.subr.mxu1 %v2223_v2  ;;  %v9811_v50 = vand.u32 4294901760, %v7018_v47  ;;  %v1648_v26 = vld [vmem:[#allocation2 + $0x130] sm:$0xff] }
  0xf7   : > { %10581 = vst [vmem:[#allocation112_spill] sm:$0xff] %v7022_v25  ;;  %10583 = vst [vmem:[#allocation114_spill] sm:$0xff] %v7034_v9  ;;  %v9810_v56 = vand.u32 4294901760, %v7022_v25  ;;  %1777 = vmatpush2.msra.mxu0 %v6952_v34  ;;  %v7039_v27 = vand.u32 4294901760, %v1651_v30  ;;  %v7041_v13 = vand.u32 4294901760, %v1650_v29  ;;  %2230 = vmatpush2.msra.mxu1 %v2229_v55  ;;  %v2235_v21 = vand.u32 4294901760, %v2234_v51 }
  0xf8   : > { %10582 = vst [vmem:[#allocation113_spill] sm:$0xff] %v7032_v38  ;;  %v2241_v23 = vand.u32 4294901760, %v2240_v49  ;;  %v9816_v58 = vand.u32 4294901760, %v7032_v38  ;;  %v7045_v31 = vsub.f32 %v1652_v36, %v7034_v9  ;;  %1779 = vmatprep.subr.mxu0 %v6957_v48  ;;  %v2246_v2 = vsub.f32 %v7018_v47, %v9811_v50  ;;  %v1646_v50 = vld [vmem:[#allocation2 + $0x120] sm:$0xff] }
  0xf9   : > { %10584 = vst [vmem:[#allocation115_spill] sm:$0xff] %v7039_v27  ;;  %10585 = vst [vmem:[#allocation116_spill] sm:$0xff] %v7041_v13  ;;  %v2252_v34 = vsub.f32 %v7022_v25, %v9810_v56  ;;  %v7055_v46 = vsub.f32 %v1651_v30, %v7039_v27  ;;  %1781 = vmatpush2.msra.mxu0 %v6959_v52  ;;  %v7059_v49 = vsub.f32 %v1650_v29, %v7041_v13  ;;  %v1647_v30 = vld [vmem:[#allocation2 + $0x128] sm:$0xff] }
  0xfa   : > { %10586 = vst [vmem:[#allocation117_spill] sm:$0xff] %v7045_v31  ;;  %2236 = vmatprep.subr.mxu1 %v2235_v21  ;;  %v2258_v55 = vsub.f32 %v7032_v38, %v9816_v58  ;;  %v9825_v36 = vand.u32 4294901760, %v7045_v31  ;;  %1783 = vmatprep.subr.mxu0 %v6984_v59  ;;  %v7066_v51 = vand.u32 4294901760, %v1649_v11  ;;  %v7068_v56 = vand.u32 4294901760, %v1648_v26  ;;  %v1645_v58 = vld [vmem:[#allocation2 + $0x118] sm:$0xff] }
  0xfb   : > { %10587 = vst [vmem:[#allocation118_spill] sm:$0xff] %v7055_v46  ;;  %10588 = vst [vmem:[#allocation119_spill] sm:$0xff] %v7059_v49  ;;  %2242 = vmatpush2.msra.mxu1 %v2241_v23  ;;  %v2247_v25 = vand.u32 4294901760, %v2246_v2  ;;  %v2253_v47 = vand.u32 4294901760, %v2252_v34  ;;  %v9826_v29 = vand.u32 4294901760, %v7055_v46  ;;  %v9831_v21 = vand.u32 4294901760, %v7059_v49  ;;  %1785 = vmatpush2.msra.mxu0 %v6986_v20 }
  0xfc   : > { %10589 = vst [vmem:[#allocation120_spill] sm:$0xff] %v7066_v51  ;;  %10590 = vst [vmem:[#allocation121_spill] sm:$0xff] %v7068_v56  ;;  %v2259_v38 = vand.u32 4294901760, %v2258_v55  ;;  %v2264_v59 = vsub.f32 %v7045_v31, %v9825_v36  ;;  %v7077_v52 = vsub.f32 %v1649_v11, %v7066_v51  ;;  %v7080_v48 = vsub.f32 %v1648_v26, %v7068_v56  ;;  %v1644_v55 = vld [vmem:[#allocation2 + $0x110] sm:$0xff]  ;;  %v1642_v31 = vld [vmem:[#allocation2 + $0x100] sm:$0xff] }
  0xfd   : > { %1787 = vmatprep.subr.mxu0 %v7008_v57  ;;  %2248 = vmatprep.subr.mxu1 %v2247_v25  ;;  %v2270_v23 = vsub.f32 %v7055_v46, %v9826_v29  ;;  %v2276_v34 = vsub.f32 %v7059_v49, %v9831_v21  ;;  %v7089_v2 = vand.u32 4294901760, %v1647_v30  ;;  %v7092_v11 = vand.u32 4294901760, %v1646_v50  ;;  %v1643_v46 = vld [vmem:[#allocation2 + $0x108] sm:$0xff] }
  0xfe   : > { %10591 = vst [vmem:[#allocation122_spill] sm:$0xff] %v7077_v52  ;;  %10592 = vst [vmem:[#allocation123_spill] sm:$0xff] %v7080_v48  ;;  %1789 = vmatpush2.msra.mxu0 %v7010_v41  ;;  %2254 = vmatpush2.msra.mxu1 %v2253_v47  ;;  %v2265_v26 = vand.u32 4294901760, %v2264_v59  ;;  %v9839_v36 = vand.u32 4294901760, %v7077_v52  ;;  %v9838_v25 = vand.u32 4294901760, %v7080_v48  ;;  %v7097_v29 = vand.u32 4294901760, %v1645_v58 }
  0xff   : > { %10593 = vst [vmem:[#allocation124_spill] sm:$0xff] %v7089_v2  ;;  %10594 = vst [vmem:[#allocation125_spill] sm:$0xff] %v7092_v11  ;;  %1791 = vmatprep.subr.mxu0 %v7015_v3  ;;  %2260 = vmatprep.subr.mxu1 %v2259_v38  ;;  %v2271_v21 = vand.u32 4294901760, %v2270_v23  ;;  %v2277_v49 = vand.u32 4294901760, %v2276_v34  ;;  %v7100_v41 = vsub.f32 %v1647_v30, %v7089_v2  ;;  %v7115_v23 = vand.u32 4294901760, %v1644_v55 }
 0x100   : > { %10595 = vst [vmem:[#allocation126_spill] sm:$0xff] %v7097_v29  ;;  %v7103_v57 = vsub.f32 %v1646_v50, %v7092_v11  ;;  %1793 = vmatpush2.msra.mxu0 %v7034_v9  ;;  %2266 = vmatpush2.msra.mxu1 %v2265_v26  ;;  %v2282_v47 = vsub.f32 %v7077_v52, %v9839_v36  ;;  %v7120_v34 = vand.u32 4294901760, %v1643_v46  ;;  %v7123_v26 = vand.u32 4294901760, %v1642_v31 }
 0x101   : > { %10596 = vst [vmem:[#allocation127_spill] sm:$0xff] %v7100_v41  ;;  %v2288_v59 = vsub.f32 %v7080_v48, %v9838_v25  ;;  %v7113_v38 = vsub.f32 %v1645_v58, %v7097_v29  ;;  %10599 = vst [vmem:[#allocation130_spill] sm:$0xff] %v7115_v23  ;;  %1795 = vmatprep.subr.mxu0 %v7039_v27  ;;  %2272 = vmatprep.subr.mxu1 %v2271_v21  ;;  %v9847_v50 = vand.u32 4294901760, %v7100_v41 }
 0x102   : > { %10597 = vst [vmem:[#allocation128_spill] sm:$0xff] %v7103_v57  ;;  %v9846_v30 = vand.u32 4294901760, %v7103_v57  ;;  %10600 = vst [vmem:[#allocation131_spill] sm:$0xff] %v7120_v34  ;;  %1797 = vmatpush2.msra.mxu0 %v7041_v13  ;;  %2278 = vmatpush2.msra.mxu1 %v2277_v49  ;;  %v2283_v25 = vand.u32 4294901760, %v2282_v47  ;;  %v7127_v48 = vsub.f32 %v1644_v55, %v7115_v23 }
 0x103   : > { %10598 = vst [vmem:[#allocation129_spill] sm:$0xff] %v7113_v38  ;;  %10601 = vst [vmem:[#allocation132_spill] sm:$0xff] %v7123_v26  ;;  %v2289_v36 = vand.u32 4294901760, %v2288_v59  ;;  %v9851_v58 = vand.u32 4294901760, %v7113_v38  ;;  %1799 = vmatprep.subr.mxu0 %v7066_v51  ;;  %v2294_v21 = vsub.f32 %v7100_v41, %v9847_v50  ;;  %v7137_v13 = vsub.f32 %v1643_v46, %v7120_v34 }
 0x104   : > { %10602 = vst [vmem:[#allocation133_spill] sm:$0xff] %v7127_v48  ;;  %v2300_v52 = vsub.f32 %v7103_v57, %v9846_v30  ;;  %v7140_v49 = vsub.f32 %v1642_v31, %v7123_v26  ;;  %1801 = vmatpush2.msra.mxu0 %v7068_v56  ;;  %2284 = vmatprep.subr.mxu1 %v2283_v25  ;;  %v9848_v47 = vand.u32 4294901760, %v7127_v48 }
 0x105   : > { %10603 = vst [vmem:[#allocation134_spill] sm:$0xff] %v7137_v13  ;;  %v2306_v55 = vsub.f32 %v7113_v38, %v9851_v58  ;;  %1803 = vmatprep.subr.mxu0 %v7089_v2  ;;  %2290 = vmatpush2.msra.mxu1 %v2289_v36  ;;  %v2295_v59 = vand.u32 4294901760, %v2294_v21  ;;  %v9850_v46 = vand.u32 4294901760, %v7137_v13 }
 0x106   : > { %10604 = vst [vmem:[#allocation135_spill] sm:$0xff] %v7140_v49  ;;  %v2301_v30 = vand.u32 4294901760, %v2300_v52  ;;  %v9849_v50 = vand.u32 4294901760, %v7140_v49  ;;  %1805 = vmatpush2.msra.mxu0 %v7092_v11  ;;  %v2312_v25 = vsub.f32 %v7127_v48, %v9848_v47 }
 0x107   : > { %v2307_v31 = vand.u32 4294901760, %v2306_v55  ;;  %1807 = vmatprep.subr.mxu0 %v7097_v29  ;;  %2296 = vmatprep.subr.mxu1 %v2295_v59  ;;  %v2318_v36 = vsub.f32 %v7137_v13, %v9850_v46  ;;  %v354_v46 = vlaneseq }
 0x108   : > { %v2324_v52 = vsub.f32 %v7140_v49, %v9849_v50  ;;  %1809 = vmatpush2.msra.mxu0 %v7115_v23  ;;  %2302 = vmatpush2.msra.mxu1 %v2301_v30  ;;  %v2313_v21 = vand.u32 4294901760, %v2312_v25 }
 0x109   : > { %1811 = vmatprep.subr.mxu0 %v7120_v34  ;;  %2308 = vmatprep.subr.mxu1 %v2307_v31  ;;  %v2319_v55 = vand.u32 4294901760, %v2318_v36  ;;  %v355_v49 = vshrl.u32 %v354_v46, 7 }
 0x10a   : > { %v2325_v47 = vand.u32 4294901760, %v2324_v52  ;;  %1813 = vmatpush2.msra.mxu0 %v7123_v26  ;;  %2314 = vmatpush2.msra.mxu1 %v2313_v21 }
 0x10b   : > { %2394 = vmatprep.subr.mxu0 %v6483_v14  ;;  %2320 = vmatprep.subr.mxu1 %v2319_v55  ;;  %v7196_v41 = vsub.s32 0, %v355_v49  ;;  %v7244_v53 = vsub.s32 1, %v355_v49 }
 0x10c   : > { %2326 = vmatpush2.msra.mxu1 %v2325_v47 }
 0x10d   : > { %2666 = vmatprep.subr.mxu1 %v6472_v61  ;;  %10605 = vst [vmem:[#allocation136_spill] sm:$0xff] %v7196_v41  ;;  %v352_v61 = vld [vmem:[%s9532_s2] sm:$0x3]  ;;  %10607 = vst [vmem:[#allocation138_spill] sm:$0xff] %v7244_v53 }
 0x10e   : > { %v357_v23 = vrot.slane %v352_v61, %v7196_v41  ;;  %v361_v18 = vrot.slane %v352_v61, %v7244_v53 }
 0x112   : > { %v7166_v59 = vpop.f32.mrf.mxu0 }
 0x113   : > { %v468_v54 = vadd.f32 %v7166_v59, %v357_v23 }
 0x114   : > { %v7168_v50 = vpop.f32.mrf.mxu0 }
 0x116   : > { %v7170_v30 = vpop.f32.mrf.mxu0 }
 0x117   : > { %v479_v19 = vadd.f32 %v7170_v30, %v357_v23 }
 0x118   : > { %v7172_v25 = vpop.f32.mrf.mxu0 }
 0x119   : > { %v481_v49 = vadd.f32 %v7172_v25, %v361_v18 }
 0x11c   : > { %v7176_v36 = vpop.f32.mrf.mxu0 }
 0x11d   : > { %v7174_v31 = vpop.f32.mrf.mxu1  ;;  %v490_v28 = vadd.f32 %v7176_v36, %v357_v23 }
 0x11e   : > { %v7180_v21 = vpop.f32.mrf.mxu0 }
 0x11f   : > { %v7178_v52 = vpop.f32.mrf.mxu1  ;;  %v492_v61 = vadd.f32 %v7180_v21, %v361_v18 }
 0x122   : > { %v7182_v55 = vpop.f32.mrf.mxu0  ;;  %v7184_v47 = vpop.f32.mrf.mxu1 }
 0x124   : > { %v7186_v58 = vpop.f32.mrf.mxu0  ;;  %v7188_v14 = vpop.f32.mrf.mxu1 }
 0x125   : > { %v503_v30 = vadd.f32 %v7186_v58, %v361_v18  ;;  %v786_v36 = vadd.f32 %v7188_v14, %v481_v49 }
 0x128   : > { %v511_v13 = vpop.f32.mrf.mxu0  ;;  %v7190_v48 = vpop.f32.mrf.mxu1 }
 0x129   : > { %v512_v11 = vadd.f32 %v511_v13, %v357_v23 }
 0x12a   : > { %v7192_v38 = vpop.f32.mrf.mxu0  ;;  %v7194_v57 = vpop.f32.mrf.mxu1 }
 0x12b   : > { %v514_v25 = vadd.f32 %v7192_v38, %v361_v18 }
 0x12e   : > { %v522_v26 = vpop.f32.mrf.mxu0  ;;  %v7201_v34 = vpop.f32.mrf.mxu1 }
 0x12f   : > { %v523_v3 = vadd.f32 %v522_v26, %v357_v23 }
 0x130   : > { %v7204_v29 = vpop.f32.mrf.mxu0  ;;  %v7206_v46 = vpop.f32.mrf.mxu1 }
 0x134   : > { %v533_v2 = vpop.f32.mrf.mxu0  ;;  %v804_v56 = vpop.f32.mrf.mxu1 }
 0x135   : > { %v7208_v51 = vadd.f32 %v804_v56, %v512_v11  ;;  %v534_v45 = vadd.f32 %v533_v2, %v357_v23 }
 0x136   : > { %v7210_v27 = vpop.f32.mrf.mxu0  ;;  %v7212_v9 = vpop.f32.mrf.mxu1 }
 0x137   : > { %v807_v14 = vadd.f32 %v7212_v9, %v514_v25 }
 0x13a   : > { %v544_v20 = vpop.f32.mrf.mxu0  ;;  %v811_v12 = vpop.f32.mrf.mxu1 }
 0x13b   : > { %v7214_v0 = vadd.f32 %v811_v12, %v523_v3  ;;  %v545_v17 = vadd.f32 %v544_v20, %v357_v23 }
 0x13c   : > { %v7216_v15 = vpop.f32.mrf.mxu0  ;;  %v7218_v41 = vpop.f32.mrf.mxu1 }
 0x13d   : > { %v547_v58 = vadd.f32 %v7216_v15, %v361_v18 }
 0x140   : > { %v818_v37 = vpop.f32.mrf.mxu1  ;;  %v962_v13 = vpop.f32.mrf.mxu0 }
 0x141   : > { %v7220_v7 = vadd.f32 %v818_v37, %v534_v45 }
 0x142   : > { %v7222_v56 = vpop.f32.mrf.mxu1  ;;  %v964_v11 = vpop.f32.mrf.mxu0 }
 0x146   : > { %v825_v62 = vpop.f32.mrf.mxu1  ;;  %v970_v39 = vpop.f32.mrf.mxu0 }
 0x147   : > { %v7224_v26 = vadd.f32 %v825_v62, %v545_v17 }
 0x148   : > { %v827_v4 = vpop.f32.mrf.mxu1  ;;  %v972_v12 = vpop.f32.mrf.mxu0 }
 0x149   : > { %10606 = vst [vmem:[#allocation137_spill] sm:$0xff] %v7224_v26  ;;  %v470_v26 = vadd.f32 %v7168_v50, %v361_v18  ;;  %v791_v50 = vadd.f32 %v7190_v48, %v490_v28  ;;  %v973_v49 = vadd.f32 %v972_v12, %v786_v36 }
 0x14c   : > { %v978_v3 = vpop.f32.mrf.mxu0  ;;  %v1124_v44 = vpop.f32.mrf.mxu1 }
 0x14e   : > { %v980_v22 = vpop.f32.mrf.mxu0  ;;  %v1126_v43 = vpop.f32.mrf.mxu1 }
 0x152   : > { %v986_v16 = vpop.f32.mrf.mxu0  ;;  %v1133_v2 = vpop.f32.mrf.mxu1 }
 0x154   : > { %v988_v32 = vpop.f32.mrf.mxu0  ;;  %v1135_v10 = vpop.f32.mrf.mxu1 }
 0x155   : > { %v1136_v9 = vadd.f32 %v1135_v10, %v973_v49 }
 0x158   : > { %v994_v37 = vpop.f32.mrf.mxu0  ;;  %v1142_v45 = vpop.f32.mrf.mxu1 }
 0x15a   : > { %v996_v1 = vpop.f32.mrf.mxu0  ;;  %v7226_v5 = vpop.f32.mrf.mxu1 }
 0x15e   : > { %v7228_v20 = vpop.f32.mrf.mxu0  ;;  %v7230_v40 = vpop.f32.mrf.mxu1 }
 0x160   : > { %v7232_v62 = vpop.f32.mrf.mxu0  ;;  %v7234_v17 = vpop.f32.mrf.mxu1 }
 0x164   : > { %v7236_v6 = vpop.f32.mrf.mxu0  ;;  %v7238_v42 = vpop.f32.mrf.mxu1 }
 0x165   : > { %v1011_v10 = vadd.f32 %v7236_v6, %v7220_v7 }
 0x166   : > { %v7240_v35 = vpop.f32.mrf.mxu0  ;;  %v7242_v63 = vpop.f32.mrf.mxu1 }
 0x16a   : > { %v7246_v33 = vpop.f32.mrf.mxu0  ;;  %v7248_v24 = vpop.f32.mrf.mxu1 }
 0x16b   : > { %10608 = vst [vmem:[#allocation139_spill] sm:$0xff] %v7246_v33  ;;  %10609 = vst [vmem:[#allocation140_spill] sm:$0xff] %v7248_v24  ;;  %v501_v33 = vadd.f32 %v7182_v55, %v357_v23  ;;  %v777_v24 = vadd.f32 %v7174_v31, %v468_v54  ;;  %v793_v23 = vadd.f32 %v7194_v57, %v492_v61 }
 0x16c   : > { %v7252_v60 = vpop.f32.mrf.mxu0  ;;  %v7254_v8 = vpop.f32.mrf.mxu1  ;;  %v525_v54 = vadd.f32 %v7204_v29, %v361_v18 }
 0x16d   : > { %10610 = vst [vmem:[#allocation141_spill] sm:$0xff] %v7252_v60  ;;  %10611 = vst [vmem:[#allocation142_spill] sm:$0xff] %v7254_v8  ;;  %v779_v60 = vadd.f32 %v7178_v52, %v470_v26  ;;  %v784_v8 = vadd.f32 %v7184_v47, %v479_v19  ;;  %v798_v55 = vadd.f32 %v7201_v34, %v501_v33 }
 0x16e   : > { %v800_v52 = vadd.f32 %v7206_v46, %v503_v30  ;;  %v536_v19 = vadd.f32 %v7210_v27, %v361_v18  ;;  %v814_v28 = vadd.f32 %v7218_v41, %v525_v54  ;;  %v963_v48 = vadd.f32 %v962_v13, %v777_v24 }
 0x16f   : > { %v965_v38 = vadd.f32 %v964_v11, %v779_v60  ;;  %v971_v29 = vadd.f32 %v970_v39, %v784_v8  ;;  %v828_v26 = vadd.f32 %v827_v4, %v547_v58  ;;  %v979_v33 = vadd.f32 %v978_v3, %v791_v50 }
 0x170   : > { %v7263_v53 = vpop.f32.mrf.mxu1  ;;  %v1355_v59 = vpop.f32.mrf.mxu0  ;;  %v821_v57 = vadd.f32 %v7222_v56, %v536_v19  ;;  %v1125_v34 = vadd.f32 %v1124_v44, %v963_v48  ;;  %v981_v46 = vadd.f32 %v980_v22, %v793_v23  ;;  %v989_v15 = vadd.f32 %v988_v32, %v800_v52 }
 0x171   : > { %10612 = vst [vmem:[#allocation143_spill] sm:$0xff] %v7263_v53  ;;  %v1127_v30 = vadd.f32 %v1126_v43, %v965_v38  ;;  %v987_v53 = vadd.f32 %v986_v16, %v798_v55  ;;  %v1134_v18 = vadd.f32 %v1133_v2, %v971_v29  ;;  %v995_v24 = vadd.f32 %v994_v37, %v7208_v51 }
 0x172   : > { %v1180_v31 = vpop.f32.mrf.mxu1  ;;  %v1357_v21 = vpop.f32.mrf.mxu0  ;;  %v1143_v60 = vadd.f32 %v1142_v45, %v979_v33  ;;  %v997_v41 = vadd.f32 %v996_v1, %v807_v14  ;;  %v1356_v13 = vadd.f32 %v1355_v59, %v1125_v34  ;;  %v1145_v8 = vadd.f32 %v7226_v5, %v981_v46  ;;  %v10615_v7 = vld [vmem:[#allocation140_spill] sm:$0xff] }
 0x173   : > { %v1003_v39 = vadd.f32 %v7228_v20, %v7214_v0  ;;  %v1152_v44 = vadd.f32 %v7230_v40, %v987_v53  ;;  %v1005_v43 = vadd.f32 %v7232_v62, %v814_v28  ;;  %v1154_v32 = vadd.f32 %v7234_v17, %v989_v15  ;;  %v10613_v0 = vld [vmem:[#allocation137_spill] sm:$0xff]  ;;  %v10614_v40 = vld [vmem:[#allocation139_spill] sm:$0xff] }
 0x174   : > { %v1362_v47 = vpop.f32.mrf.mxu0  ;;  %v1358_v22 = vadd.f32 %v1357_v21, %v1127_v30  ;;  %v1161_v51 = vadd.f32 %v7238_v42, %v995_v24  ;;  %v1013_v5 = vadd.f32 %v7240_v35, %v821_v57  ;;  %v7292_v11 = vadd.f32 %v7242_v63, %v997_v41  ;;  %v10616_v20 = vld [vmem:[#allocation141_spill] sm:$0xff]  ;;  %v10617_v42 = vld [vmem:[#allocation142_spill] sm:$0xff] }
 0x175   : > { %v1187_v61 = vpop.f32.mrf.mxu1  ;;  %v1019_v53 = vadd.f32 %v10614_v40, %v10613_v0  ;;  %v1363_v3 = vadd.f32 %v1362_v47, %v1134_v18  ;;  %v7297_v6 = vadd.f32 %v10615_v7, %v1003_v39  ;;  %v1021_v62 = vadd.f32 %v10616_v20, %v828_v26  ;;  %v10623_v39 = vld [vmem:[#allocation27_spill] sm:$0xff]  ;;  %v10629_v7 = vld [vmem:[#allocation21_spill] sm:$0xff] }
 0x176   : > { %v1364_v27 = vpop.f32.mrf.mxu0  ;;  %v7301_v17 = vadd.f32 %v10617_v42, %v1005_v43  ;;  %v7306_v55 = vadd.f32 %v1180_v31, %v1013_v5 }
 0x177   : > { %v1189_v25 = vpop.f32.mrf.mxu1  ;;  %v1365_v35 = vadd.f32 %v1364_v27, %v1136_v9  ;;  %v7310_v47 = vadd.f32 %v1187_v61, %v1019_v53 }
 0x178   : > { %v1369_v56 = vpop.f32.mrf.mxu0  ;;  %v10618_v54 = vld [vmem:[#allocation143_spill] sm:$0xff]  ;;  %v7317_v30 = vadd.f32 %v1189_v25, %v1021_v62 }
 0x179   : > { %v1508_v16 = vpop.f32.mrf.mxu1  ;;  %v7304_v21 = vadd.f32 %v10618_v54, %v1011_v10  ;;  %v1370_v52 = vadd.f32 %v1369_v56, %v1143_v60 }
 0x17a   : > { %v1509_v4 = vadd.f32 %v1508_v16, %v1356_v13  ;;  %v1371_v1 = vpop.f32.mrf.mxu0 }
 0x17b   : > { %v1510_v12 = vpop.f32.mrf.mxu1  ;;  %v1372_v29 = vadd.f32 %v1371_v1, %v1145_v8 }
 0x17c   : > { %vm1562_vm0 = vcmp.ge.f32.partialorder %v1509_v4, 0.0  ;;  %v1578_v2 = vmul.f32 0.001, %v1509_v4  ;;  %v1511_v37 = vadd.f32 %v1510_v12, %v1358_v22  ;;  %v1376_v45 = vpop.f32.mrf.mxu0  ;;  %v10624_v22 = vld [vmem:[#allocation13_spill] sm:$0xff] }
 0x17d   : > { %v1515_v63 = vpop.f32.mrf.mxu1  ;;  %v1377_v18 = vadd.f32 %v1376_v45, %v1152_v44 }
 0x17e   : > { %v1594_v59 = vsel %vm1562_vm0, %v1509_v4, %v1578_v2  ;;  %vm1563_vm1 = vcmp.ge.f32.partialorder %v1511_v37, 0.0  ;;  %v1579_v36 = vmul.f32 0.001, %v1511_v37  ;;  %v1516_v50 = vadd.f32 %v1515_v63, %v1363_v3  ;;  %v1378_v23 = vpop.f32.mrf.mxu0  ;;  %v10626_v3 = vld [vmem:[#allocation16_spill] sm:$0xff] }
 0x17f   : > { %v7308_v19 = vand.u32 4294901760, %v1594_v59  ;;  %v1517_v58 = vpop.f32.mrf.mxu1  ;;  %v1379_v25 = vadd.f32 %v1378_v23, %v1154_v32 }
 0x180   : > { %v1595_v14 = vsel %vm1563_vm1, %v1511_v37, %v1579_v36  ;;  %vm1564_vm2 = vcmp.ge.f32.partialorder %v1516_v50, 0.0  ;;  %v1580_v28 = vmul.f32 0.001, %v1516_v50  ;;  %v1518_v48 = vadd.f32 %v1517_v58, %v1365_v35  ;;  %v1383_v38 = vpop.f32.mrf.mxu0 }
 0x181   : > { %10619 = vst [vmem:[#allocation137_spill] sm:$0xff] %v7308_v19  ;;  %v7313_v57 = vsub.f32 %v1594_v59, %v7308_v19  ;;  %v7315_v26 = vand.u32 4294901760, %v1595_v14  ;;  %v1522_v49 = vpop.f32.mrf.mxu1  ;;  %v1384_v8 = vadd.f32 %v1383_v38, %v1161_v51  ;;  %v10625_v51 = vld [vmem:[#allocation14_spill] sm:$0xff]  ;;  %v10630_v59 = vld [vmem:[#allocation23_spill] sm:$0xff] }
 0x182   : > { %v1596_v31 = vsel %vm1564_vm2, %v1516_v50, %v1580_v28  ;;  %vm1565_vm3 = vcmp.ge.f32.partialorder %v1518_v48, 0.0  ;;  %v1581_v33 = vmul.f32 0.001, %v1518_v48  ;;  %v1523_v34 = vadd.f32 %v1522_v49, %v1370_v52  ;;  %v1385_v46 = vpop.f32.mrf.mxu0  ;;  %v10632_v52 = vld [vmem:[#allocation24_spill] sm:$0xff] }
 0x183   : > { %10620 = vst [vmem:[#allocation139_spill] sm:$0xff] %v7315_v26  ;;  %v9961_v27 = vand.u32 4294901760, %v7313_v57  ;;  %v7320_v15 = vand.u32 4294901760, %v1596_v31  ;;  %v1524_v61 = vpop.f32.mrf.mxu1  ;;  %2328 = vmatprep.mubr.f32.mxu1 %v7315_v26  ;;  %v7325_v13 = vsub.f32 %v1595_v14, %v7315_v26  ;;  %v1386_v32 = vadd.f32 %v1385_v46, %v7292_v11  ;;  %v10671_v26 = vld [vmem:[#allocation52_spill] sm:$0xff] }
 0x184   : > { %v1597_v9 = vsel %vm1565_vm3, %v1518_v48, %v1581_v33  ;;  %vm1566_vm4 = vcmp.ge.f32.partialorder %v1523_v34, 0.0  ;;  %v1582_v24 = vmul.f32 0.001, %v1523_v34  ;;  %v1525_v60 = vadd.f32 %v1524_v61, %v1372_v29  ;;  %2330 = vmatmul.mubr.f32.vlgmr.msra.gmra.mxu1 %v7308_v19  ;;  %v1390_v41 = vpop.f32.mrf.mxu0  ;;  %v10633_v29 = vld [vmem:[#allocation28_spill] sm:$0xff]  ;;  %v10670_v19 = vld [vmem:[#allocation33_spill] sm:$0xff] }
 0x185   : > { %10621 = vst [vmem:[#allocation140_spill] sm:$0xff] %v7320_v15  ;;  %v7327_v56 = vand.u32 4294901760, %v1597_v9  ;;  %2668 = vmatpush1.msra.mxu1 %v10623_v39  ;;  %v1529_v44 = vpop.f32.mrf.mxu1  ;;  %v1823_v1 = vsub.f32 %v7313_v57, %v9961_v27  ;;  %v7335_v5 = vsub.f32 %v1596_v31, %v7320_v15  ;;  %v1391_v11 = vadd.f32 %v1390_v41, %v7297_v6  ;;  %v10654_v27 = vld [vmem:[#allocation30_spill] sm:$0xff] }
 0x186   : > { %v1598_v43 = vsel %vm1566_vm4, %v1523_v34, %v1582_v24  ;;  %vm1567_vm5 = vcmp.ge.f32.partialorder %v1525_v60, 0.0  ;;  %v1583_v16 = vmul.f32 0.001, %v1525_v60  ;;  %v1530_v10 = vadd.f32 %v1529_v44, %v1377_v18  ;;  %2670 = vmatprep.subr.mxu1 %v10624_v22  ;;  %v1392_v4 = vpop.f32.mrf.mxu0  ;;  %v10635_v34 = vld [vmem:[#allocation29_spill] sm:$0xff]  ;;  %v10636_v24 = vld [vmem:[#allocation43_spill] sm:$0xff] }
 0x187   : > { %10622 = vst [vmem:[#allocation141_spill] sm:$0xff] %v7327_v56  ;;  %2672 = vmatpush1.msra.mxu1 %v10625_v51  ;;  %v1531_v0 = vpop.f32.mrf.mxu1  ;;  %2336 = vmatprep.mubr.f32.mxu1 %v7327_v56  ;;  %v7342_v37 = vand.u32 4294901760, %v1598_v43  ;;  %v9962_v62 = vand.u32 4294901760, %v7325_v13  ;;  %v1824_v50 = vand.u32 4294901760, %v1823_v1  ;;  %v7351_v23 = vsub.f32 %v1597_v9, %v7327_v56 }
 0x188   : > { %v1599_v40 = vsel %vm1567_vm5, %v1525_v60, %v1583_v16  ;;  %vm1568_vm6 = vcmp.ge.f32.partialorder %v1530_v10, 0.0  ;;  %v1584_v53 = vmul.f32 0.001, %v1530_v10  ;;  %v1532_v12 = vadd.f32 %v1531_v0, %v1379_v25  ;;  %2674 = vmatprep.subr.mxu1 %v10626_v3  ;;  %2338 = vmatmul.mubr.f32.gmra.mxu1 %v7320_v15  ;;  %v1397_v2 = vpop.f32.mrf.mxu0  ;;  %v10662_v15 = vld [vmem:[#allocation20_spill] sm:$0xff] }
 0x189   : > { %10627 = vst [vmem:[#allocation142_spill] sm:$0xff] %v7342_v37  ;;  %v7344_v45 = vand.u32 4294901760, %v1599_v40  ;;  %2676 = vmatpush1.msra.mxu1 %v10629_v7  ;;  %v1536_v20 = vpop.f32.mrf.mxu1  ;;  %v1817_v58 = vsub.f32 %v7325_v13, %v9962_v62  ;;  %v1393_v14 = vadd.f32 %v1392_v4, %v7301_v17  ;;  %v7364_v49 = vsub.f32 %v1598_v43, %v7342_v37  ;;  %v10638_v4 = vld [vmem:[#allocation11_spill] sm:$0xff] }
 0x18a   : > { %v1600_v42 = vsel %vm1568_vm6, %v1530_v10, %v1584_v53  ;;  %vm1569_vm7 = vcmp.ge.f32.partialorder %v1532_v12, 0.0  ;;  %v1585_v35 = vmul.f32 0.001, %v1532_v12  ;;  %v1537_v63 = vadd.f32 %v1536_v20, %v1384_v8  ;;  %2678 = vmatprep.subr.mxu1 %v10630_v59  ;;  %v1399_v36 = vpop.f32.mrf.mxu0  ;;  %v10637_v8 = vld [vmem:[#allocation34_spill] sm:$0xff] }
 0x18b   : > { %10628 = vst [vmem:[#allocation143_spill] sm:$0xff] %v7344_v45  ;;  %v7353_v54 = vand.u32 4294901760, %v1600_v42  ;;  %2680 = vmatpush1.msra.mxu1 %v10632_v52  ;;  %v1538_v6 = vpop.f32.mrf.mxu1  ;;  %2344 = vmatprep.mubr.f32.mxu1 %v7344_v45  ;;  %v1818_v33 = vand.u32 4294901760, %v1817_v58  ;;  %v1398_v17 = vadd.f32 %v1397_v2, %v7304_v21  ;;  %v7372_v60 = vsub.f32 %v1599_v40, %v7344_v45  ;;  %v10639_v40 = vld [vmem:[#allocation19_spill] sm:$0xff] }
 0x18c   : > { %v1601_v28 = vsel %vm1569_vm7, %v1532_v12, %v1585_v35  ;;  %v1586_v48 = vmul.f32 0.001, %v1537_v63  ;;  %v1539_v38 = vadd.f32 %v1538_v6, %v1386_v32  ;;  %2682 = vmatprep.subr.mxu1 %v10633_v29  ;;  %2346 = vmatmul.mubr.f32.gmra.mxu1 %v7342_v37  ;;  %vm1570_vm8 = vcmp.ge.f32.partialorder %v1537_v63, 0.0  ;;  %v1404_v46 = vpop.f32.mrf.mxu0  ;;  %v10643_v35 = vld [vmem:[#allocation17_spill] sm:$0xff] }
 0x18d   : > { %10631 = vst [vmem:[#allocation27_spill] sm:$0xff] %v7353_v54  ;;  %v7366_v31 = vand.u32 4294901760, %v1601_v28  ;;  %2684 = vmatpush1.msra.mxu1 %v10635_v34  ;;  %v1543_v18 = vpop.f32.mrf.mxu1  ;;  %v7375_v41 = vsub.f32 %v1600_v42, %v7353_v54  ;;  %v1400_v25 = vadd.f32 %v1399_v36, %v7306_v55  ;;  %1819 = vmatprep.mubr.f32.mxu0 %v1818_v33  ;;  %v9959_v43 = vand.u32 4294901760, %v7351_v23  ;;  %v10661_v37 = vld [vmem:[#allocation45_spill] sm:$0xff] }
 0x18e   : > { %vm1571_vm9 = vcmp.ge.f32.partialorder %v1539_v38, 0.0  ;;  %v1587_v61 = vmul.f32 0.001, %v1539_v38  ;;  %v1544_v9 = vadd.f32 %v1543_v18, %v1391_v11  ;;  %2686 = vmatprep.subr.mxu1 %v10636_v24  ;;  %v1602_v21 = vsel %vm1570_vm8, %v1537_v63, %v1586_v48  ;;  %1825 = vmatmul.mubr.f32.vlgmr.msra.gmra.mxu0 %v1824_v50  ;;  %v1406_v0 = vpop.f32.mrf.mxu0  ;;  %v10640_v11 = vld [vmem:[#allocation15_spill] sm:$0xff]  ;;  %v10644_v50 = vld [vmem:[#allocation36_spill] sm:$0xff] }
 0x18f   : > { %10634 = vst [vmem:[#allocation13_spill] sm:$0xff] %v7366_v31  ;;  %2688 = vmatpush1.msra.mxu1 %v10637_v8  ;;  %v1545_v44 = vpop.f32.mrf.mxu1  ;;  %2352 = vmatprep.mubr.f32.mxu1 %v7366_v31  ;;  %v1405_v1 = vadd.f32 %v1404_v46, %v7310_v47  ;;  %v1833_v55 = vsub.f32 %v7351_v23, %v9959_v43  ;;  %v9958_v53 = vand.u32 4294901760, %v7335_v5  ;;  %v7394_v47 = vand.u32 4294901760, %v1602_v21  ;;  %v10646_v48 = vld [vmem:[#allocation31_spill] sm:$0xff]  ;;  %v10647_v18 = vld [vmem:[#allocation8_spill] sm:$0xff]  ;;  %v10649_v43 = vld [vmem:[#allocation25_spill] sm:$0xff] }
 0x190   : > { %v1603_v16 = vsel %vm1571_vm9, %v1539_v38, %v1587_v61  ;;  %v1546_v10 = vadd.f32 %v1545_v44, %v1393_v14  ;;  %2397 = vmatpush1.msra.mxu0 %v10638_v4  ;;  %v1588_v32 = vmul.f32 0.001, %v1544_v9  ;;  %2690 = vmatprep.subr.mxu1 %v10639_v40  ;;  %v7390_v2 = vsub.f32 %v1601_v28, %v7366_v31  ;;  %v10645_v28 = vld [vmem:[#allocation32_spill] sm:$0xff] }
 0x191   : > { %v1550_v12 = vpop.f32.mrf.mxu1  ;;  %vm1572_vm10 = vcmp.ge.f32.partialorder %v1544_v9, 0.0  ;;  %2400 = vmatprep.subr.mxu0 %v10640_v11  ;;  %2354 = vmatmul.mubr.f32.gmra.mxu1 %v7353_v54  ;;  %10641 = vst [vmem:[#allocation14_spill] sm:$0xff] %v7394_v47  ;;  %v7396_v42 = vand.u32 4294901760, %v1603_v16  ;;  %v1834_v63 = vand.u32 4294901760, %v1833_v55  ;;  %v1839_v36 = vsub.f32 %v7335_v5, %v9958_v53  ;;  %v10655_v54 = vld [vmem:[#allocation12_spill] sm:$0xff] }
 0x192   : > { %vm1573_vm11 = vcmp.ge.f32.partialorder %v1546_v10, 0.0  ;;  %v1589_v20 = vmul.f32 0.001, %v1546_v10  ;;  %2403 = vmatpush1.msra.mxu0 %v10643_v35  ;;  %2692 = vmatpush1.msra.mxu1 %v10644_v50  ;;  %v1407_v58 = vadd.f32 %v1406_v0, %v7317_v30  ;;  %v1604_v33 = vsel %vm1572_vm10, %v1544_v9, %v1588_v32  ;;  %v10650_v30 = vld [vmem:[#allocation22_spill] sm:$0xff]  ;;  %v10656_v31 = vld [vmem:[#allocation40_spill] sm:$0xff] }
 0x193   : > { %10642 = vst [vmem:[#allocation16_spill] sm:$0xff] %v7396_v42  ;;  %v1552_v6 = vpop.f32.mrf.mxu1  ;;  %2406 = vmatprep.subr.mxu0 %v10645_v28  ;;  %2694 = vmatprep.subr.mxu1 %v10646_v48  ;;  %v1840_v46 = vand.u32 4294901760, %v1839_v36  ;;  %v1551_v61 = vadd.f32 %v1550_v12, %v1398_v17  ;;  %v9960_v44 = vand.u32 4294901760, %v7372_v60  ;;  %v7415_v9 = vsub.f32 %v1602_v21, %v7394_v47 }
 0x194   : > { %v1605_v14 = vsel %vm1573_vm11, %v1546_v10, %v1589_v20  ;;  %v1553_v38 = vadd.f32 %v1552_v6, %v1400_v25  ;;  %1835 = vmatprep.mubr.f32.mxu0 %v1834_v63  ;;  %2409 = vmatpush1.msra.mxu0 %v10647_v18  ;;  %v9969_v25 = vand.u32 4294901760, %v7364_v49  ;;  %v7418_v32 = vsub.f32 %v1603_v16, %v7396_v42  ;;  %v10652_v20 = vld [vmem:[#allocation26_spill] sm:$0xff]  ;;  %v10653_v63 = vld [vmem:[#allocation39_spill] sm:$0xff] }
 0x195   : > { %v1557_v55 = vpop.f32.mrf.mxu1  ;;  %v7409_v53 = vand.u32 4294901760, %v1605_v14  ;;  %2412 = vmatprep.subr.mxu0 %v10649_v43  ;;  %2696 = vmatpush1.msra.mxu1 %v10650_v30  ;;  %v1849_v17 = vsub.f32 %v7372_v60, %v9960_v44  ;;  %v7424_v12 = vand.u32 4294901760, %v1604_v33  ;;  %v9974_v36 = vand.u32 4294901760, %v7390_v2 }
 0x196   : > { %vm1575_vm12 = vcmp.ge.f32.partialorder %v1553_v38, 0.0  ;;  %v1591_v10 = vmul.f32 0.001, %v1553_v38  ;;  %1841 = vmatmul.mubr.f32.gmra.mxu0 %v1840_v46  ;;  %2360 = vmatprep.mubr.f32.mxu1 %v7396_v42  ;;  %v1855_v21 = vsub.f32 %v7364_v49, %v9969_v25  ;;  %vm1574_vm13 = vcmp.ge.f32.partialorder %v1551_v61, 0.0  ;;  %v10657_v25 = vld [vmem:[#allocation18_spill] sm:$0xff] }
 0x197   : > { %10648 = vst [vmem:[#allocation21_spill] sm:$0xff] %v7409_v53  ;;  %v1559_v0 = vpop.f32.mrf.mxu1  ;;  %10651 = vst [vmem:[#allocation23_spill] sm:$0xff] %v7424_v12  ;;  %2415 = vmatpush1.msra.mxu0 %v10652_v20  ;;  %2698 = vmatprep.subr.mxu1 %v10653_v63  ;;  %v1590_v6 = vmul.f32 0.001, %v1551_v61  ;;  %v1850_v44 = vand.u32 4294901760, %v1849_v17  ;;  %v7436_v62 = vsub.f32 %v1605_v14, %v7409_v53 }
 0x198   : > { %v1560_v16 = vadd.f32 %v1559_v0, %v1407_v58  ;;  %v1607_v46 = vsel %vm1575_vm12, %v1553_v38, %v1591_v10  ;;  %2418 = vmatprep.subr.mxu0 %v10654_v27  ;;  %2362 = vmatmul.mubr.f32.gmra.mxu1 %v7394_v47  ;;  %v1856_v42 = vand.u32 4294901760, %v1855_v21  ;;  %v1558_v58 = vadd.f32 %v1557_v55, %v1405_v1  ;;  %v10659_v21 = vld [vmem:[#allocation42_spill] sm:$0xff]  ;;  %v10660_v47 = vld [vmem:[#allocation35_spill] sm:$0xff] }
 0x199   : > { %2421 = vmatpush1.msra.mxu0 %v10655_v54  ;;  %2700 = vmatpush1.msra.mxu1 %v10656_v31  ;;  %v1865_v38 = vsub.f32 %v7390_v2, %v9974_v36  ;;  %v9981_v10 = vand.u32 4294901760, %v7375_v41  ;;  %v7446_v17 = vand.u32 4294901760, %v1607_v46  ;;  %v1606_v55 = vsel %vm1574_vm13, %v1551_v61, %v1590_v6  ;;  %v10664_v6 = vld [vmem:[#allocation48_spill] sm:$0xff] }
 0x19a   : > { %v1593_v0 = vmul.f32 0.001, %v1560_v16  ;;  %1851 = vmatprep.mubr.f32.mxu0 %v1850_v44  ;;  %2424 = vmatprep.subr.mxu0 %v10657_v25  ;;  %vm1577_vm14 = vcmp.ge.f32.partialorder %v1560_v16, 0.0  ;;  %v7451_v44 = vsub.f32 %v1604_v33, %v7424_v12  ;;  %v1592_v45 = vmul.f32 0.001, %v1558_v58 }
 0x19b   : > { %10658 = vst [vmem:[#allocation24_spill] sm:$0xff] %v7446_v17  ;;  %1857 = vmatmul.mubr.f32.gmra.mxu0 %v1856_v42  ;;  %2702 = vmatprep.subr.mxu1 %v10659_v21  ;;  %v1866_v36 = vand.u32 4294901760, %v1865_v38  ;;  %v1871_v14 = vsub.f32 %v7375_v41, %v9981_v10  ;;  %v10663_v33 = vand.u32 4294901760, %v7418_v32  ;;  %vm1576_vm15 = vcmp.ge.f32.partialorder %v1558_v58, 0.0 }
 0x19c   : > { %2427 = vmatpush1.msra.mxu0 %v10660_v47  ;;  %2704 = vmatpush1.msra.mxu1 %v10661_v37  ;;  %v1609_v42 = vsel %vm1577_vm14, %v1560_v16, %v1593_v0  ;;  %v7466_v56 = vand.u32 4294901760, %v1606_v55  ;;  %v7469_v10 = vsub.f32 %v1607_v46, %v7446_v17  ;;  %v10666_v16 = vld [vmem:[#allocation37_spill] sm:$0xff]  ;;  %v10672_v46 = vand.u32 4294901760, %v7436_v62 }
 0x19d   : > { %2368 = vmatprep.mubr.f32.mxu1 %v7409_v53  ;;  %2430 = vmatprep.subr.mxu0 %v10662_v15  ;;  %v1881_v1 = vsub.f32 %v7418_v32, %v10663_v33  ;;  %v1872_v38 = vand.u32 4294901760, %v1871_v14  ;;  %v10667_v53 = vand.u32 4294901760, %v7415_v9  ;;  %v7476_v61 = vand.u32 4294901760, %v1609_v42 }
 0x19e   : > { %1867 = vmatprep.mubr.f32.mxu0 %v1866_v36  ;;  %2706 = vmatprep.subr.mxu1 %v10664_v6  ;;  %10665 = vst [vmem:[#allocation28_spill] sm:$0xff] %v7466_v56  ;;  %v10669_v36 = vld [vmem:[#allocation49_spill] sm:$0xff]  ;;  %v1608_v14 = vsel %vm1576_vm15, %v1558_v58, %v1592_v45 }
 0x19f   : > { %2370 = vmatmul.mubr.f32.gmra.mxu1 %v7424_v12  ;;  %2433 = vmatpush1.msra.mxu0 %v10666_v16  ;;  %v1882_v0 = vand.u32 4294901760, %v1881_v1  ;;  %v1887_v33 = vsub.f32 %v7415_v9, %v10667_v53  ;;  %10668 = vst [vmem:[#allocation29_spill] sm:$0xff] %v7476_v61  ;;  %v1897_v12 = vsub.f32 %v7436_v62, %v10672_v46  ;;  %v10673_v16 = vld [vmem:[#allocation38_spill] sm:$0xff]  ;;  %v10674_v6 = vld [vmem:[#allocation53_spill] sm:$0xff]  ;;  %v10677_v1 = vld [vmem:[#allocation56_spill] sm:$0xff] }
 0x1a0   : > { %1873 = vmatmul.mubr.f32.gmra.mxu0 %v1872_v38  ;;  %2708 = vmatpush1.msra.mxu1 %v10669_v36  ;;  %v7488_v53 = vsub.f32 %v1606_v55, %v7466_v56  ;;  %v7492_v38 = vand.u32 4294901760, %v1608_v14  ;;  %v10676_v46 = vld [vmem:[#allocation41_spill] sm:$0xff] }
 0x1a1   : > { %2436 = vmatprep.subr.mxu0 %v10670_v19  ;;  %2710 = vmatprep.subr.mxu1 %v10671_v26  ;;  %v1888_v45 = vand.u32 4294901760, %v1887_v33  ;;  %v7495_v26 = vsub.f32 %v1609_v42, %v7476_v61  ;;  %v1898_v55 = vand.u32 4294901760, %v1897_v12  ;;  %v10679_v33 = vld [vmem:[#allocation44_spill] sm:$0xff]  ;;  %v10680_v58 = vld [vmem:[#allocation57_spill] sm:$0xff] }
 0x1a2   : > { %2439 = vmatpush1.msra.mxu0 %v10673_v16  ;;  %2712 = vmatpush1.msra.mxu1 %v10674_v6  ;;  %10675 = vst [vmem:[#allocation43_spill] sm:$0xff] %v7492_v38  ;;  %v10681_v6 = vld [vmem:[#allocation46_spill] sm:$0xff]  ;;  %v10682_v42 = vld [vmem:[#allocation60_spill] sm:$0xff]  ;;  %v7512_v12 = vsub.f32 %v1608_v14, %v7492_v38 }
 0x1a3   : > { %1883 = vmatprep.mubr.f32.mxu0 %v1882_v0  ;;  %2376 = vmatprep.mubr.f32.mxu1 %v7446_v17  ;;  %v10678_v0 = vand.u32 4294901760, %v7451_v44 }
 0x1a4   : > { %2442 = vmatprep.subr.mxu0 %v10676_v46  ;;  %2714 = vmatprep.subr.mxu1 %v10677_v1  ;;  %v10683_v46 = vand.u32 4294901760, %v7469_v10 }
 0x1a5   : > { %1889 = vmatmul.mubr.f32.gmra.mxu0 %v1888_v45  ;;  %2378 = vmatmul.mubr.f32.gmra.mxu1 %v7466_v56  ;;  %v1903_v17 = vsub.f32 %v7451_v44, %v10678_v0  ;;  %v9998_v45 = vand.u32 4294901760, %v7488_v53  ;;  %v10684_v56 = vld [vmem:[#allocation47_spill] sm:$0xff]  ;;  %v10685_v0 = vld [vmem:[#allocation61_spill] sm:$0xff] }
 0x1a6   : > { %2445 = vmatpush1.msra.mxu0 %v10679_v33  ;;  %2716 = vmatpush1.msra.mxu1 %v10680_v58  ;;  %v1913_v1 = vsub.f32 %v7469_v10, %v10683_v46  ;;  %v9999_v33 = vand.u32 4294901760, %v7495_v26  ;;  %v10687_v58 = vld [vmem:[#allocation62_spill] sm:$0xff] }
 0x1a7   : > { %2448 = vmatprep.subr.mxu0 %v10681_v6  ;;  %2718 = vmatprep.subr.mxu1 %v10682_v42  ;;  %v1904_v6 = vand.u32 4294901760, %v1903_v17  ;;  %v10686_v42 = vld [vmem:[#allocation50_spill] sm:$0xff]  ;;  %v1919_v14 = vsub.f32 %v7488_v53, %v9998_v45  ;;  %v10694_v45 = vld [vmem:[#allocation68_spill] sm:$0xff] }
 0x1a8   : > { %2451 = vmatpush1.msra.mxu0 %v10684_v56  ;;  %2720 = vmatpush1.msra.mxu1 %v10685_v0  ;;  %v1914_v46 = vand.u32 4294901760, %v1913_v1  ;;  %v10688_v56 = vld [vmem:[#allocation51_spill] sm:$0xff]  ;;  %v10689_v0 = vld [vmem:[#allocation66_spill] sm:$0xff]  ;;  %v1929_v17 = vsub.f32 %v7495_v26, %v9999_v33  ;;  %v10692_v1 = vand.u32 4294901760, %v7325_v13 }
 0x1a9   : > { %1899 = vmatprep.mubr.f32.mxu0 %v1898_v55  ;;  %2384 = vmatprep.mubr.f32.mxu1 %v7476_v61  ;;  %v10000_v55 = vand.u32 4294901760, %v7512_v12  ;;  %v10690_v61 = vld [vmem:[#allocation54_spill] sm:$0xff] }
 0x1aa   : > { %2454 = vmatprep.subr.mxu0 %v10686_v42  ;;  %2722 = vmatprep.subr.mxu1 %v10687_v58  ;;  %v10696_v58 = vld [vmem:[#allocation72_spill] sm:$0xff]  ;;  %v1930_v33 = vand.u32 4294901760, %v1929_v17  ;;  %v10698_v42 = vld [vmem:[#allocation59_spill] sm:$0xff]  ;;  %v10703_v17 = vld [vmem:[#allocation65_spill] sm:$0xff] }
 0x1ab   : > { %1905 = vmatmul.mubr.f32.gmra.mxu0 %v1904_v6  ;;  %2386 = vmatmul.mubr.f32.gmra.mxu1 %v7492_v38  ;;  %v10691_v6 = vld [vmem:[#allocation67_spill] sm:$0xff] }
 0x1ac   : > { %2457 = vmatpush1.msra.mxu0 %v10688_v56  ;;  %2724 = vmatpush1.msra.mxu1 %v10689_v0  ;;  %v10693_v38 = vld [vmem:[#allocation55_spill] sm:$0xff]  ;;  %v1920_v56 = vand.u32 4294901760, %v1919_v14  ;;  %v10695_v0 = vld [vmem:[#allocation58_spill] sm:$0xff]  ;;  %v10702_v14 = vld [vmem:[#allocation64_spill] sm:$0xff] }
 0x1ad   : > { %2460 = vmatprep.subr.mxu0 %v10690_v61  ;;  %2726 = vmatprep.subr.mxu1 %v10691_v6  ;;  %v1935_v61 = vsub.f32 %v7512_v12, %v10000_v55  ;;  %v10697_v6 = vld [vmem:[#allocation73_spill] sm:$0xff] }
 0x1ae   : > { %2796 = vmatprep.mubr.f32.mxu1 %v10692_v1  ;;  %2463 = vmatpush1.msra.mxu0 %v10693_v38  ;;  %v10699_v1 = vld [vmem:[#allocation76_spill] sm:$0xff]  ;;  %v10700_v38 = vld [vmem:[#allocation63_spill] sm:$0xff]  ;;  %v10706_v55 = vld [vmem:[#allocation69_spill] sm:$0xff] }
 0x1af   : > { %2728 = vmatpush1.msra.mxu1 %v10694_v45  ;;  %1915 = vmatprep.mubr.f32.mxu0 %v1914_v46  ;;  %v10701_v46 = vld [vmem:[#allocation77_spill] sm:$0xff] }
 0x1b0   : > { %2466 = vmatprep.subr.mxu0 %v10695_v0  ;;  %2730 = vmatprep.subr.mxu1 %v10696_v58  ;;  %v1936_v58 = vand.u32 4294901760, %v1935_v61  ;;  %v10704_v0 = vld [vmem:[#allocation78_spill] sm:$0xff] }
 0x1b1   : > { %1921 = vmatmul.mubr.f32.gmra.mxu0 %v1920_v56  ;;  %2732 = vmatpush2.msra.mxu1 %v10697_v6  ;;  %v10705_v56 = vld [vmem:[#allocation82_spill] sm:$0xff] }
 0x1b2   : > { %2469 = vmatpush1.msra.mxu0 %v10698_v42  ;;  %2734 = vmatprep.subr.mxu1 %v10699_v1  ;;  %v10707_v1 = vld [vmem:[#allocation70_spill] sm:$0xff] }
 0x1b3   : > { %2472 = vmatprep.subr.mxu0 %v10700_v38  ;;  %2736 = vmatpush2.msra.mxu1 %v10701_v46  ;;  %v10708_v38 = vld [vmem:[#allocation83_spill] sm:$0xff]  ;;  %v10711_v61 = vld [vmem:[#allocation74_spill] sm:$0xff] }
 0x1b4   : > { %2475 = vmatpush1.msra.mxu0 %v10702_v14  ;;  %1931 = vmatprep.mubr.f32.mxu0 %v1930_v33  ;;  %v10709_v46 = vld [vmem:[#allocation71_spill] sm:$0xff]  ;;  %v10710_v14 = vld [vmem:[#allocation84_spill] sm:$0xff] }
 0x1b5   : > { %2478 = vmatprep.subr.mxu0 %v10703_v17  ;;  %2738 = vmatprep.subr.mxu1 %v10704_v0  ;;  %v10712_v33 = vld [vmem:[#allocation88_spill] sm:$0xff]  ;;  %v10713_v0 = vld [vmem:[#allocation75_spill] sm:$0xff] }
 0x1b6   : > { %1937 = vmatmul.mubr.f32.gmra.mxu0 %v1936_v58  ;;  %2740 = vmatpush2.msra.mxu1 %v10705_v56  ;;  %v10714_v58 = vld [vmem:[#allocation89_spill] sm:$0xff]  ;;  %v10715_v56 = vld [vmem:[#allocation79_spill] sm:$0xff] }
 0x1b7   : > { %2481 = vmatpush1.msra.mxu0 %v10706_v55  ;;  %2586 = vmatprep.mubr.f32.mxu0 %v7325_v13  ;;  %v10716_v55 = vld [vmem:[#allocation92_spill] sm:$0xff] }
 0x1b8   : > { %2484 = vmatprep.subr.mxu0 %v10707_v1  ;;  %2742 = vmatprep.subr.mxu1 %v10708_v38  ;;  %v10717_v13 = vld [vmem:[#allocation80_spill] sm:$0xff]  ;;  %v10718_v1 = vld [vmem:[#allocation93_spill] sm:$0xff] }
 0x1b9   : > { %2487 = vmatpush1.msra.mxu0 %v10709_v46  ;;  %2744 = vmatpush2.msra.mxu1 %v10710_v14  ;;  %v10719_v38 = vld [vmem:[#allocation81_spill] sm:$0xff]  ;;  %v10720_v46 = vld [vmem:[#allocation94_spill] sm:$0xff] }
 0x1ba   : > { %2490 = vmatprep.subr.mxu0 %v10711_v61  ;;  %2746 = vmatprep.subr.mxu1 %v10712_v33  ;;  %v10721_v14 = vld [vmem:[#allocation85_spill] sm:$0xff]  ;;  %v10722_v61 = vld [vmem:[#allocation98_spill] sm:$0xff] }
 0x1bb   : > { %2493 = vmatpush2.msra.mxu0 %v10713_v0  ;;  %2748 = vmatpush2.msra.mxu1 %v10714_v58  ;;  %v10723_v33 = vld [vmem:[#allocation86_spill] sm:$0xff]  ;;  %v10724_v0 = vld [vmem:[#allocation99_spill] sm:$0xff] }
 0x1bc   : > { %2496 = vmatprep.subr.mxu0 %v10715_v56  ;;  %2750 = vmatprep.subr.mxu1 %v10716_v55  ;;  %v10725_v58 = vld [vmem:[#allocation87_spill] sm:$0xff]  ;;  %v10726_v56 = vld [vmem:[#allocation100_spill] sm:$0xff]  ;;  %v10727_v55 = vld [vmem:[#allocation90_spill] sm:$0xff] }
 0x1bd   : > { %2499 = vmatpush2.msra.mxu0 %v10717_v13  ;;  %2752 = vmatpush2.msra.mxu1 %v10718_v1  ;;  %v10728_v13 = vld [vmem:[#allocation104_spill] sm:$0xff]  ;;  %v10729_v1 = vld [vmem:[#allocation91_spill] sm:$0xff] }
 0x1be   : > { %2502 = vmatprep.subr.mxu0 %v10719_v38  ;;  %2754 = vmatprep.subr.mxu1 %v10720_v46  ;;  %v10730_v38 = vld [vmem:[#allocation105_spill] sm:$0xff]  ;;  %v10731_v46 = vld [vmem:[#allocation95_spill] sm:$0xff] }
 0x1bf   : > { %2505 = vmatpush2.msra.mxu0 %v10721_v14  ;;  %2756 = vmatpush2.msra.mxu1 %v10722_v61  ;;  %v10732_v14 = vld [vmem:[#allocation108_spill] sm:$0xff] }
 0x1c0   : > { %2508 = vmatprep.subr.mxu0 %v10723_v33  ;;  %2758 = vmatprep.subr.mxu1 %v10724_v0  ;;  %v10733_v61 = vld [vmem:[#allocation96_spill] sm:$0xff]  ;;  %v10734_v33 = vld [vmem:[#allocation109_spill] sm:$0xff] }
 0x1c1   : > { %2511 = vmatpush2.msra.mxu0 %v10725_v58  ;;  %2760 = vmatpush2.msra.mxu1 %v10726_v56  ;;  %v10735_v0 = vld [vmem:[#allocation97_spill] sm:$0xff]  ;;  %v10736_v58 = vld [vmem:[#allocation110_spill] sm:$0xff] }
 0x1c2   : > { %2514 = vmatprep.subr.mxu0 %v10727_v55  ;;  %2762 = vmatprep.subr.mxu1 %v10728_v13  ;;  %v10737_v56 = vld [vmem:[#allocation101_spill] sm:$0xff]  ;;  %v10738_v55 = vld [vmem:[#allocation114_spill] sm:$0xff] }
 0x1c3   : > { %2517 = vmatpush2.msra.mxu0 %v10729_v1  ;;  %2764 = vmatpush2.msra.mxu1 %v10730_v38  ;;  %v10739_v13 = vld [vmem:[#allocation102_spill] sm:$0xff]  ;;  %v10740_v1 = vld [vmem:[#allocation115_spill] sm:$0xff] }
 0x1c4   : > { %2520 = vmatprep.subr.mxu0 %v10731_v46  ;;  %2766 = vmatprep.subr.mxu1 %v10732_v14  ;;  %v10741_v38 = vld [vmem:[#allocation103_spill] sm:$0xff]  ;;  %v10742_v46 = vld [vmem:[#allocation116_spill] sm:$0xff]  ;;  %v10743_v14 = vld [vmem:[#allocation106_spill] sm:$0xff] }
 0x1c5   : > { %2523 = vmatpush2.msra.mxu0 %v10733_v61  ;;  %2768 = vmatpush2.msra.mxu1 %v10734_v33  ;;  %v10744_v61 = vld [vmem:[#allocation120_spill] sm:$0xff]  ;;  %v10745_v33 = vld [vmem:[#allocation107_spill] sm:$0xff] }
 0x1c6   : > { %2526 = vmatprep.subr.mxu0 %v10735_v0  ;;  %2770 = vmatprep.subr.mxu1 %v10736_v58  ;;  %v10746_v0 = vld [vmem:[#allocation121_spill] sm:$0xff]  ;;  %v10747_v58 = vld [vmem:[#allocation111_spill] sm:$0xff] }
 0x1c7   : > { %2529 = vmatpush2.msra.mxu0 %v10737_v56  ;;  %2772 = vmatpush2.msra.mxu1 %v10738_v55  ;;  %v10748_v56 = vld [vmem:[#allocation124_spill] sm:$0xff] }
 0x1c8   : > { %2532 = vmatprep.subr.mxu0 %v10739_v13  ;;  %2774 = vmatprep.subr.mxu1 %v10740_v1  ;;  %v10749_v55 = vld [vmem:[#allocation112_spill] sm:$0xff]  ;;  %v10750_v13 = vld [vmem:[#allocation125_spill] sm:$0xff] }
 0x1c9   : > { %2535 = vmatpush2.msra.mxu0 %v10741_v38  ;;  %2776 = vmatpush2.msra.mxu1 %v10742_v46  ;;  %v10751_v1 = vld [vmem:[#allocation113_spill] sm:$0xff]  ;;  %v10752_v38 = vld [vmem:[#allocation126_spill] sm:$0xff] }
 0x1ca   : > { %2538 = vmatprep.subr.mxu0 %v10743_v14  ;;  %2778 = vmatprep.subr.mxu1 %v10744_v61  ;;  %v10753_v46 = vld [vmem:[#allocation117_spill] sm:$0xff]  ;;  %v10754_v14 = vld [vmem:[#allocation130_spill] sm:$0xff] }
 0x1cb   : > { %2541 = vmatpush2.msra.mxu0 %v10745_v33  ;;  %2780 = vmatpush2.msra.mxu1 %v10746_v0  ;;  %v10755_v61 = vld [vmem:[#allocation118_spill] sm:$0xff]  ;;  %v10756_v33 = vld [vmem:[#allocation131_spill] sm:$0xff] }
 0x1cc   : > { %2544 = vmatprep.subr.mxu0 %v10747_v58  ;;  %2782 = vmatprep.subr.mxu1 %v10748_v56  ;;  %v10757_v0 = vld [vmem:[#allocation119_spill] sm:$0xff]  ;;  %v10758_v58 = vld [vmem:[#allocation132_spill] sm:$0xff]  ;;  %v10759_v56 = vld [vmem:[#allocation122_spill] sm:$0xff] }
 0x1cd   : > { %2547 = vmatpush2.msra.mxu0 %v10749_v55  ;;  %2784 = vmatpush2.msra.mxu1 %v10750_v13  ;;  %v10760_v13 = vand.u32 4294901760, %v7313_v57 }
 0x1ce   : > { %2550 = vmatprep.subr.mxu0 %v10751_v1  ;;  %2786 = vmatprep.subr.mxu1 %v10752_v38  ;;  %v10761_v1 = vld [vmem:[#allocation9_spill] sm:$0xff]  ;;  %v10762_v38 = vld [vmem:[#allocation123_spill] sm:$0xff] }
 0x1cf   : > { %2553 = vmatpush2.msra.mxu0 %v10753_v46  ;;  %2788 = vmatpush2.msra.mxu1 %v10754_v14  ;;  %v10763_v46 = vand.u32 4294901760, %v7351_v23 }
 0x1d0   : > { %2556 = vmatprep.subr.mxu0 %v10755_v61  ;;  %2790 = vmatprep.subr.mxu1 %v10756_v33  ;;  %v10764_v61 = vld [vmem:[#allocation127_spill] sm:$0xff] }
 0x1d1   : > { %2559 = vmatpush2.msra.mxu0 %v10757_v0  ;;  %2792 = vmatpush2.msra.mxu1 %v10758_v58  ;;  %v10765_v0 = vld [vmem:[#allocation128_spill] sm:$0xff] }
 0x1d2   : > { %2562 = vmatprep.subr.mxu0 %v10759_v56  ;;  %2800 = vmatmul.mubr.f32.vlgmr.msra.gmra.mxu1 %v10760_v13  ;;  %v10766_v56 = vld [vmem:[#allocation129_spill] sm:$0xff]  ;;  %v10767_v13 = vand.u32 4294901760, %v7335_v5 }
 0x1d3   : > { %3212 = vmatprep.subr.mxu1 %v10761_v1  ;;  %2565 = vmatpush2.msra.mxu0 %v10762_v38  ;;  %v10768_v1 = vld [vmem:[#allocation133_spill] sm:$0xff] }
 0x1d4   : > { %2808 = vmatprep.mubr.f32.mxu1 %v10763_v46  ;;  %3214 = vmatpush1.msra.mxu1 %v10623_v39  ;;  %v10769_v46 = vand.u32 4294901760, %v7372_v60  ;;  %v10770_v39 = vld [vmem:[#allocation134_spill] sm:$0xff] }
 0x1d5   : > { %2568 = vmatprep.subr.mxu0 %v10764_v61  ;;  %3216 = vmatprep.subr.mxu1 %v10624_v22  ;;  %v10771_v22 = vld [vmem:[#allocation135_spill] sm:$0xff] }
 0x1d6   : > { %2571 = vmatpush2.msra.mxu0 %v10765_v0  ;;  %3218 = vmatpush1.msra.mxu1 %v10625_v51  ;;  %v10772_v51 = vand.u32 4294901760, %v7364_v49 }
 0x1d7   : > { %2574 = vmatprep.subr.mxu0 %v10766_v56  ;;  %2812 = vmatmul.mubr.f32.gmra.mxu1 %v10767_v13 }
 0x1d8   : > { %3220 = vmatprep.subr.mxu1 %v10626_v3  ;;  %2577 = vmatpush2.msra.mxu0 %v10768_v1  ;;  %v10773_v3 = vld [vmem:[#allocation10_spill] sm:$0xff] }
 0x1d9   : > { %2820 = vmatprep.mubr.f32.mxu1 %v10769_v46  ;;  %3222 = vmatpush1.msra.mxu1 %v10629_v7  ;;  %v10774_v13 = vand.u32 4294901760, %v10773_v3  ;;  %v10775_v7 = vand.u32 4294901760, %v7390_v2  ;;  %v10814_v46 = vld [vmem:[#allocation61_spill] sm:$0xff] }
 0x1da   : > { %2580 = vmatprep.subr.mxu0 %v10770_v39  ;;  %3224 = vmatprep.subr.mxu1 %v10630_v59  ;;  %v10776_v59 = vand.u32 4294901760, %v10638_v4  ;;  %v10786_v4 = vand.u32 4294901760, %v10654_v27  ;;  %v10790_v27 = vand.u32 4294901760, %v10660_v47 }
 0x1db   : > { %2583 = vmatpush2.msra.mxu0 %v10771_v22  ;;  %3226 = vmatpush1.msra.mxu1 %v10632_v52  ;;  %v10778_v52 = vand.u32 4294901760, %v10643_v35  ;;  %v10795_v35 = vld [vmem:[#allocation37_spill] sm:$0xff] }
 0x1dc   : > { %2589 = vmatmul.mubr.f32.vlgmr.msra.gmra.mxu0 %v7313_v57  ;;  %2824 = vmatmul.mubr.f32.gmra.mxu1 %v10772_v51  ;;  %v10777_v57 = vand.u32 4294901760, %v10640_v11  ;;  %v10793_v11 = vld [vmem:[#allocation48_spill] sm:$0xff]  ;;  %v10796_v47 = vand.u32 4294901760, %v10795_v35  ;;  %v10816_v51 = vld [vmem:[#allocation50_spill] sm:$0xff]  ;;  %v10846_v35 = vld [vmem:[#allocation71_spill] sm:$0xff] }
 0x1dd   : > { %2893 = vmatprep.subr.mxu0 %v10774_v13  ;;  %3228 = vmatprep.subr.mxu1 %v10633_v29  ;;  %v10780_v29 = vand.u32 4294901760, %v10645_v28  ;;  %v10801_v28 = vand.u32 4294901760, %v7488_v53  ;;  %v10817_v3 = vand.u32 4294901760, %v10816_v51  ;;  %v10818_v13 = vld [vmem:[#allocation62_spill] sm:$0xff]  ;;  %v10869_v51 = vld [vmem:[#allocation99_spill] sm:$0xff] }
 0x1de   : > { %2596 = vmatprep.mubr.f32.mxu0 %v7351_v23  ;;  %2832 = vmatprep.mubr.f32.mxu1 %v10775_v7  ;;  %v10779_v23 = vand.u32 4294901760, %v7375_v41  ;;  %v10819_v7 = vld [vmem:[#allocation51_spill] sm:$0xff] }
 0x1df   : > { %2897 = vmatpush1.msra.mxu0 %v10776_v59  ;;  %3230 = vmatpush1.msra.mxu1 %v10635_v34  ;;  %v10781_v34 = vand.u32 4294901760, %v7418_v32  ;;  %v10820_v59 = vand.u32 4294901760, %v10819_v7  ;;  %v10872_v7 = vld [vmem:[#allocation100_spill] sm:$0xff] }
 0x1e0   : > { %2901 = vmatprep.subr.mxu0 %v10777_v57  ;;  %3232 = vmatprep.subr.mxu1 %v10636_v24  ;;  %v10782_v24 = vand.u32 4294901760, %v10647_v18  ;;  %v10821_v57 = vld [vmem:[#allocation66_spill] sm:$0xff] }
 0x1e1   : > { %2905 = vmatpush1.msra.mxu0 %v10778_v52  ;;  %3234 = vmatpush1.msra.mxu1 %v10637_v8  ;;  %v10784_v8 = vand.u32 4294901760, %v10652_v20  ;;  %v10808_v20 = vld [vmem:[#allocation57_spill] sm:$0xff]  ;;  %v10822_v52 = vld [vmem:[#allocation139_spill] sm:$0xff] }
 0x1e2   : > { %2599 = vmatmul.mubr.f32.gmra.mxu0 %v7335_v5  ;;  %2836 = vmatmul.mubr.f32.gmra.mxu1 %v10779_v23  ;;  %v10783_v5 = vand.u32 4294901760, %v10649_v43  ;;  %v10787_v43 = vand.u32 4294901760, %v7436_v62  ;;  %v10823_v23 = vld [vmem:[#allocation54_spill] sm:$0xff] }
 0x1e3   : > { %2909 = vmatprep.subr.mxu0 %v10780_v29  ;;  %3236 = vmatprep.subr.mxu1 %v10639_v40  ;;  %v10788_v40 = vand.u32 4294901760, %v10655_v54  ;;  %v10792_v54 = vand.u32 4294901760, %v10662_v15  ;;  %v10799_v15 = vand.u32 4294901760, %v10673_v16  ;;  %v10812_v16 = vld [vmem:[#allocation47_spill] sm:$0xff]  ;;  %v10824_v29 = vand.u32 4294901760, %v10823_v23 }
 0x1e4   : > { %2606 = vmatprep.mubr.f32.mxu0 %v7372_v60  ;;  %2844 = vmatprep.mubr.f32.mxu1 %v10781_v34  ;;  %v10785_v60 = vand.u32 4294901760, %v7415_v9  ;;  %v10826_v34 = vld [vmem:[#allocation55_spill] sm:$0xff] }
 0x1e5   : > { %2913 = vmatpush1.msra.mxu0 %v10782_v24  ;;  %3238 = vmatpush1.msra.mxu1 %v10644_v50  ;;  %v10800_v50 = vld [vmem:[#allocation53_spill] sm:$0xff]  ;;  %v10827_v24 = vand.u32 4294901760, %v10826_v34  ;;  %v10876_v23 = vld [vmem:[#allocation91_spill] sm:$0xff] }
 0x1e6   : > { %2917 = vmatprep.subr.mxu0 %v10783_v5  ;;  %3240 = vmatprep.subr.mxu1 %v10646_v48  ;;  %v10802_v48 = vld [vmem:[#allocation41_spill] sm:$0xff]  ;;  %v10879_v34 = vld [vmem:[#allocation95_spill] sm:$0xff] }
 0x1e7   : > { %2921 = vmatpush1.msra.mxu0 %v10784_v8  ;;  %3242 = vmatpush1.msra.mxu1 %v10650_v30  ;;  %v10803_v18 = vand.u32 4294901760, %v10802_v48  ;;  %v10804_v30 = vld [vmem:[#allocation56_spill] sm:$0xff]  ;;  %v10855_v48 = vld [vmem:[#allocation79_spill] sm:$0xff] }
 0x1e8   : > { %2609 = vmatmul.mubr.f32.gmra.mxu0 %v7364_v49  ;;  %2848 = vmatmul.mubr.f32.gmra.mxu1 %v10785_v60  ;;  %v10789_v49 = vand.u32 4294901760, %v10657_v25  ;;  %v10806_v25 = vld [vmem:[#allocation44_spill] sm:$0xff]  ;;  %v10831_v60 = vand.u32 4294901760, %v10698_v42  ;;  %v10840_v42 = vld [vmem:[#allocation69_spill] sm:$0xff] }
 0x1e9   : > { %2925 = vmatprep.subr.mxu0 %v10786_v4  ;;  %3244 = vmatprep.subr.mxu1 %v10653_v63  ;;  %v10809_v63 = vld [vmem:[#allocation46_spill] sm:$0xff]  ;;  %v10830_v8 = vld [vmem:[#allocation72_spill] sm:$0xff]  ;;  %v10832_v4 = vld [vmem:[#allocation63_spill] sm:$0xff] }
 0x1ea   : > { %2616 = vmatprep.mubr.f32.mxu0 %v7390_v2  ;;  %2856 = vmatprep.mubr.f32.mxu1 %v10787_v43  ;;  %v10791_v2 = vand.u32 4294901760, %v7451_v44  ;;  %v10833_v43 = vand.u32 4294901760, %v10832_v4  ;;  %v10885_v4 = vld [vmem:[#allocation97_spill] sm:$0xff] }
 0x1eb   : > { %2929 = vmatpush1.msra.mxu0 %v10788_v40  ;;  %3246 = vmatpush1.msra.mxu1 %v10656_v31  ;;  %v10794_v31 = vand.u32 4294901760, %v7469_v10  ;;  %v10834_v40 = vld [vmem:[#allocation76_spill] sm:$0xff] }
 0x1ec   : > { %2933 = vmatprep.subr.mxu0 %v10789_v49  ;;  %3248 = vmatprep.subr.mxu1 %v10659_v21  ;;  %v10811_v21 = vld [vmem:[#allocation60_spill] sm:$0xff] }
 0x1ed   : > { %2937 = vmatpush1.msra.mxu0 %v10790_v27  ;;  %3250 = vmatpush1.msra.mxu1 %v10661_v37  ;;  %v10797_v37 = vand.u32 4294901760, %v10670_v19  ;;  %v10805_v19 = vand.u32 4294901760, %v7495_v26  ;;  %v10838_v27 = vand.u32 4294901760, %v10703_v17  ;;  %v10849_v17 = vld [vmem:[#allocation74_spill] sm:$0xff] }
 0x1ee   : > { %2619 = vmatmul.mubr.f32.gmra.mxu0 %v7375_v41  ;;  %2860 = vmatmul.mubr.f32.gmra.mxu1 %v10791_v2  ;;  %v10798_v41 = vld [vmem:[#allocation52_spill] sm:$0xff]  ;;  %v10841_v2 = vand.u32 4294901760, %v10840_v42  ;;  %v10893_v42 = vld [vmem:[#allocation115_spill] sm:$0xff] }
 0x1ef   : > { %2941 = vmatprep.subr.mxu0 %v10792_v54  ;;  %3252 = vmatprep.subr.mxu1 %v10793_v11  ;;  %v10843_v54 = vld [vmem:[#allocation70_spill] sm:$0xff] }
 0x1f0   : > { %2626 = vmatprep.mubr.f32.mxu0 %v7418_v32  ;;  %2868 = vmatprep.mubr.f32.mxu1 %v10794_v31  ;;  %v10807_v32 = vand.u32 4294901760, %v10806_v25  ;;  %v10844_v11 = vand.u32 4294901760, %v10843_v54  ;;  %v10845_v31 = vld [vmem:[#allocation83_spill] sm:$0xff]  ;;  %v10896_v54 = vld [vmem:[#allocation116_spill] sm:$0xff] }
 0x1f1   : > { %2945 = vmatpush1.msra.mxu0 %v10796_v47  ;;  %3254 = vmatpush1.msra.mxu1 %v10669_v36  ;;  %v10813_v36 = vand.u32 4294901760, %v10812_v16  ;;  %v10847_v47 = vand.u32 4294901760, %v10846_v35  ;;  %v10899_v35 = vld [vmem:[#allocation120_spill] sm:$0xff] }
 0x1f2   : > { %2949 = vmatprep.subr.mxu0 %v10797_v37  ;;  %3256 = vmatprep.subr.mxu1 %v10798_v41  ;;  %v10850_v37 = vand.u32 4294901760, %v10849_v17  ;;  %v10851_v41 = vld [vmem:[#allocation88_spill] sm:$0xff]  ;;  %v10902_v17 = vld [vmem:[#allocation121_spill] sm:$0xff] }
 0x1f3   : > { %2953 = vmatpush1.msra.mxu0 %v10799_v15  ;;  %3258 = vmatpush1.msra.mxu1 %v10800_v50  ;;  %v10852_v15 = vld [vmem:[#allocation75_spill] sm:$0xff] }
 0x1f4   : > { %2629 = vmatmul.mubr.f32.gmra.mxu0 %v7415_v9  ;;  %2872 = vmatmul.mubr.f32.gmra.mxu1 %v10801_v28  ;;  %v10810_v9 = vand.u32 4294901760, %v10809_v63  ;;  %v10853_v50 = vand.u32 4294901760, %v10852_v15  ;;  %v10854_v28 = vld [vmem:[#allocation89_spill] sm:$0xff]  ;;  %v10905_v15 = vld [vmem:[#allocation124_spill] sm:$0xff] }
 0x1f5   : > { %2957 = vmatprep.subr.mxu0 %v10803_v18  ;;  %3260 = vmatprep.subr.mxu1 %v10804_v30  ;;  %v10856_v18 = vand.u32 4294901760, %v10855_v48  ;;  %v10857_v30 = vld [vmem:[#allocation92_spill] sm:$0xff]  ;;  %v10908_v48 = vld [vmem:[#allocation113_spill] sm:$0xff] }
 0x1f6   : > { %2636 = vmatprep.mubr.f32.mxu0 %v7436_v62  ;;  %2880 = vmatprep.mubr.f32.mxu1 %v10805_v19  ;;  %v10815_v62 = vand.u32 4294901760, %v7512_v12  ;;  %v10858_v19 = vld [vmem:[#allocation80_spill] sm:$0xff] }
 0x1f7   : > { %2961 = vmatpush1.msra.mxu0 %v10807_v32  ;;  %3262 = vmatpush1.msra.mxu1 %v10808_v20  ;;  %v10859_v25 = vand.u32 4294901760, %v10858_v19  ;;  %v10860_v32 = vld [vmem:[#allocation93_spill] sm:$0xff] }
 0x1f8   : > { %2965 = vmatprep.subr.mxu0 %v10810_v9  ;;  %3264 = vmatprep.subr.mxu1 %v10811_v21  ;;  %v10861_v20 = vld [vmem:[#allocation81_spill] sm:$0xff]  ;;  %v10863_v9 = vld [vmem:[#allocation94_spill] sm:$0xff] }
 0x1f9   : > { %2969 = vmatpush1.msra.mxu0 %v10813_v36  ;;  %3266 = vmatpush1.msra.mxu1 %v10814_v46  ;;  %v10862_v63 = vand.u32 4294901760, %v10861_v20  ;;  %v10864_v21 = vld [vmem:[#allocation85_spill] sm:$0xff]  ;;  %v10866_v36 = vld [vmem:[#allocation98_spill] sm:$0xff] }
 0x1fa   : > { %2639 = vmatmul.mubr.f32.gmra.mxu0 %v7451_v44  ;;  %2884 = vmatmul.mubr.f32.gmra.mxu1 %v10815_v62  ;;  %v10825_v44 = vld [vmem:[#allocation67_spill] sm:$0xff]  ;;  %v10865_v16 = vand.u32 4294901760, %v10864_v21  ;;  %v10867_v46 = vld [vmem:[#allocation86_spill] sm:$0xff]  ;;  %v10911_v19 = vld [vmem:[#allocation117_spill] sm:$0xff] }
 0x1fb   : > { %2973 = vmatprep.subr.mxu0 %v10817_v3  ;;  %3268 = vmatprep.subr.mxu1 %v10818_v13  ;;  %v10868_v62 = vand.u32 4294901760, %v10867_v46  ;;  %v10870_v3 = vld [vmem:[#allocation87_spill] sm:$0xff]  ;;  %v10921_v46 = vld [vmem:[#allocation141_spill] sm:$0xff] }
 0x1fc   : > { %2646 = vmatprep.mubr.f32.mxu0 %v7469_v10  ;;  %2977 = vmatpush1.msra.mxu0 %v10820_v59  ;;  %v10828_v10 = vld [vmem:[#allocation58_spill] sm:$0xff]  ;;  %v10871_v13 = vand.u32 4294901760, %v10870_v3  ;;  %v10927_v3 = vld [vmem:[#allocation143_spill] sm:$0xff] }
 0x1fd   : > { %3270 = vmatpush1.msra.mxu1 %v10821_v57  ;;  %3340 = vmatprep.mubr.f32.mxu1 %v10822_v52  ;;  %v10829_v5 = vand.u32 4294901760, %v10828_v10  ;;  %v10873_v59 = vld [vmem:[#allocation90_spill] sm:$0xff]  ;;  %v10881_v10 = vld [vmem:[#allocation108_spill] sm:$0xff] }
 0x1fe   : > { %2981 = vmatprep.subr.mxu0 %v10824_v29  ;;  %3272 = vmatprep.subr.mxu1 %v10825_v44  ;;  %v10874_v57 = vand.u32 4294901760, %v10873_v59  ;;  %v10877_v29 = vand.u32 4294901760, %v10876_v23  ;;  %v10878_v44 = vld [vmem:[#allocation105_spill] sm:$0xff]  ;;  %v3480_v23 = vld [vmem:[#allocation4 + $0xe0] sm:$0xff] }
 0x1ff   : > { %2985 = vmatpush1.msra.mxu0 %v10827_v24  ;;  %3274 = vmatpush1.msra.mxu1 %v10694_v45  ;;  %v10835_v45 = vld [vmem:[#allocation64_spill] sm:$0xff]  ;;  %v10880_v24 = vand.u32 4294901760, %v10879_v34  ;;  %v7875_v34 = vand.u32 4294901760, %v3480_v23 }
 0x200   : > { %2649 = vmatmul.mubr.f32.gmra.mxu0 %v7488_v53  ;;  %2989 = vmatprep.subr.mxu0 %v10829_v5  ;;  %v10836_v49 = vand.u32 4294901760, %v10835_v45  ;;  %v10837_v53 = vld [vmem:[#allocation77_spill] sm:$0xff]  ;;  %v10882_v5 = vld [vmem:[#allocation96_spill] sm:$0xff] }
 0x201   : > { %3276 = vmatprep.subr.mxu1 %v10830_v8  ;;  %2656 = vmatprep.mubr.f32.mxu0 %v7495_v26  ;;  %v10839_v26 = vld [vmem:[#allocation78_spill] sm:$0xff]  ;;  %v10883_v8 = vand.u32 4294901760, %v10882_v5  ;;  %v10888_v45 = vld [vmem:[#allocation101_spill] sm:$0xff]  ;;  %10939 = vst [vmem:[#allocation36_spill] sm:$0xff] %v7875_v34 }
 0x202   : > { %2993 = vmatpush1.msra.mxu0 %v10831_v60  ;;  %3278 = vmatpush2.msra.mxu1 %v10697_v6  ;;  %v10842_v6 = vld [vmem:[#allocation82_spill] sm:$0xff]  ;;  %v10884_v60 = vld [vmem:[#allocation109_spill] sm:$0xff] }
 0x203   : > { %2997 = vmatprep.subr.mxu0 %v10833_v43  ;;  %3280 = vmatprep.subr.mxu1 %v10834_v40  ;;  %v10886_v43 = vand.u32 4294901760, %v10885_v4  ;;  %v10887_v40 = vld [vmem:[#allocation110_spill] sm:$0xff] }
 0x204   : > { %3001 = vmatpush1.msra.mxu0 %v10836_v49  ;;  %3282 = vmatpush2.msra.mxu1 %v10837_v53  ;;  %v10889_v49 = vand.u32 4294901760, %v10888_v45  ;;  %v10890_v53 = vld [vmem:[#allocation114_spill] sm:$0xff]  ;;  %v3477_v45 = vld [vmem:[#allocation4 + $0xc8] sm:$0xff] }
 0x205   : > { %2659 = vmatmul.mubr.f32.gmra.mxu0 %v7512_v12  ;;  %3005 = vmatprep.subr.mxu0 %v10838_v27  ;;  %v10848_v12 = vld [vmem:[#allocation84_spill] sm:$0xff]  ;;  %v10891_v27 = vld [vmem:[#allocation102_spill] sm:$0xff] }
 0x206   : > { %3284 = vmatprep.subr.mxu1 %v10839_v26  ;;  %3009 = vmatpush1.msra.mxu0 %v10841_v2  ;;  %v10892_v26 = vand.u32 4294901760, %v10891_v27  ;;  %v10894_v2 = vld [vmem:[#allocation103_spill] sm:$0xff] }
 0x207   : > { %3147 = vmatprep.mubr.f32.mxu0 %v10822_v52  ;;  %3286 = vmatpush2.msra.mxu1 %v10842_v6  ;;  %v10875_v52 = vld [vmem:[#allocation104_spill] sm:$0xff]  ;;  %v10895_v6 = vand.u32 4294901760, %v10894_v2 }
 0x208   : > { %3013 = vmatprep.subr.mxu0 %v10844_v11  ;;  %3288 = vmatprep.subr.mxu1 %v10845_v31  ;;  %v10897_v11 = vld [vmem:[#allocation106_spill] sm:$0xff]  ;;  %v3476_v2 = vld [vmem:[#allocation4 + $0xc0] sm:$0xff] }
 0x209   : > { %3017 = vmatpush1.msra.mxu0 %v10847_v47  ;;  %3290 = vmatpush2.msra.mxu1 %v10848_v12  ;;  %v10898_v31 = vand.u32 4294901760, %v10897_v11  ;;  %v10900_v47 = vld [vmem:[#allocation107_spill] sm:$0xff] }
 0x20a   : > { %3021 = vmatprep.subr.mxu0 %v10850_v37  ;;  %3292 = vmatprep.subr.mxu1 %v10851_v41  ;;  %v10901_v12 = vand.u32 4294901760, %v10900_v47  ;;  %v10903_v37 = vld [vmem:[#allocation111_spill] sm:$0xff] }
 0x20b   : > { %3025 = vmatpush2.msra.mxu0 %v10853_v50  ;;  %3294 = vmatpush2.msra.mxu1 %v10854_v28  ;;  %v10904_v41 = vand.u32 4294901760, %v10903_v37  ;;  %v10906_v50 = vand.u32 4294901760, %v10749_v55  ;;  %v10907_v28 = vld [vmem:[#allocation125_spill] sm:$0xff]  ;;  %v3475_v47 = vld [vmem:[#allocation4 + $0xb8] sm:$0xff] }
 0x20c   : > { %3029 = vmatprep.subr.mxu0 %v10856_v18  ;;  %3296 = vmatprep.subr.mxu1 %v10857_v30  ;;  %v10909_v18 = vand.u32 4294901760, %v10908_v48  ;;  %v10910_v30 = vld [vmem:[#allocation126_spill] sm:$0xff] }
 0x20d   : > { %3033 = vmatpush2.msra.mxu0 %v10859_v25  ;;  %3298 = vmatpush2.msra.mxu1 %v10860_v32  ;;  %v10912_v25 = vand.u32 4294901760, %v10911_v19  ;;  %v10913_v32 = vld [vmem:[#allocation118_spill] sm:$0xff]  ;;  %v10952_v19 = vld [vmem:[#allocation23_spill] sm:$0xff] }
 0x20e   : > { %3037 = vmatprep.subr.mxu0 %v10862_v63  ;;  %3300 = vmatprep.subr.mxu1 %v10863_v9  ;;  %v10914_v20 = vand.u32 4294901760, %v10913_v32  ;;  %v10915_v63 = vld [vmem:[#allocation119_spill] sm:$0xff]  ;;  %v10917_v9 = vld [vmem:[#allocation122_spill] sm:$0xff] }
 0x20f   : > { %3041 = vmatpush2.msra.mxu0 %v10865_v16  ;;  %3302 = vmatpush2.msra.mxu1 %v10866_v36  ;;  %v10916_v55 = vand.u32 4294901760, %v10915_v63  ;;  %v10918_v21 = vand.u32 4294901760, %v10917_v9  ;;  %v10919_v16 = vld [vmem:[#allocation137_spill] sm:$0xff]  ;;  %v10920_v36 = vand.u32 4294901760, %v10762_v38  ;;  %v10928_v38 = vand.u32 4294901760, %v10770_v39  ;;  %v10934_v39 = vld [vmem:[#allocation27_spill] sm:$0xff] }
 0x210   : > { %3045 = vmatprep.subr.mxu0 %v10868_v62  ;;  %3304 = vmatprep.subr.mxu1 %v10869_v51  ;;  %v10924_v62 = vand.u32 4294901760, %v10766_v56  ;;  %v10926_v51 = vand.u32 4294901760, %v10768_v1  ;;  %v10931_v56 = vld [vmem:[#allocation13_spill] sm:$0xff]  ;;  %v3482_v1 = vld [vmem:[#allocation4 + $0xf0] sm:$0xff]  ;;  %v7935_v63 = vand.u32 4294901760, %v3475_v47  ;;  %v10954_v9 = vld [vmem:[#allocation24_spill] sm:$0xff] }
 0x211   : > { %3049 = vmatpush2.msra.mxu0 %v10871_v13  ;;  %3306 = vmatpush2.msra.mxu1 %v10872_v7  ;;  %v10929_v13 = vand.u32 4294901760, %v10771_v22  ;;  %v7861_v59 = vand.u32 4294901760, %v3482_v1 }
 0x212   : > { %3053 = vmatprep.subr.mxu0 %v10874_v57  ;;  %3308 = vmatprep.subr.mxu1 %v10875_v52  ;;  %v3481_v57 = vld [vmem:[#allocation4 + $0xe8] sm:$0xff]  ;;  %10953 = vst [vmem:[#allocation18_spill] sm:$0xff] %v7935_v63 }
 0x213   : > { %3057 = vmatpush2.msra.mxu0 %v10877_v29  ;;  %3310 = vmatpush2.msra.mxu1 %v10878_v44  ;;  %10933 = vst [vmem:[#allocation11_spill] sm:$0xff] %v7861_v59  ;;  %v7868_v52 = vand.u32 4294901760, %v3481_v57  ;;  %v10937_v29 = vld [vmem:[#allocation16_spill] sm:$0xff]  ;;  %v7873_v44 = vsub.f32 %v3482_v1, %v7861_v59 }
 0x214   : > { %3061 = vmatprep.subr.mxu0 %v10880_v24  ;;  %3312 = vmatprep.subr.mxu1 %v10881_v10  ;;  %v3479_v24 = vld [vmem:[#allocation4 + $0xd8] sm:$0xff]  ;;  %v10960_v1 = vld [vmem:[#allocation28_spill] sm:$0xff] }
 0x215   : > { %3065 = vmatpush2.msra.mxu0 %v10883_v8  ;;  %3314 = vmatpush2.msra.mxu1 %v10884_v60  ;;  %10936 = vst [vmem:[#allocation15_spill] sm:$0xff] %v7868_v52  ;;  %10938 = vst [vmem:[#allocation17_spill] sm:$0xff] %v7873_v44  ;;  %v7879_v5 = vsub.f32 %v3481_v57, %v7868_v52  ;;  %v7881_v8 = vand.u32 4294901760, %v3479_v24  ;;  %v3478_v60 = vld [vmem:[#allocation4 + $0xd0] sm:$0xff]  ;;  %v10016_v4 = vand.u32 4294901760, %v7873_v44 }
 0x216   : > { %3069 = vmatprep.subr.mxu0 %v10886_v43  ;;  %3316 = vmatprep.subr.mxu1 %v10887_v40  ;;  %v7886_v43 = vsub.f32 %v3480_v23, %v7875_v34  ;;  %v7888_v40 = vand.u32 4294901760, %v3478_v60 }
 0x217   : > { %3073 = vmatpush2.msra.mxu0 %v10889_v49  ;;  %3318 = vmatpush2.msra.mxu1 %v10890_v53  ;;  %10940 = vst [vmem:[#allocation32_spill] sm:$0xff] %v7879_v5  ;;  %10941 = vst [vmem:[#allocation31_spill] sm:$0xff] %v7881_v8  ;;  %v10944_v49 = vld [vmem:[#allocation14_spill] sm:$0xff]  ;;  %v10014_v27 = vand.u32 4294901760, %v7879_v5 }
 0x218   : > { %3077 = vmatprep.subr.mxu0 %v10892_v26  ;;  %3320 = vmatprep.subr.mxu1 %v10893_v42  ;;  %10942 = vst [vmem:[#allocation8_spill] sm:$0xff] %v7886_v43  ;;  %10943 = vst [vmem:[#allocation25_spill] sm:$0xff] %v7888_v40  ;;  %v7898_v26 = vsub.f32 %v3479_v24, %v7881_v8  ;;  %v7900_v42 = vand.u32 4294901760, %v3477_v45  ;;  %v10013_v11 = vand.u32 4294901760, %v7886_v43  ;;  %v3468_v24 = vld [vmem:[#allocation4 + $0x80] sm:$0xff] }
 0x219   : > { %3081 = vmatpush2.msra.mxu0 %v10895_v6  ;;  %3322 = vmatpush2.msra.mxu1 %v10896_v54  ;;  %v10947_v6 = vld [vmem:[#allocation21_spill] sm:$0xff]  ;;  %v3794_v54 = vsub.f32 %v7873_v44, %v10016_v4 }
 0x21a   : > { %3085 = vmatprep.subr.mxu0 %v10898_v31  ;;  %3324 = vmatprep.subr.mxu1 %v10899_v35  ;;  %10945 = vst [vmem:[#allocation22_spill] sm:$0xff] %v7898_v26  ;;  %10946 = vst [vmem:[#allocation26_spill] sm:$0xff] %v7900_v42  ;;  %v7909_v31 = vsub.f32 %v3478_v60, %v7888_v40  ;;  %v7911_v35 = vand.u32 4294901760, %v3476_v2  ;;  %v10011_v37 = vand.u32 4294901760, %v7898_v26  ;;  %v10963_v60 = vld [vmem:[#allocation29_spill] sm:$0xff] }
 0x21b   : > { %3089 = vmatpush2.msra.mxu0 %v10901_v12  ;;  %3326 = vmatpush2.msra.mxu1 %v10902_v17  ;;  %v3800_v17 = vsub.f32 %v7879_v5, %v10014_v27 }
 0x21c   : > { %3093 = vmatprep.subr.mxu0 %v10904_v41  ;;  %3328 = vmatprep.subr.mxu1 %v10905_v15  ;;  %10948 = vst [vmem:[#allocation39_spill] sm:$0xff] %v7909_v31  ;;  %10949 = vst [vmem:[#allocation30_spill] sm:$0xff] %v7911_v35  ;;  %v7918_v41 = vsub.f32 %v3477_v45, %v7900_v42  ;;  %v3474_v15 = vld [vmem:[#allocation4 + $0xb0] sm:$0xff]  ;;  %v10010_v48 = vand.u32 4294901760, %v7909_v31  ;;  %v3812_v32 = vsub.f32 %v7898_v26, %v10011_v37 }
 0x21d   : > { %3097 = vmatpush2.msra.mxu0 %v10906_v50  ;;  %3330 = vmatpush2.msra.mxu1 %v10907_v28  ;;  %v3795_v50 = vand.u32 4294901760, %v3794_v54  ;;  %v3806_v28 = vsub.f32 %v7886_v43, %v10013_v11  ;;  %v3492_v43 = vld [vmem:[#allocation4 + $0x140] sm:$0xff] }
 0x21e   : > { %3101 = vmatprep.subr.mxu0 %v10909_v18  ;;  %3332 = vmatprep.subr.mxu1 %v10910_v30  ;;  %10950 = vst [vmem:[#allocation12_spill] sm:$0xff] %v7918_v41  ;;  %v7926_v18 = vsub.f32 %v3476_v2, %v7911_v35  ;;  %v3473_v30 = vld [vmem:[#allocation4 + $0xa8] sm:$0xff] }
 0x21f   : > { %3105 = vmatpush2.msra.mxu0 %v10912_v25  ;;  %3334 = vmatpush2.msra.mxu1 %v10754_v14  ;;  %v10922_v14 = vand.u32 4294901760, %v10764_v61  ;;  %v3483_v61 = vld [vmem:[#allocation4 + $0xf8] sm:$0xff]  ;;  %v3801_v25 = vand.u32 4294901760, %v3800_v17 }
 0x220   : > { %3109 = vmatprep.subr.mxu0 %v10914_v20  ;;  %3336 = vmatprep.subr.mxu1 %v10756_v33  ;;  %v10923_v33 = vand.u32 4294901760, %v10765_v0  ;;  %v10930_v0 = vld [vmem:[#allocation142_spill] sm:$0xff]  ;;  %v7859_v7 = vand.u32 4294901760, %v3483_v61  ;;  %10951 = vst [vmem:[#allocation40_spill] sm:$0xff] %v7926_v18  ;;  %v10008_v20 = vand.u32 4294901760, %v7918_v41 }
 0x221   : > { %3113 = vmatpush2.msra.mxu0 %v10916_v55  ;;  %3338 = vmatpush2.msra.mxu1 %v10758_v58  ;;  %v10925_v58 = vld [vmem:[#allocation140_spill] sm:$0xff] }
 0x222   : > { %3117 = vmatprep.subr.mxu0 %v10918_v21  ;;  %3342 = vmatmul.mubr.f32.vlgmr.msra.gmra.mxu1 %v10919_v16  ;;  %10932 = vst [vmem:[#allocation34_spill] sm:$0xff] %v7859_v7  ;;  %v7866_v22 = vsub.f32 %v3483_v61, %v7859_v7  ;;  %v3472_v55 = vld [vmem:[#allocation4 + $0xa0] sm:$0xff]  ;;  %v3807_v21 = vand.u32 4294901760, %v3806_v28  ;;  %v3469_v61 = vld [vmem:[#allocation4 + $0x88] sm:$0xff]  ;;  %v7997_v28 = vand.u32 4294901760, %v3468_v24 }
 0x223   : > { %3121 = vmatpush2.msra.mxu0 %v10920_v36  ;;  %3348 = vmatprep.mubr.f32.mxu1 %v10921_v46  ;;  %v10007_v36 = vand.u32 4294901760, %v7926_v18 }
 0x224   : > { %3125 = vmatprep.subr.mxu0 %v10922_v14  ;;  %10935 = vst [vmem:[#allocation19_spill] sm:$0xff] %v7866_v22  ;;  %v10017_v10 = vand.u32 4294901760, %v7866_v22  ;;  %v3471_v14 = vld [vmem:[#allocation4 + $0x98] sm:$0xff]  ;;  %10969 = vst [vmem:[#allocation130_spill] sm:$0xff] %v7997_v28 }
 0x225   : > { %3129 = vmatpush2.msra.mxu0 %v10923_v33  ;;  %v3813_v33 = vand.u32 4294901760, %v3812_v32 }
 0x226   : > { %3133 = vmatprep.subr.mxu0 %v10924_v62  ;;  %3350 = vmatmul.mubr.f32.gmra.mxu1 %v10925_v58  ;;  %v3788_v53 = vsub.f32 %v7866_v22, %v10017_v10  ;;  %v3824_v62 = vsub.f32 %v7918_v41, %v10008_v20  ;;  %v3500_v41 = vld [vmem:[#allocation4 + $0x180] sm:$0xff] }
 0x227   : > { %3137 = vmatpush2.msra.mxu0 %v10926_v51  ;;  %3356 = vmatprep.mubr.f32.mxu1 %v10927_v3  ;;  %v7951_v51 = vand.u32 4294901760, %v3473_v30 }
 0x228   : > { %3141 = vmatprep.subr.mxu0 %v10928_v38  ;;  %v3789_v12 = vand.u32 4294901760, %v3788_v53  ;;  %v3825_v57 = vand.u32 4294901760, %v3824_v62 }
 0x229   : > { %3145 = vmatpush2.msra.mxu0 %v10929_v13  ;;  %10957 = vst [vmem:[#allocation45_spill] sm:$0xff] %v7951_v51  ;;  %v3830_v13 = vsub.f32 %v7926_v18, %v10007_v36  ;;  %v7967_v23 = vsub.f32 %v3473_v30, %v7951_v51  ;;  %v3467_v30 = vld [vmem:[#allocation4 + $0x78] sm:$0xff] }
 0x22a   : > { %3149 = vmatmul.mubr.f32.vlgmr.msra.gmra.mxu0 %v10919_v16  ;;  %3358 = vmatmul.mubr.f32.gmra.mxu1 %v10930_v0  ;;  %v3818_v16 = vsub.f32 %v7909_v31, %v10010_v48 }
 0x22b   : > { %3155 = vmatprep.mubr.f32.mxu0 %v10921_v46  ;;  %3364 = vmatprep.mubr.f32.mxu1 %v10931_v56  ;;  %v7943_v46 = vand.u32 4294901760, %v3474_v15  ;;  %10961 = vst [vmem:[#allocation33_spill] sm:$0xff] %v7967_v23  ;;  %v3831_v45 = vand.u32 4294901760, %v3830_v13  ;;  %v8014_v13 = vsub.f32 %v3468_v24, %v7997_v28 }
 0x22c   : > { %3529 = vmatprep.subr.mxu0 %v7859_v7  ;;  %3790 = vmatprep.subr.mxu1 %v3789_v12  ;;  %v3819_v38 = vand.u32 4294901760, %v3818_v16 }
 0x22d   : > { %3531 = vmatpush1.msra.mxu0 %v7861_v59  ;;  %10955 = vst [vmem:[#allocation42_spill] sm:$0xff] %v7943_v46  ;;  %3796 = vmatpush1.msra.mxu1 %v3795_v50  ;;  %10972 = vst [vmem:[#allocation132_spill] sm:$0xff] %v8014_v13 }
 0x22e   : > { %3157 = vmatmul.mubr.f32.gmra.mxu0 %v10925_v58  ;;  %3366 = vmatmul.mubr.f32.gmra.mxu1 %v10934_v39  ;;  %v7949_v58 = vsub.f32 %v3475_v47, %v7935_v63  ;;  %v10001_v47 = vand.u32 4294901760, %v7967_v23 }
 0x22f   : > { %3163 = vmatprep.mubr.f32.mxu0 %v10927_v3  ;;  %3372 = vmatprep.mubr.f32.mxu1 %v10937_v29  ;;  %v3470_v3 = vld [vmem:[#allocation4 + $0x90] sm:$0xff] }
 0x230   : > { %3533 = vmatprep.subr.mxu0 %v7868_v52  ;;  %10956 = vst [vmem:[#allocation35_spill] sm:$0xff] %v7949_v58  ;;  %v7977_v2 = vand.u32 4294901760, %v3470_v3  ;;  %3802 = vmatprep.subr.mxu1 %v3801_v25  ;;  %v10970_v25 = vld [vmem:[#allocation43_spill] sm:$0xff] }
 0x231   : > { %3535 = vmatpush1.msra.mxu0 %v7875_v34  ;;  %3808 = vmatpush1.msra.mxu1 %v3807_v21 }
 0x232   : > { %3165 = vmatmul.mubr.f32.gmra.mxu0 %v10930_v0  ;;  %3374 = vmatmul.mubr.f32.gmra.mxu1 %v10944_v49  ;;  %v7958_v0 = vsub.f32 %v3474_v15, %v7943_v46  ;;  %10965 = vst [vmem:[#allocation73_spill] sm:$0xff] %v7977_v2  ;;  %v7994_v50 = vsub.f32 %v3470_v3, %v7977_v2 }
 0x233   : > { %3171 = vmatprep.mubr.f32.mxu0 %v10931_v56  ;;  %3380 = vmatprep.mubr.f32.mxu1 %v10947_v6  ;;  %v7960_v56 = vand.u32 4294901760, %v3472_v55 }
 0x234   : > { %3537 = vmatprep.subr.mxu0 %v7881_v8  ;;  %10958 = vst [vmem:[#allocation20_spill] sm:$0xff] %v7958_v0  ;;  %v10004_v53 = vand.u32 4294901760, %v7958_v0  ;;  %10968 = vst [vmem:[#allocation112_spill] sm:$0xff] %v7994_v50  ;;  %3814 = vmatprep.subr.mxu1 %v3813_v33  ;;  %v10006_v3 = vand.u32 4294901760, %v7994_v50  ;;  %v8021_v33 = vand.u32 4294901760, %v3467_v30 }
 0x235   : > { %10959 = vst [vmem:[#allocation49_spill] sm:$0xff] %v7960_v56  ;;  %3539 = vmatpush1.msra.mxu0 %v7888_v40  ;;  %3820 = vmatpush1.msra.mxu1 %v3819_v38  ;;  %v10012_v38 = vand.u32 4294901760, %v8014_v13 }
 0x236   : > { %3173 = vmatmul.mubr.f32.gmra.mxu0 %v10934_v39  ;;  %3382 = vmatmul.mubr.f32.gmra.mxu1 %v10952_v19  ;;  %v10005_v39 = vand.u32 4294901760, %v7949_v58  ;;  %v3842_v17 = vsub.f32 %v7958_v0, %v10004_v53  ;;  %10973 = vst [vmem:[#allocation9_spill] sm:$0xff] %v8021_v33  ;;  %v3866_v24 = vsub.f32 %v7994_v50, %v10006_v3  ;;  %v3462_v3 = vld [vmem:[#allocation4 + $0x50] sm:$0xff] }
 0x237   : > { %3179 = vmatprep.mubr.f32.mxu0 %v10937_v29  ;;  %3388 = vmatprep.mubr.f32.mxu1 %v10954_v9  ;;  %v7969_v29 = vand.u32 4294901760, %v3471_v14 }
 0x238   : > { %v3836_v54 = vsub.f32 %v7949_v58, %v10005_v39  ;;  %3541 = vmatprep.subr.mxu0 %v7900_v42  ;;  %v3843_v62 = vand.u32 4294901760, %v3842_v17  ;;  %v3464_v17 = vld [vmem:[#allocation4 + $0x60] sm:$0xff]  ;;  %3826 = vmatprep.subr.mxu1 %v3825_v57  ;;  %v3867_v20 = vand.u32 4294901760, %v3866_v24  ;;  %v3503_v58 = vld [vmem:[#allocation4 + $0x198] sm:$0xff] }
 0x239   : > { %10962 = vst [vmem:[#allocation38_spill] sm:$0xff] %v7969_v29  ;;  %v7984_v12 = vsub.f32 %v3471_v14, %v7969_v29  ;;  %3543 = vmatpush1.msra.mxu0 %v7911_v35  ;;  %v3466_v14 = vld [vmem:[#allocation4 + $0x70] sm:$0xff]  ;;  %3832 = vmatpush1.msra.mxu1 %v3831_v45  ;;  %v3460_v24 = vld [vmem:[#allocation4 + $0x40] sm:$0xff] }
 0x23a   : > { %3181 = vmatmul.mubr.f32.gmra.mxu0 %v10944_v49  ;;  %3390 = vmatmul.mubr.f32.gmra.mxu1 %v10960_v1  ;;  %v7975_v49 = vsub.f32 %v3472_v55, %v7960_v56  ;;  %v3837_v32 = vand.u32 4294901760, %v3836_v54  ;;  %v3848_v55 = vsub.f32 %v7967_v23, %v10001_v47  ;;  %v3465_v54 = vld [vmem:[#allocation4 + $0x68] sm:$0xff]  ;;  %v3507_v23 = vld [vmem:[#allocation4 + $0x1b8] sm:$0xff] }
 0x23b   : > { %3187 = vmatprep.mubr.f32.mxu0 %v10947_v6  ;;  %3396 = vmatprep.mubr.f32.mxu1 %v10963_v60  ;;  %10966 = vst [vmem:[#allocation59_spill] sm:$0xff] %v7984_v12  ;;  %v7987_v6 = vand.u32 4294901760, %v3469_v61  ;;  %v10003_v21 = vand.u32 4294901760, %v7984_v12  ;;  %v8037_v39 = vand.u32 4294901760, %v3465_v54 }
 0x23c   : > { %10964 = vst [vmem:[#allocation68_spill] sm:$0xff] %v7975_v49  ;;  %v10002_v15 = vand.u32 4294901760, %v7975_v49  ;;  %v3849_v47 = vand.u32 4294901760, %v3848_v55  ;;  %3545 = vmatprep.subr.mxu0 %v7935_v63  ;;  %v8028_v55 = vand.u32 4294901760, %v3466_v14  ;;  %3838 = vmatprep.subr.mxu1 %v3837_v32 }
 0x23d   : > { %10967 = vst [vmem:[#allocation65_spill] sm:$0xff] %v7987_v6  ;;  %v8006_v16 = vsub.f32 %v3469_v61, %v7987_v6  ;;  %v3860_v61 = vsub.f32 %v7984_v12, %v10003_v21  ;;  %3547 = vmatpush1.msra.mxu0 %v7943_v46  ;;  %v3463_v21 = vld [vmem:[#allocation4 + $0x58] sm:$0xff]  ;;  %10976 = vst [vmem:[#allocation128_spill] sm:$0xff] %v8037_v39  ;;  %3844 = vmatpush1.msra.mxu1 %v3843_v62 }
 0x23e   : > { %3189 = vmatmul.mubr.f32.gmra.mxu0 %v10952_v19  ;;  %3398 = vmatmul.mubr.f32.gmra.mxu1 %v10970_v25  ;;  %v3854_v19 = vsub.f32 %v7975_v49, %v10002_v15  ;;  %10974 = vst [vmem:[#allocation123_spill] sm:$0xff] %v8028_v55  ;;  %v8046_v45 = vsub.f32 %v3466_v14, %v8028_v55  ;;  %v8055_v32 = vand.u32 4294901760, %v3463_v21 }
 0x23f   : > { %10971 = vst [vmem:[#allocation131_spill] sm:$0xff] %v8006_v16  ;;  %3195 = vmatprep.mubr.f32.mxu0 %v10954_v9  ;;  %v10009_v9 = vand.u32 4294901760, %v8006_v16  ;;  %v3861_v53 = vand.u32 4294901760, %v3860_v61  ;;  %v8048_v61 = vand.u32 4294901760, %v3464_v17  ;;  %3549 = vmatprep.subr.mxu0 %v7951_v51 }
 0x240   : > { %v3855_v15 = vand.u32 4294901760, %v3854_v19  ;;  %v8035_v19 = vsub.f32 %v3467_v30, %v8021_v33  ;;  %10977 = vst [vmem:[#allocation129_spill] sm:$0xff] %v8046_v45  ;;  %v3461_v30 = vld [vmem:[#allocation4 + $0x48] sm:$0xff]  ;;  %10980 = vst [vmem:[#allocation135_spill] sm:$0xff] %v8055_v32  ;;  %3850 = vmatprep.subr.mxu1 %v3849_v47  ;;  %3551 = vmatpush1.msra.mxu0 %v7960_v56  ;;  %v8072_v47 = vsub.f32 %v3463_v21, %v8055_v32  ;;  %v3459_v21 = vld [vmem:[#allocation4 + $0x38] sm:$0xff] }
 0x241   : > { %v3872_v57 = vsub.f32 %v8006_v16, %v10009_v9  ;;  %10978 = vst [vmem:[#allocation133_spill] sm:$0xff] %v8048_v61  ;;  %v8062_v62 = vsub.f32 %v3464_v17, %v8048_v61  ;;  %3553 = vmatprep.subr.mxu0 %v7969_v29  ;;  %v3493_v29 = vld [vmem:[#allocation4 + $0x148] sm:$0xff] }
 0x242   : > { %3197 = vmatmul.mubr.f32.gmra.mxu0 %v10960_v1  ;;  %10975 = vst [vmem:[#allocation127_spill] sm:$0xff] %v8035_v19  ;;  %v3878_v1 = vsub.f32 %v8014_v13, %v10012_v38  ;;  %v10015_v48 = vand.u32 4294901760, %v8035_v19  ;;  %v10018_v38 = vand.u32 4294901760, %v8046_v45  ;;  %3856 = vmatpush1.msra.mxu1 %v3855_v15  ;;  %10983 = vst [vmem:[#allocation37_spill] sm:$0xff] %v8072_v47  ;;  %v3458_v15 = vld [vmem:[#allocation4 + $0x30] sm:$0xff] }
 0x243   : > { %3203 = vmatprep.mubr.f32.mxu0 %v10963_v60  ;;  %v3873_v9 = vand.u32 4294901760, %v3872_v57  ;;  %v8053_v60 = vsub.f32 %v3465_v54, %v8037_v39  ;;  %10981 = vst [vmem:[#allocation10_spill] sm:$0xff] %v8062_v62  ;;  %v8064_v57 = vand.u32 4294901760, %v3462_v3  ;;  %3862 = vmatprep.subr.mxu1 %v3861_v53 }
 0x244   : > { %v8040_v36 = vpop.f32.mrf.mxu1  ;;  %v3879_v14 = vand.u32 4294901760, %v3878_v1  ;;  %v3884_v54 = vsub.f32 %v8035_v19, %v10015_v48  ;;  %v8074_v1 = vand.u32 4294901760, %v3461_v30  ;;  %v3890_v17 = vsub.f32 %v8046_v45, %v10018_v38  ;;  %3868 = vmatpush1.msra.mxu1 %v3867_v20  ;;  %3555 = vmatpush1.msra.mxu0 %v7977_v2  ;;  %v3456_v20 = vld [vmem:[#allocation4 + $0x20] sm:$0xff] }
 0x245   : > { %10979 = vst [vmem:[#allocation134_spill] sm:$0xff] %v8053_v60  ;;  %10982 = vst [vmem:[#allocation48_spill] sm:$0xff] %v8064_v57  ;;  %v10023_v11 = vand.u32 4294901760, %v8053_v60  ;;  %v8086_v48 = vand.u32 4294901760, %v3460_v24  ;;  %3874 = vmatprep.subr.mxu1 %v3873_v9  ;;  %v10988_v45 = vand.u32 4294901760, %v8062_v62  ;;  %3557 = vmatprep.subr.mxu0 %v7987_v6  ;;  %v3499_v6 = vld [vmem:[#allocation4 + $0x178] sm:$0xff] }
 0x246   : > { %v8057_v37 = vpop.f32.mrf.mxu1  ;;  %3205 = vmatmul.mubr.f32.gmra.mxu0 %v10970_v25  ;;  %10984 = vst [vmem:[#allocation52_spill] sm:$0xff] %v8074_v1  ;;  %v8084_v25 = vsub.f32 %v3462_v3, %v8064_v57  ;;  %v3885_v4 = vand.u32 4294901760, %v3884_v54  ;;  %v8094_v38 = vsub.f32 %v3461_v30, %v8074_v1  ;;  %v3891_v3 = vand.u32 4294901760, %v3890_v17  ;;  %3880 = vmatpush1.msra.mxu1 %v3879_v14 }
 0x247   : > { %10986 = vst [vmem:[#allocation41_spill] sm:$0xff] %v8086_v48  ;;  %v3896_v53 = vsub.f32 %v8053_v60, %v10023_v11  ;;  %v3902_v19 = vsub.f32 %v8062_v62, %v10988_v45  ;;  %v8102_v54 = vsub.f32 %v3460_v24, %v8086_v48  ;;  %v3457_v11 = vld [vmem:[#allocation4 + $0x28] sm:$0xff]  ;;  %v10990_v60 = vand.u32 4294901760, %v8072_v47  ;;  %3559 = vmatpush1.msra.mxu0 %v7997_v28 }
 0x248   : > { %v8076_v27 = vpop.f32.mrf.mxu1  ;;  %10985 = vst [vmem:[#allocation53_spill] sm:$0xff] %v8084_v25  ;;  %10987 = vst [vmem:[#allocation56_spill] sm:$0xff] %v8094_v38  ;;  %v8111_v45 = vand.u32 4294901760, %v3459_v21  ;;  %3886 = vmatprep.subr.mxu1 %v3885_v4  ;;  %v10992_v24 = vand.u32 4294901760, %v8084_v25  ;;  %3561 = vmatprep.subr.mxu0 %v8021_v33 }
 0x249   : > { %10989 = vst [vmem:[#allocation44_spill] sm:$0xff] %v8102_v54  ;;  %v3897_v30 = vand.u32 4294901760, %v3896_v53  ;;  %v3908_v9 = vsub.f32 %v8072_v47, %v10990_v60  ;;  %v3903_v62 = vand.u32 4294901760, %v3902_v19  ;;  %v8118_v53 = vand.u32 4294901760, %v3458_v15  ;;  %v3455_v60 = vld [vmem:[#allocation4 + $0x18] sm:$0xff]  ;;  %3892 = vmatpush1.msra.mxu1 %v3891_v3  ;;  %3563 = vmatpush1.msra.mxu0 %v8028_v55 }
 0x24a   : > { %v8104_v10 = vpop.f32.mrf.mxu1  ;;  %10991 = vst [vmem:[#allocation57_spill] sm:$0xff] %v8111_v45  ;;  %v3914_v13 = vsub.f32 %v8084_v25, %v10992_v24  ;;  %v10994_v47 = vand.u32 4294901760, %v8094_v38  ;;  %v8124_v4 = vsub.f32 %v3459_v21, %v8111_v45  ;;  %v8127_v19 = vand.u32 4294901760, %v3457_v11  ;;  %v3454_v24 = vld [vmem:[#allocation4 + $0x10] sm:$0xff]  ;;  %3565 = vmatprep.subr.mxu0 %v8037_v39 }
 0x24b   : > { %10993 = vst [vmem:[#allocation46_spill] sm:$0xff] %v8118_v53  ;;  %v3909_v17 = vand.u32 4294901760, %v3908_v9  ;;  %3898 = vmatprep.subr.mxu1 %v3897_v30  ;;  %v10997_v25 = vand.u32 4294901760, %v8102_v54  ;;  %v8133_v3 = vsub.f32 %v3458_v15, %v8118_v53  ;;  %3567 = vmatpush1.msra.mxu0 %v8048_v61 }
 0x24c   : > { %v3920_v16 = vsub.f32 %v8094_v38, %v10994_v47  ;;  %10995 = vst [vmem:[#allocation60_spill] sm:$0xff] %v8124_v4  ;;  %10996 = vst [vmem:[#allocation47_spill] sm:$0xff] %v8127_v19  ;;  %v3915_v14 = vand.u32 4294901760, %v3914_v13  ;;  %v8136_v47 = vand.u32 4294901760, %v3456_v20  ;;  %v8138_v21 = vpop.f32.mrf.mxu1  ;;  %3904 = vmatpush1.msra.mxu1 %v3903_v62  ;;  %v10048_v38 = vand.u32 4294901760, %v8124_v4  ;;  %3569 = vmatprep.subr.mxu0 %v8055_v32 }
 0x24d   : > { %v3926_v50 = vsub.f32 %v8102_v54, %v10997_v25  ;;  %10998 = vst [vmem:[#allocation61_spill] sm:$0xff] %v8133_v3  ;;  %v8142_v30 = vsub.f32 %v3457_v11, %v8127_v19  ;;  %v8145_v13 = vand.u32 4294901760, %v3455_v60  ;;  %v3453_v25 = vld [vmem:[#allocation4 + $0x8] sm:$0xff]  ;;  %3910 = vmatprep.subr.mxu1 %v3909_v17  ;;  %v10051_v12 = vand.u32 4294901760, %v8133_v3  ;;  %3571 = vmatpush1.msra.mxu0 %v8064_v57 }
 0x24e   : > { %10999 = vst [vmem:[#allocation50_spill] sm:$0xff] %v8136_v47  ;;  %v3921_v9 = vand.u32 4294901760, %v3920_v16  ;;  %v8147_v15 = vpop.f32.mrf.mxu0  ;;  %v8151_v49 = vsub.f32 %v3456_v20, %v8136_v47  ;;  %v8154_v16 = vand.u32 4294901760, %v3454_v24  ;;  %3916 = vmatpush1.msra.mxu1 %v3915_v14  ;;  %v3932_v11 = vsub.f32 %v8124_v4, %v10048_v38  ;;  %3573 = vmatprep.subr.mxu0 %v8074_v1  ;;  %v3452_v38 = vld [vmem:[#allocation4] sm:$0xff]  ;;  %v3515_v20 = vld [vmem:[#allocation4 + $0x1f8] sm:$0xff] }
 0x24f   : > { %11000 = vst [vmem:[#allocation62_spill] sm:$0xff] %v8142_v30  ;;  %11001 = vst [vmem:[#allocation51_spill] sm:$0xff] %v8145_v13  ;;  %v3927_v54 = vand.u32 4294901760, %v3926_v50  ;;  %v8161_v61 = vsub.f32 %v3455_v60, %v8145_v13  ;;  %v3938_v50 = vsub.f32 %v8133_v3, %v10051_v12  ;;  %v8172_v14 = vand.u32 4294901760, %v3453_v25  ;;  %v8176_v60 = vpop.f32.mrf.mxu1  ;;  %3575 = vmatpush1.msra.mxu0 %v8086_v48 }
 0x250   : > { %11002 = vst [vmem:[#allocation66_spill] sm:$0xff] %v8151_v49  ;;  %11003 = vst [vmem:[#allocation139_spill] sm:$0xff] %v8154_v16  ;;  %3922 = vmatprep.subr.mxu1 %v3921_v9  ;;  %v8169_v17 = vsub.f32 %v3454_v24, %v8154_v16  ;;  %v8174_v62 = vpop.f32.mrf.mxu0  ;;  %v3933_v9 = vand.u32 4294901760, %v3932_v11  ;;  %v11007_v4 = vand.u32 4294901760, %v8142_v30  ;;  %v11008_v3 = vand.u32 4294901760, %v8151_v49  ;;  %3577 = vmatprep.subr.mxu0 %v8111_v45  ;;  %v3513_v11 = vld [vmem:[#allocation4 + $0x1e8] sm:$0xff] }
 0x251   : > { %11004 = vst [vmem:[#allocation54_spill] sm:$0xff] %v8161_v61  ;;  %11006 = vst [vmem:[#allocation55_spill] sm:$0xff] %v8172_v14  ;;  %3928 = vmatpush1.msra.mxu1 %v3927_v54  ;;  %v3939_v24 = vand.u32 4294901760, %v3938_v50  ;;  %v10068_v57 = vand.u32 4294901760, %v8161_v61  ;;  %v3514_v54 = vld [vmem:[#allocation4 + $0x1f0] sm:$0xff]  ;;  %3579 = vmatpush1.msra.mxu0 %v8118_v53  ;;  %v8200_v45 = vand.u32 4294901760, %v3515_v20 }
 0x252   : > { %11005 = vst [vmem:[#allocation67_spill] sm:$0xff] %v8169_v17  ;;  %v3944_v12 = vsub.f32 %v8142_v30, %v11007_v4  ;;  %v3950_v1 = vsub.f32 %v8151_v49, %v11008_v3  ;;  %v10069_v32 = vand.u32 4294901760, %v8169_v17  ;;  %3934 = vmatprep.subr.mxu1 %v3933_v9  ;;  %v8189_v4 = vsub.f32 %v3453_v25, %v8172_v14  ;;  %v8205_v25 = vpop.f32.mrf.mxu1 }
 0x253   : > { %v8191_v30 = vand.u32 4294901760, %v3452_v38  ;;  %3940 = vmatpush1.msra.mxu1 %v3939_v24  ;;  %v3956_v3 = vsub.f32 %v8161_v61, %v10068_v57  ;;  %11011 = vst [vmem:[#allocation63_spill] sm:$0xff] %v8200_v45  ;;  %3581 = vmatprep.subr.mxu0 %v8127_v19  ;;  %v8211_v24 = vand.u32 4294901760, %v3514_v54  ;;  %v8213_v57 = vand.u32 4294901760, %v3513_v11 }
 0x254   : > { %v3945_v39 = vand.u32 4294901760, %v3944_v12  ;;  %11009 = vst [vmem:[#allocation58_spill] sm:$0xff] %v8189_v4  ;;  %v3951_v50 = vand.u32 4294901760, %v3950_v1  ;;  %v3962_v49 = vsub.f32 %v8169_v17, %v10069_v32  ;;  %v10082_v9 = vand.u32 4294901760, %v8189_v4  ;;  %3583 = vmatpush1.msra.mxu0 %v8136_v47  ;;  %v3512_v32 = vld [vmem:[#allocation4 + $0x1e0] sm:$0xff]  ;;  %v3509_v47 = vld [vmem:[#allocation4 + $0x1c8] sm:$0xff] }
 0x255   : > { %11010 = vst [vmem:[#allocation72_spill] sm:$0xff] %v8191_v30  ;;  %v8209_v1 = vsub.f32 %v3452_v38, %v8191_v30  ;;  %11013 = vst [vmem:[#allocation64_spill] sm:$0xff] %v8211_v24  ;;  %v3957_v17 = vand.u32 4294901760, %v3956_v3  ;;  %v8217_v19 = vsub.f32 %v3515_v20, %v8200_v45  ;;  %3585 = vmatprep.subr.mxu0 %v8145_v13  ;;  %v8234_v3 = vand.u32 4294901760, %v3512_v32  ;;  %v8237_v13 = vpop.f32.mrf.mxu1 }
 0x256   : > { %v8203_v12 = vpop.f32.mrf.mxu0  ;;  %3946 = vmatprep.subr.mxu1 %v3945_v39  ;;  %11014 = vst [vmem:[#allocation77_spill] sm:$0xff] %v8213_v57  ;;  %v3963_v61 = vand.u32 4294901760, %v3962_v49  ;;  %v3968_v38 = vsub.f32 %v8189_v4, %v10082_v9  ;;  %v8227_v48 = vsub.f32 %v3514_v54, %v8211_v24  ;;  %v3511_v49 = vld [vmem:[#allocation4 + $0x1d8] sm:$0xff]  ;;  %3587 = vmatpush1.msra.mxu0 %v8154_v16  ;;  %v3510_v16 = vld [vmem:[#allocation4 + $0x1d0] sm:$0xff]  ;;  %v8280_v55 = vand.u32 4294901760, %v3509_v47 }
 0x257   : > { %11012 = vst [vmem:[#allocation76_spill] sm:$0xff] %v8209_v1  ;;  %3952 = vmatpush1.msra.mxu1 %v3951_v50  ;;  %11015 = vst [vmem:[#allocation78_spill] sm:$0xff] %v8217_v19  ;;  %v10089_v53 = vand.u32 4294901760, %v8209_v1  ;;  %v8230_v50 = vsub.f32 %v3513_v11, %v8213_v57  ;;  %v10096_v20 = vand.u32 4294901760, %v8217_v19  ;;  %3589 = vmatprep.subr.mxu0 %v8172_v14 }
 0x258   : > { %v8220_v39 = vpop.f32.mrf.mxu0  ;;  %11016 = vst [vmem:[#allocation69_spill] sm:$0xff] %v8227_v48  ;;  %3958 = vmatprep.subr.mxu1 %v3957_v17  ;;  %11018 = vst [vmem:[#allocation70_spill] sm:$0xff] %v8234_v3  ;;  %v3969_v9 = vand.u32 4294901760, %v3968_v38  ;;  %v10103_v11 = vand.u32 4294901760, %v8227_v48  ;;  %3591 = vmatpush1.msra.mxu0 %v8191_v30  ;;  %v8253_v38 = vand.u32 4294901760, %v3511_v49 }
 0x259   : > { %11017 = vst [vmem:[#allocation82_spill] sm:$0xff] %v8230_v50  ;;  %3964 = vmatpush1.msra.mxu1 %v3963_v61  ;;  %v3974_v54 = vsub.f32 %v8209_v1, %v10089_v53  ;;  %v3980_v14 = vsub.f32 %v8217_v19, %v10096_v20  ;;  %v8251_v61 = vsub.f32 %v3512_v32, %v8234_v3  ;;  %v11021_v1 = vand.u32 4294901760, %v8230_v50 }
 0x25a   : > { %11020 = vst [vmem:[#allocation71_spill] sm:$0xff] %v8253_v38  ;;  %3593 = vmatprep.subr.mxu0 %v8200_v45  ;;  %3970 = vmatprep.subr.mxu1 %v3969_v9  ;;  %v3986_v4 = vsub.f32 %v8227_v48, %v10103_v11  ;;  %v8267_v45 = vsub.f32 %v3511_v49, %v8253_v38  ;;  %v8269_v9 = vand.u32 4294901760, %v3510_v16  ;;  %v3506_v11 = vld [vmem:[#allocation4 + $0x1b0] sm:$0xff]  ;;  %v2363_v48 = vpop.f32.mrf.mxu1  ;;  %11025 = vst [vmem:[#allocation75_spill] sm:$0xff] %v8280_v55 }
 0x25b   : > { %v8245_v17 = vpop.f32.mrf.mxu0  ;;  %11019 = vst [vmem:[#allocation83_spill] sm:$0xff] %v8251_v61  ;;  %v3975_v53 = vand.u32 4294901760, %v3974_v54  ;;  %v3992_v30 = vsub.f32 %v8230_v50, %v11021_v1  ;;  %3595 = vmatpush2.msra.mxu0 %v8211_v24  ;;  %v3981_v32 = vand.u32 4294901760, %v3980_v14  ;;  %v10112_v19 = vand.u32 4294901760, %v8251_v61  ;;  %v3508_v54 = vld [vmem:[#allocation4 + $0x1c0] sm:$0xff] }
 0x25c   : > { %11022 = vst [vmem:[#allocation84_spill] sm:$0xff] %v8267_v45  ;;  %11023 = vst [vmem:[#allocation74_spill] sm:$0xff] %v8269_v9  ;;  %3597 = vmatprep.subr.mxu0 %v8213_v57  ;;  %v3987_v1 = vand.u32 4294901760, %v3986_v4  ;;  %v10123_v49 = vand.u32 4294901760, %v8267_v45  ;;  %v8278_v24 = vsub.f32 %v3510_v16, %v8269_v9  ;;  %v8290_v4 = vand.u32 4294901760, %v3508_v54 }
 0x25d   : > { %v8263_v20 = vpop.f32.mrf.mxu0  ;;  %3976 = vmatpush1.msra.mxu1 %v3975_v53  ;;  %v3993_v50 = vand.u32 4294901760, %v3992_v30  ;;  %3599 = vmatpush2.msra.mxu0 %v8234_v3  ;;  %v3998_v14 = vsub.f32 %v8251_v61, %v10112_v19  ;;  %v8286_v53 = vld [vmem:[%s9534_s4] sm:$0x3]  ;;  %v8294_v19 = vand.u32 4294901760, %v3506_v11  ;;  %v8302_v3 = vpop.f32.mrf.mxu1  ;;  %v8307_v57 = vsub.f32 %v3509_v47, %v8280_v55 }
 0x25e   : > { %3982 = vmatprep.subr.mxu1 %v3981_v32  ;;  %11024 = vst [vmem:[#allocation88_spill] sm:$0xff] %v8278_v24  ;;  %3601 = vmatprep.subr.mxu0 %v8253_v38  ;;  %11026 = vst [vmem:[#allocation89_spill] sm:$0xff] %v8290_v4  ;;  %v8292_v32 = vand.u32 4294901760, %v3507_v23  ;;  %v4004_v61 = vsub.f32 %v8267_v45, %v10123_v49  ;;  %v8310_v0 = vsub.f32 %v3508_v54, %v8290_v4  ;;  %v3505_v49 = vld [vmem:[#allocation4 + $0x1a8] sm:$0xff]  ;;  %v3504_v38 = vld [vmem:[#allocation4 + $0x1a0] sm:$0xff] }
 0x25f   : > { %3988 = vmatpush2.msra.mxu1 %v3987_v1  ;;  %11028 = vst [vmem:[#allocation92_spill] sm:$0xff] %v8294_v19  ;;  %3603 = vmatpush2.msra.mxu0 %v8269_v9  ;;  %v3999_v16 = vand.u32 4294901760, %v3998_v14  ;;  %11029 = vst [vmem:[#allocation80_spill] sm:$0xff] %v8307_v57  ;;  %v8316_v14 = vsub.f32 %v3506_v11, %v8294_v19  ;;  %v11033_v45 = vld [vmem:[#allocation136_spill] sm:$0xff]  ;;  %v8334_v18 = vand.u32 4294901760, %v3504_v38 }
 0x260   : > { %v8288_v30 = vpop.f32.mrf.mxu0  ;;  %11027 = vst [vmem:[#allocation79_spill] sm:$0xff] %v8292_v32  ;;  %3994 = vmatprep.subr.mxu1 %v3993_v50  ;;  %3605 = vmatprep.subr.mxu0 %v8280_v55  ;;  %11030 = vst [vmem:[#allocation93_spill] sm:$0xff] %v8310_v0  ;;  %v8313_v50 = vsub.f32 %v3507_v23, %v8292_v32  ;;  %v8321_v9 = vrot.slane %v8286_v53, %v11033_v45  ;;  %v4005_v47 = vand.u32 4294901760, %v4004_v61 }
 0x261   : > { %11032 = vst [vmem:[#allocation94_spill] sm:$0xff] %v8316_v14  ;;  %3607 = vmatpush2.msra.mxu0 %v8290_v4  ;;  %4000 = vmatpush2.msra.mxu1 %v3999_v16  ;;  %v11034_v55 = vand.u32 4294901760, %v8278_v24  ;;  %v10146_v23 = vand.u32 4294901760, %v8307_v57  ;;  %v8332_v16 = vand.u32 4294901760, %v3505_v49  ;;  %11036 = vst [vmem:[#allocation98_spill] sm:$0xff] %v8334_v18  ;;  %v11037_v33 = vand.u32 4294901760, %v8310_v0 }
 0x262   : > { %v8304_v1 = vpop.f32.mrf.mxu0  ;;  %11031 = vst [vmem:[#allocation81_spill] sm:$0xff] %v8313_v50  ;;  %3609 = vmatprep.subr.mxu0 %v8292_v32  ;;  %4006 = vmatprep.subr.mxu1 %v4005_v47  ;;  %v11039_v32 = vand.u32 4294901760, %v8316_v14  ;;  %v1827_v63 = vadd.f32 %v8147_v15, %v8321_v9  ;;  %v1843_v8 = vadd.f32 %v8203_v12, %v8321_v9 }
 0x263   : > { %v4010_v54 = vsub.f32 %v8278_v24, %v11034_v55  ;;  %3611 = vmatpush2.msra.mxu0 %v8294_v19  ;;  %11035 = vst [vmem:[#allocation85_spill] sm:$0xff] %v8332_v16  ;;  %v2371_v55 = vpop.f32.mrf.mxu1  ;;  %v4016_v11 = vsub.f32 %v8307_v57, %v10146_v23  ;;  %v4022_v4 = vsub.f32 %v8310_v0, %v11037_v33  ;;  %v11038_v19 = vand.u32 4294901760, %v8313_v50  ;;  %v3502_v33 = vld [vmem:[#allocation4 + $0x190] sm:$0xff]  ;;  %v3501_v0 = vld [vmem:[#allocation4 + $0x188] sm:$0xff] }
 0x264   : > { %v4034_v28 = vsub.f32 %v8316_v14, %v11039_v32  ;;  %v8355_v23 = vsub.f32 %v3504_v38, %v8334_v18  ;;  %v8357_v57 = vand.u32 4294901760, %v3503_v58  ;;  %3613 = vmatprep.subr.mxu0 %v8332_v16  ;;  %v1859_v52 = vadd.f32 %v8245_v17, %v8321_v9 }
 0x265   : > { %v1890_v45 = vpop.f32.mrf.mxu0  ;;  %v4011_v61 = vand.u32 4294901760, %v4010_v54  ;;  %v4028_v47 = vsub.f32 %v8313_v50, %v11038_v19  ;;  %v4017_v50 = vand.u32 4294901760, %v4016_v11  ;;  %3615 = vmatpush2.msra.mxu0 %v8334_v18  ;;  %v8366_v31 = vpop.f32.mrf.mxu1  ;;  %v8381_v18 = vand.u32 4294901760, %v3500_v41 }
 0x266   : > { %v1891_v24 = vadd.f32 %v1890_v45, %v8321_v9  ;;  %v8352_v45 = vsub.f32 %v3505_v49, %v8332_v16  ;;  %11041 = vst [vmem:[#allocation99_spill] sm:$0xff] %v8355_v23  ;;  %11042 = vst [vmem:[#allocation87_spill] sm:$0xff] %v8357_v57  ;;  %v4035_v49 = vand.u32 4294901760, %v4034_v28  ;;  %v10170_v38 = vand.u32 4294901760, %v8355_v23  ;;  %3617 = vmatprep.subr.mxu0 %v8357_v57 }
 0x267   : > { %v8346_v54 = vpop.f32.mrf.mxu0  ;;  %4012 = vmatpush2.msra.mxu1 %v4011_v61  ;;  %v4023_v61 = vand.u32 4294901760, %v4022_v4  ;;  %v4029_v32 = vand.u32 4294901760, %v4028_v47  ;;  %v8373_v4 = vand.u32 4294901760, %v3501_v0  ;;  %11046 = vst [vmem:[#allocation91_spill] sm:$0xff] %v8381_v18  ;;  %v8397_v2 = vsub.f32 %v3500_v41, %v8381_v18 }
 0x268   : > { %11040 = vst [vmem:[#allocation86_spill] sm:$0xff] %v8352_v45  ;;  %v8360_v19 = vadd.f32 %v2363_v48, %v1891_v24  ;;  %v10167_v14 = vand.u32 4294901760, %v8352_v45  ;;  %4018 = vmatprep.subr.mxu1 %v4017_v50  ;;  %v8369_v48 = vsub.f32 %v3503_v58, %v8357_v57  ;;  %v8371_v24 = vand.u32 4294901760, %v3502_v33 }
 0x269   : > { %11045 = vst [vmem:[#allocation104_spill] sm:$0xff] %v8373_v4  ;;  %4024 = vmatpush2.msra.mxu1 %v4023_v61  ;;  %v4046_v47 = vsub.f32 %v8355_v23, %v10170_v38  ;;  %v8383_v50 = vand.u32 4294901760, %v3499_v6  ;;  %v8391_v61 = vsub.f32 %v3501_v0, %v8373_v4  ;;  %11050 = vst [vmem:[#allocation96_spill] sm:$0xff] %v8397_v2 }
 0x26a   : > { %11043 = vst [vmem:[#allocation100_spill] sm:$0xff] %v8369_v48  ;;  %11044 = vst [vmem:[#allocation90_spill] sm:$0xff] %v8371_v24  ;;  %v4040_v28 = vsub.f32 %v8352_v45, %v10167_v14  ;;  %4030 = vmatprep.subr.mxu1 %v4029_v32  ;;  %v10179_v57 = vand.u32 4294901760, %v8369_v48  ;;  %v8388_v16 = vsub.f32 %v3502_v33, %v8371_v24  ;;  %v3498_v14 = vld [vmem:[#allocation4 + $0x170] sm:$0xff]  ;;  %3619 = vmatpush2.msra.mxu0 %v8371_v24  ;;  %v2379_v33 = vpop.f32.mrf.mxu1 }
 0x26b   : > { %v1906_v11 = vpop.f32.mrf.mxu0  ;;  %11047 = vst [vmem:[#allocation105_spill] sm:$0xff] %v8383_v50  ;;  %11049 = vst [vmem:[#allocation108_spill] sm:$0xff] %v8391_v61  ;;  %4036 = vmatpush2.msra.mxu1 %v4035_v49  ;;  %v4047_v23 = vand.u32 4294901760, %v4046_v47  ;;  %v8400_v32 = vsub.f32 %v3499_v6, %v8383_v50  ;;  %3621 = vmatprep.subr.mxu0 %v8373_v4  ;;  %v8413_v47 = vand.u32 4294901760, %v3498_v14  ;;  %v3496_v4 = vld [vmem:[#allocation4 + $0x160] sm:$0xff] }
 0x26c   : > { %v1907_v58 = vadd.f32 %v1906_v11, %v8321_v9  ;;  %11048 = vst [vmem:[#allocation95_spill] sm:$0xff] %v8388_v16  ;;  %v4041_v38 = vand.u32 4294901760, %v4040_v28  ;;  %v3497_v11 = vld [vmem:[#allocation4 + $0x168] sm:$0xff]  ;;  %v4052_v24 = vsub.f32 %v8369_v48, %v10179_v57  ;;  %v10186_v49 = vand.u32 4294901760, %v8388_v16  ;;  %3623 = vmatpush2.msra.mxu0 %v8381_v18 }
 0x26d   : > { %v8394_v45 = vpop.f32.mrf.mxu0  ;;  %11051 = vst [vmem:[#allocation109_spill] sm:$0xff] %v8400_v32  ;;  %11052 = vst [vmem:[#allocation97_spill] sm:$0xff] %v8413_v47  ;;  %3625 = vmatprep.subr.mxu0 %v8383_v50  ;;  %v8423_v41 = vand.u32 4294901760, %v3497_v11  ;;  %v11055_v28 = vand.u32 4294901760, %v8391_v61  ;;  %v11056_v18 = vand.u32 4294901760, %v8397_v2  ;;  %v2332_v15 = vadd.f32 %v8040_v36, %v1827_v63 }
 0x26e   : > { %v8403_v0 = vadd.f32 %v2371_v55, %v1907_v58  ;;  %4042 = vmatprep.subr.mxu1 %v4041_v38  ;;  %v11053_v55 = vld [vmem:[#allocation138_spill] sm:$0xff]  ;;  %v4053_v57 = vand.u32 4294901760, %v4052_v24  ;;  %v4058_v38 = vsub.f32 %v8388_v16, %v10186_v49  ;;  %v8435_v24 = vsub.f32 %v3498_v14, %v8413_v47  ;;  %3627 = vmatpush2.msra.mxu0 %v8413_v47  ;;  %v2381_v49 = vpop.f32.mrf.mxu1 }
 0x26f   : > { %v8418_v58 = vrot.slane %v8286_v53, %v11053_v55  ;;  %4048 = vmatpush2.msra.mxu1 %v4047_v23  ;;  %11054 = vst [vmem:[#allocation110_spill] sm:$0xff] %v8423_v41  ;;  %v4064_v48 = vsub.f32 %v8391_v61, %v11055_v28  ;;  %v4070_v50 = vsub.f32 %v8397_v2, %v11056_v18  ;;  %v11057_v53 = vand.u32 4294901760, %v8400_v32  ;;  %v3495_v18 = vld [vmem:[#allocation4 + $0x158] sm:$0xff]  ;;  %v3494_v2 = vld [vmem:[#allocation4 + $0x150] sm:$0xff] }
 0x270   : > { %11058 = vst [vmem:[#allocation101_spill] sm:$0xff] %v8435_v24  ;;  %4054 = vmatprep.subr.mxu1 %v4053_v57  ;;  %v4059_v16 = vand.u32 4294901760, %v4058_v38  ;;  %v8440_v28 = vsub.f32 %v3497_v11, %v8423_v41  ;;  %v8442_v61 = vand.u32 4294901760, %v3496_v4  ;;  %3629 = vmatprep.subr.mxu0 %v8423_v41  ;;  %v10205_v47 = vand.u32 4294901760, %v8435_v24 }
 0x271   : > { %v1922_v6 = vpop.f32.mrf.mxu0  ;;  %v4076_v23 = vsub.f32 %v8400_v32, %v11057_v53  ;;  %v4065_v14 = vand.u32 4294901760, %v4064_v48  ;;  %v4071_v32 = vand.u32 4294901760, %v4070_v50  ;;  %v8457_v50 = vand.u32 4294901760, %v3495_v18 }
 0x272   : > { %v1923_v55 = vadd.f32 %v1922_v6, %v8321_v9  ;;  %11059 = vst [vmem:[#allocation114_spill] sm:$0xff] %v8440_v28  ;;  %11060 = vst [vmem:[#allocation102_spill] sm:$0xff] %v8442_v61  ;;  %4060 = vmatpush2.msra.mxu1 %v4059_v16  ;;  %v10212_v11 = vand.u32 4294901760, %v8440_v28  ;;  %v8451_v38 = vsub.f32 %v3496_v4, %v8442_v61  ;;  %3631 = vmatpush2.msra.mxu0 %v8442_v61 }
 0x273   : > { %v1924_v53 = vpop.f32.mrf.mxu0  ;;  %v4077_v26 = vand.u32 4294901760, %v4076_v23  ;;  %4066 = vmatprep.subr.mxu1 %v4065_v14  ;;  %v4082_v48 = vsub.f32 %v8435_v24, %v10205_v47  ;;  %11062 = vst [vmem:[#allocation103_spill] sm:$0xff] %v8457_v50  ;;  %v8459_v23 = vand.u32 4294901760, %v3494_v2  ;;  %v8469_v61 = vand.u32 4294901760, %v3492_v43  ;;  %3633 = vmatprep.subr.mxu0 %v8457_v50 }
 0x274   : > { %v1925_v57 = vadd.f32 %v1924_v53, %v8418_v58  ;;  %v8447_v6 = vadd.f32 %v2379_v33, %v1923_v55  ;;  %11061 = vst [vmem:[#allocation115_spill] sm:$0xff] %v8451_v38  ;;  %v8461_v53 = vand.u32 4294901760, %v3493_v29  ;;  %v2387_v33 = vpop.f32.mrf.mxu1  ;;  %4072 = vmatpush2.msra.mxu1 %v4071_v32  ;;  %v4088_v4 = vsub.f32 %v8440_v28, %v10212_v11 }
 0x275   : > { %11063 = vst [vmem:[#allocation116_spill] sm:$0xff] %v8459_v23  ;;  %v10217_v14 = vand.u32 4294901760, %v8451_v38  ;;  %11065 = vst [vmem:[#allocation120_spill] sm:$0xff] %v8469_v61  ;;  %4078 = vmatprep.subr.mxu1 %v4077_v26  ;;  %v4083_v24 = vand.u32 4294901760, %v4082_v48  ;;  %v8473_v41 = vsub.f32 %v3495_v18, %v8457_v50  ;;  %v8476_v56 = vsub.f32 %v3494_v2, %v8459_v23  ;;  %v3490_v18 = vld [vmem:[#allocation4 + $0x130] sm:$0xff]  ;;  %v3489_v50 = vld [vmem:[#allocation4 + $0x128] sm:$0xff] }
 0x276   : > { %11064 = vst [vmem:[#allocation106_spill] sm:$0xff] %v8461_v53  ;;  %v1938_v16 = vpop.f32.mrf.mxu0  ;;  %v8463_v55 = vadd.f32 %v2381_v49, %v1925_v57  ;;  %v3491_v49 = vld [vmem:[#allocation4 + $0x138] sm:$0xff]  ;;  %v4089_v57 = vand.u32 4294901760, %v4088_v4  ;;  %v8483_v28 = vsub.f32 %v3493_v29, %v8461_v53  ;;  %v8486_v26 = vsub.f32 %v3492_v43, %v8469_v61  ;;  %3635 = vmatpush2.msra.mxu0 %v8459_v23  ;;  %v2389_v29 = vpop.f32.mrf.mxu1 }
 0x277   : > { %v1939_v47 = vadd.f32 %v1938_v16, %v8321_v9  ;;  %11066 = vst [vmem:[#allocation107_spill] sm:$0xff] %v8473_v41  ;;  %11067 = vst [vmem:[#allocation121_spill] sm:$0xff] %v8476_v56  ;;  %v4094_v11 = vsub.f32 %v8451_v38, %v10217_v14  ;;  %4084 = vmatpush2.msra.mxu1 %v4083_v24  ;;  %v10224_v16 = vand.u32 4294901760, %v8473_v41  ;;  %v10227_v4 = vand.u32 4294901760, %v8476_v56 }
 0x278   : > { %v1940_v32 = vpop.f32.mrf.mxu0  ;;  %11068 = vst [vmem:[#allocation111_spill] sm:$0xff] %v8483_v28  ;;  %11069 = vst [vmem:[#allocation124_spill] sm:$0xff] %v8486_v26  ;;  %3637 = vmatprep.subr.mxu0 %v8461_v53  ;;  %4090 = vmatprep.subr.mxu1 %v4089_v57  ;;  %v10232_v43 = vand.u32 4294901760, %v8483_v28  ;;  %v10235_v38 = vand.u32 4294901760, %v8486_v26  ;;  %v8497_v23 = vand.u32 4294901760, %v3491_v49  ;;  %v1829_v40 = vadd.f32 %v8174_v62, %v8418_v58 }
 0x279   : > { %v1941_v2 = vadd.f32 %v1940_v32, %v8418_v58  ;;  %v8490_v48 = vadd.f32 %v2387_v33, %v1939_v47  ;;  %v4095_v14 = vand.u32 4294901760, %v4094_v11  ;;  %v3488_v32 = vld [vmem:[#allocation4 + $0x120] sm:$0xff]  ;;  %3639 = vmatpush2.msra.mxu0 %v8469_v61  ;;  %v4100_v24 = vsub.f32 %v8473_v41, %v10224_v16  ;;  %v3487_v16 = vld [vmem:[#allocation4 + $0x118] sm:$0xff]  ;;  %v3486_v41 = vld [vmem:[#allocation4 + $0x110] sm:$0xff] }
 0x27a   : > { %11071 = vst [vmem:[#allocation113_spill] sm:$0xff] %v8497_v23  ;;  %v4106_v33 = vsub.f32 %v8476_v56, %v10227_v4  ;;  %v8508_v11 = vand.u32 4294901760, %v3490_v18  ;;  %v4112_v57 = vsub.f32 %v8483_v28, %v10232_v43  ;;  %v8519_v61 = vand.u32 4294901760, %v3489_v50  ;;  %3641 = vmatprep.subr.mxu0 %v8497_v23  ;;  %v3485_v43 = vld [vmem:[#allocation4 + $0x108] sm:$0xff]  ;;  %v3484_v28 = vld [vmem:[#allocation4 + $0x100] sm:$0xff] }
 0x27b   : > { %11070 = vst [vmem:[#allocation125_spill] sm:$0xff] %v8490_v48  ;;  %v8500_v47 = vadd.f32 %v2389_v29, %v1941_v2  ;;  %4096 = vmatpush2.msra.mxu1 %v4095_v14  ;;  %v4118_v2 = vsub.f32 %v8486_v26, %v10235_v38  ;;  %v8517_v29 = vsub.f32 %v3491_v49, %v8497_v23  ;;  %v4101_v4 = vand.u32 4294901760, %v4100_v24 }
 0x27c   : > { %11073 = vst [vmem:[#allocation117_spill] sm:$0xff] %v8508_v11  ;;  %11075 = vst [vmem:[#allocation119_spill] sm:$0xff] %v8519_v61  ;;  %v4107_v56 = vand.u32 4294901760, %v4106_v33  ;;  %v8523_v14 = vsub.f32 %v3490_v18, %v8508_v11  ;;  %v8525_v53 = vand.u32 4294901760, %v3488_v32  ;;  %3643 = vmatpush2.msra.mxu0 %v8508_v11  ;;  %v4113_v38 = vand.u32 4294901760, %v4112_v57 }
 0x27d   : > { %11072 = vst [vmem:[#allocation126_spill] sm:$0xff] %v8500_v47  ;;  %11074 = vst [vmem:[#allocation118_spill] sm:$0xff] %v8517_v29  ;;  %v4119_v49 = vand.u32 4294901760, %v4118_v2  ;;  %v10246_v26 = vand.u32 4294901760, %v8517_v29  ;;  %v8530_v5 = vsub.f32 %v3489_v50, %v8519_v61  ;;  %3645 = vmatprep.subr.mxu0 %v8519_v61  ;;  %4102 = vmatprep.subr.mxu1 %v4101_v4  ;;  %v8537_v33 = vand.u32 4294901760, %v3487_v16 }
 0x27e   : > { %11076 = vst [vmem:[#allocation122_spill] sm:$0xff] %v8523_v14  ;;  %11077 = vst [vmem:[#allocation137_spill] sm:$0xff] %v8525_v53  ;;  %v10249_v24 = vand.u32 4294901760, %v8523_v14  ;;  %v8535_v18 = vsub.f32 %v3488_v32, %v8525_v53  ;;  %v8539_v23 = vand.u32 4294901760, %v3486_v41  ;;  %3647 = vmatpush2.msra.mxu0 %v8525_v53  ;;  %4108 = vmatpush2.msra.mxu1 %v4107_v56  ;;  %v8546_v2 = vand.u32 4294901760, %v3485_v43 }
 0x27f   : > { %11078 = vst [vmem:[#allocation141_spill] sm:$0xff] %v8530_v5  ;;  %11080 = vst [vmem:[#allocation143_spill] sm:$0xff] %v8537_v33  ;;  %v4124_v50 = vsub.f32 %v8517_v29, %v10246_v26  ;;  %v10250_v57 = vand.u32 4294901760, %v8530_v5  ;;  %v8548_v4 = vand.u32 4294901760, %v3484_v28  ;;  %4114 = vmatprep.subr.mxu1 %v4113_v38  ;;  %v8555_v53 = vsub.f32 %v3487_v16, %v8537_v33 }
 0x280   : > { %11079 = vst [vmem:[#allocation140_spill] sm:$0xff] %v8535_v18  ;;  %11081 = vst [vmem:[#allocation142_spill] sm:$0xff] %v8539_v23  ;;  %v4130_v32 = vsub.f32 %v8523_v14, %v10249_v24  ;;  %v10251_v61 = vand.u32 4294901760, %v8535_v18  ;;  %v8558_v56 = vsub.f32 %v3486_v41, %v8539_v23  ;;  %3649 = vmatprep.subr.mxu0 %v8537_v33  ;;  %4120 = vmatpush2.msra.mxu1 %v4119_v49 }
 0x281   : > { %11082 = vst [vmem:[#allocation13_spill] sm:$0xff] %v8546_v2  ;;  %11083 = vst [vmem:[#allocation27_spill] sm:$0xff] %v8548_v4  ;;  %v4125_v26 = vand.u32 4294901760, %v4124_v50  ;;  %v4136_v38 = vsub.f32 %v8530_v5, %v10250_v57  ;;  %v8565_v29 = vsub.f32 %v3485_v43, %v8546_v2  ;;  %v8568_v24 = vsub.f32 %v3484_v28, %v8548_v4 }
 0x282   : > { %11084 = vst [vmem:[#allocation16_spill] sm:$0xff] %v8555_v53  ;;  %11085 = vst [vmem:[#allocation14_spill] sm:$0xff] %v8558_v56  ;;  %3651 = vmatpush2.msra.mxu0 %v8539_v23  ;;  %v4131_v16 = vand.u32 4294901760, %v4130_v32  ;;  %v4142_v41 = vsub.f32 %v8535_v18, %v10251_v61  ;;  %v10256_v49 = vand.u32 4294901760, %v8555_v53  ;;  %v10257_v50 = vand.u32 4294901760, %v8558_v56 }
 0x283   : > { %11086 = vst [vmem:[#allocation21_spill] sm:$0xff] %v8565_v29  ;;  %11087 = vst [vmem:[#allocation23_spill] sm:$0xff] %v8568_v24  ;;  %3653 = vmatprep.subr.mxu0 %v8546_v2  ;;  %4126 = vmatprep.subr.mxu1 %v4125_v26  ;;  %v4137_v57 = vand.u32 4294901760, %v4136_v38  ;;  %v10259_v43 = vand.u32 4294901760, %v8565_v29  ;;  %v10262_v28 = vand.u32 4294901760, %v8568_v24  ;;  %v1845_v34 = vadd.f32 %v8220_v39, %v8418_v58 }
 0x284   : > { %3655 = vmatpush2.msra.mxu0 %v8548_v4  ;;  %4132 = vmatpush2.msra.mxu1 %v4131_v16  ;;  %v4143_v32 = vand.u32 4294901760, %v4142_v41  ;;  %v4148_v61 = vsub.f32 %v8555_v53, %v10256_v49  ;;  %v4154_v18 = vsub.f32 %v8558_v56, %v10257_v50  ;;  %v1861_v59 = vadd.f32 %v8263_v20, %v8418_v58 }
 0x285   : > { %4236 = vmatprep.subr.mxu0 %v7866_v22  ;;  %4138 = vmatprep.subr.mxu1 %v4137_v57  ;;  %v4160_v26 = vsub.f32 %v8565_v29, %v10259_v43  ;;  %v4166_v38 = vsub.f32 %v8568_v24, %v10262_v28  ;;  %v1877_v62 = vadd.f32 %v8304_v1, %v8418_v58 }
 0x286   : > { %4144 = vmatpush2.msra.mxu1 %v4143_v32  ;;  %v4149_v16 = vand.u32 4294901760, %v4148_v61  ;;  %v4155_v41 = vand.u32 4294901760, %v4154_v18  ;;  %v2334_v39 = vadd.f32 %v8057_v37, %v1829_v40  ;;  %v2340_v17 = vadd.f32 %v8076_v27, %v1843_v8 }
 0x287   : > { %v4161_v5 = vand.u32 4294901760, %v4160_v26  ;;  %v4167_v49 = vand.u32 4294901760, %v4166_v38  ;;  %v1893_v20 = vadd.f32 %v8346_v54, %v8418_v58  ;;  %v1909_v63 = vadd.f32 %v8394_v45, %v8418_v58 }
 0x288   : > { %4150 = vmatprep.subr.mxu1 %v4149_v16  ;;  %v2348_v36 = vadd.f32 %v8138_v21, %v1859_v52  ;;  %v2358_v8 = vadd.f32 %v8237_v13, %v1877_v62 }
 0x289   : > { %4156 = vmatpush2.msra.mxu1 %v4155_v41  ;;  %v2366_v45 = vadd.f32 %v8302_v3, %v1893_v20  ;;  %v2374_v52 = vadd.f32 %v8366_v31, %v1909_v63 }
 0x28a   : > { %4162 = vmatprep.subr.mxu1 %v4161_v5 }
 0x28b   : > { %4168 = vmatpush2.msra.mxu1 %v4167_v49 }
 0x28c   : > { %4508 = vmatprep.subr.mxu1 %v7859_v7 }
 0x292   : > { %v2801_v57 = vpop.f32.mrf.mxu1 }
 0x294   : > { %v8594_v50 = vpop.f32.mrf.mxu1 }
 0x297   : > { %v8596_v22 = vpop.f32.mrf.mxu1 }
 0x299   : > { %v8598_v29 = vpop.f32.mrf.mxu1 }
 0x29c   : > { %v2590_v43 = vpop.f32.mrf.mxu0  ;;  %v8600_v32 = vpop.f32.mrf.mxu1 }
 0x29d   : > { %v2591_v48 = vadd.f32 %v2590_v43, %v2332_v15  ;;  %v2350_v43 = vadd.f32 %v8176_v60, %v1861_v59 }
 0x29e   : > { %v2592_v28 = vpop.f32.mrf.mxu0  ;;  %v8602_v18 = vpop.f32.mrf.mxu1 }
 0x29f   : > { %v2802_v54 = vadd.f32 %v2801_v57, %v2591_v48 }
 0x2a2   : > { %v2600_v61 = vpop.f32.mrf.mxu0  ;;  %v8604_v38 = vpop.f32.mrf.mxu1 }
 0x2a3   : > { %v2601_v1 = vadd.f32 %v2600_v61, %v2340_v17 }
 0x2a4   : > { %v2602_v26 = vpop.f32.mrf.mxu0  ;;  %v8606_v49 = vpop.f32.mrf.mxu1 }
 0x2a8   : > { %v2610_v5 = vpop.f32.mrf.mxu0  ;;  %v8608_v41 = vpop.f32.mrf.mxu1 }
 0x2aa   : > { %v2612_v16 = vpop.f32.mrf.mxu0  ;;  %v8610_v56 = vpop.f32.mrf.mxu1 }
 0x2ab   : > { %v2613_v37 = vadd.f32 %v2612_v16, %v2350_v43  ;;  %v11099_v43 = vld [vmem:[#allocation126_spill] sm:$0xff] }
 0x2ad   : > { %v2828_v61 = vadd.f32 %v8602_v18, %v2613_v37 }
 0x2ae   : > { %v2620_v24 = vpop.f32.mrf.mxu0  ;;  %v8612_v14 = vpop.f32.mrf.mxu1 }
 0x2b0   : > { %v2622_v53 = vpop.f32.mrf.mxu0  ;;  %v8614_v4 = vpop.f32.mrf.mxu1 }
 0x2b4   : > { %v2630_v7 = vpop.f32.mrf.mxu0  ;;  %v8616_v23 = vpop.f32.mrf.mxu1 }
 0x2b5   : > { %11088 = vst [vmem:[#allocation24_spill] sm:$0xff] %v8616_v23  ;;  %v2623_v23 = vadd.f32 %v2622_v53, %v2358_v8  ;;  %v2631_v60 = vadd.f32 %v2630_v7, %v8360_v19 }
 0x2b6   : > { %v2632_v2 = vpop.f32.mrf.mxu0  ;;  %v8618_v11 = vpop.f32.mrf.mxu1 }
 0x2b7   : > { %11089 = vst [vmem:[#allocation28_spill] sm:$0xff] %v8618_v11  ;;  %v2342_v11 = vadd.f32 %v8104_v10, %v1845_v34  ;;  %v2611_v10 = vadd.f32 %v2610_v5, %v2348_v36  ;;  %v2840_v19 = vadd.f32 %v8606_v49, %v2623_v23 }
 0x2b9   : > { %v2826_v31 = vadd.f32 %v8600_v32, %v2611_v10 }
 0x2ba   : > { %v2640_v33 = vpop.f32.mrf.mxu0  ;;  %v8620_v44 = vpop.f32.mrf.mxu1 }
 0x2bb   : > { %11090 = vst [vmem:[#allocation29_spill] sm:$0xff] %v8620_v44  ;;  %v2641_v48 = vadd.f32 %v2640_v33, %v8403_v0 }
 0x2bc   : > { %v2642_v51 = vpop.f32.mrf.mxu0  ;;  %v8624_v35 = vpop.f32.mrf.mxu1  ;;  %v11094_v16 = vld [vmem:[#allocation24_spill] sm:$0xff] }
 0x2bd   : > { %11091 = vst [vmem:[#allocation43_spill] sm:$0xff] %v8624_v35  ;;  %v1875_v35 = vadd.f32 %v8288_v30, %v8321_v9  ;;  %v2593_v30 = vadd.f32 %v2592_v28, %v2334_v39  ;;  %v11096_v39 = vld [vmem:[#allocation125_spill] sm:$0xff] }
 0x2bf   : > { %v2356_v40 = vadd.f32 %v8205_v25, %v1875_v35  ;;  %v2804_v59 = vadd.f32 %v8594_v50, %v2593_v30  ;;  %v2814_v35 = vadd.f32 %v8596_v22, %v2601_v1  ;;  %v2633_v25 = vadd.f32 %v2632_v2, %v2366_v45 }
 0x2c0   : > { %v2650_v46 = vpop.f32.mrf.mxu0  ;;  %v2850_v2 = vadd.f32 %v8608_v41, %v2631_v60 }
 0x2c1   : > { %v2621_v15 = vadd.f32 %v2620_v24, %v2356_v40  ;;  %v2643_v24 = vadd.f32 %v2642_v51, %v2374_v52  ;;  %v2651_v50 = vadd.f32 %v2650_v46, %v8447_v6  ;;  %v8671_v32 = vadd.f32 %v8610_v56, %v2633_v25  ;;  %v11095_v56 = vld [vmem:[#allocation28_spill] sm:$0xff] }
 0x2c2   : > { %v2652_v42 = vpop.f32.mrf.mxu0  ;;  %v11102_v25 = vld [vmem:[#allocation29_spill] sm:$0xff] }
 0x2c3   : > { %v2653_v22 = vadd.f32 %v2652_v42, %v8463_v55  ;;  %v2838_v7 = vadd.f32 %v8604_v38, %v2621_v15  ;;  %v8674_v42 = vadd.f32 %v8612_v14, %v2641_v48  ;;  %v8677_v46 = vadd.f32 %v8614_v4, %v2643_v24 }
 0x2c4   : > { %v8682_v41 = vadd.f32 %v11094_v16, %v2651_v50  ;;  %v11109_v16 = vld [vmem:[#allocation26_spill] sm:$0xff] }
 0x2c5   : > { %v8641_v47 = vpop.f32.mrf.mxu0  ;;  %v8685_v62 = vadd.f32 %v11095_v56, %v2653_v22 }
 0x2c6   : > { %11092 = vst [vmem:[#allocation144_spill] sm:$0xff] %v8641_v47  ;;  %v2603_v47 = vadd.f32 %v2602_v26, %v2342_v11 }
 0x2c7   : > { %v2662_v27 = vpop.f32.mrf.mxu0 }
 0x2c8   : > { %v2816_v13 = vadd.f32 %v8598_v29, %v2603_v47  ;;  %v8697_v40 = vadd.f32 %v2662_v27, %v11099_v43  ;;  %v11112_v43 = vld [vmem:[#allocation18_spill] sm:$0xff] }
 0x2cd   : > { %v11097_v17 = vld [vmem:[#allocation144_spill] sm:$0xff] }
 0x2ce   : > { %v2661_v20 = vadd.f32 %v11097_v17, %v11096_v39 }
 0x2d0   : > { %v8712_v48 = vadd.f32 %v11102_v25, %v2661_v20 }
 0x2e2   : > { %v3343_v44 = vpop.f32.mrf.mxu1 }
 0x2e4   : > { %v3345_v12 = vpop.f32.mrf.mxu1 }
 0x2e6   : > { %v3351_v9 = vpop.f32.mrf.mxu1 }
 0x2e8   : > { %v3353_v34 = vpop.f32.mrf.mxu1 }
 0x2ea   : > { %v3150_v21 = vpop.f32.mrf.mxu0  ;;  %v3359_v58 = vpop.f32.mrf.mxu1 }
 0x2eb   : > { %v3151_v11 = vadd.f32 %v3150_v21, %v2802_v54 }
 0x2ec   : > { %v3152_v53 = vpop.f32.mrf.mxu0  ;;  %v3361_v28 = vpop.f32.mrf.mxu1 }
 0x2ed   : > { %v3344_v3 = vadd.f32 %v3343_v44, %v3151_v11  ;;  %v3153_v57 = vadd.f32 %v3152_v53, %v2804_v59 }
 0x2ee   : > { %v3158_v26 = vpop.f32.mrf.mxu0  ;;  %v3367_v47 = vpop.f32.mrf.mxu1 }
 0x2ef   : > { %vm3404_vm0 = vcmp.ge.f32.partialorder %v3344_v3, 0.0  ;;  %v3420_v51 = vmul.f32 0.001, %v3344_v3  ;;  %v3346_v0 = vadd.f32 %v3345_v12, %v3153_v57  ;;  %v3159_v29 = vadd.f32 %v3158_v26, %v2814_v35  ;;  %v11101_v35 = vld [vmem:[#allocation11_spill] sm:$0xff] }
 0x2f0   : > { %v3160_v44 = vpop.f32.mrf.mxu0  ;;  %v8667_v33 = vpop.f32.mrf.mxu1 }
 0x2f1   : > { %v3436_v6 = vsel %vm3404_vm0, %v3344_v3, %v3420_v51  ;;  %vm3405_vm1 = vcmp.ge.f32.partialorder %v3346_v0, 0.0  ;;  %v3421_v23 = vmul.f32 0.001, %v3346_v0  ;;  %v3352_v55 = vadd.f32 %v3351_v9, %v3159_v29  ;;  %v11106_v29 = vld [vmem:[#allocation31_spill] sm:$0xff] }
 0x2f2   : > { %v8679_v18 = vand.u32 4294901760, %v3436_v6  ;;  %v3161_v38 = vadd.f32 %v3160_v44, %v2816_v13  ;;  %v3166_v5 = vpop.f32.mrf.mxu0  ;;  %v3375_v49 = vpop.f32.mrf.mxu1 }
 0x2f3   : > { %v3437_v14 = vsel %vm3405_vm1, %v3346_v0, %v3421_v23  ;;  %vm3406_vm2 = vcmp.ge.f32.partialorder %v3352_v55, 0.0  ;;  %v3422_v12 = vmul.f32 0.001, %v3352_v55  ;;  %v3167_v4 = vadd.f32 %v3166_v5, %v2826_v31 }
 0x2f4   : > { %11093 = vst [vmem:[#allocation145_spill] sm:$0xff] %v8679_v18  ;;  %v8690_v63 = vsub.f32 %v3436_v6, %v8679_v18  ;;  %v3354_v36 = vadd.f32 %v3353_v34, %v3161_v38  ;;  %v3168_v9 = vpop.f32.mrf.mxu0  ;;  %v8692_v30 = vpop.f32.mrf.mxu1  ;;  %v8694_v1 = vand.u32 4294901760, %v3437_v14 }
 0x2f5   : > { %v3438_v8 = vsel %vm3406_vm2, %v3352_v55, %v3422_v12  ;;  %v3360_v10 = vadd.f32 %v3359_v58, %v3167_v4  ;;  %v3169_v37 = vadd.f32 %v3168_v9, %v2828_v61  ;;  %v11104_v61 = vld [vmem:[#allocation36_spill] sm:$0xff]  ;;  %v11111_v12 = vld [vmem:[#allocation30_spill] sm:$0xff] }
 0x2f6   : > { %11098 = vst [vmem:[#allocation24_spill] sm:$0xff] %v8694_v1  ;;  %v10307_v54 = vand.u32 4294901760, %v8690_v63  ;;  %vm3407_vm3 = vcmp.ge.f32.partialorder %v3354_v36, 0.0  ;;  %v3423_v15 = vmul.f32 0.001, %v3354_v36  ;;  %v3174_v45 = vpop.f32.mrf.mxu0  ;;  %4170 = vmatprep.mubr.f32.mxu1 %v8694_v1  ;;  %v8701_v52 = vand.u32 4294901760, %v3438_v8  ;;  %v3383_v59 = vpop.f32.mrf.mxu1 }
 0x2f7   : > { %vm3408_vm4 = vcmp.ge.f32.partialorder %v3360_v10, 0.0  ;;  %v3424_v34 = vmul.f32 0.001, %v3360_v10  ;;  %v3362_v21 = vadd.f32 %v3361_v28, %v3169_v37  ;;  %v3175_v11 = vadd.f32 %v3174_v45, %v2838_v7  ;;  %4172 = vmatmul.mubr.f32.vlgmr.msra.gmra.mxu1 %v8679_v18  ;;  %v11103_v28 = vld [vmem:[#allocation15_spill] sm:$0xff] }
 0x2f8   : > { %11100 = vst [vmem:[#allocation28_spill] sm:$0xff] %v8701_v52  ;;  %v3439_v27 = vsel %vm3407_vm3, %v3354_v36, %v3423_v15  ;;  %4510 = vmatpush1.msra.mxu1 %v11101_v35  ;;  %v3176_v58 = vpop.f32.mrf.mxu0  ;;  %v8706_v13 = vsub.f32 %v3437_v14, %v8694_v1  ;;  %v3665_v60 = vsub.f32 %v8690_v63, %v10307_v54  ;;  %v11114_v45 = vld [vmem:[#allocation43_spill] sm:$0xff]  ;;  %v11133_v54 = vld [vmem:[#allocation9_spill] sm:$0xff] }
 0x2f9   : > { %vm3409_vm5 = vcmp.ge.f32.partialorder %v3362_v21, 0.0  ;;  %v3425_v24 = vmul.f32 0.001, %v3362_v21  ;;  %v3368_v53 = vadd.f32 %v3367_v47, %v3175_v11  ;;  %4512 = vmatprep.subr.mxu1 %v11103_v28  ;;  %v8716_v3 = vsub.f32 %v3438_v8, %v8701_v52  ;;  %v3385_v47 = vpop.f32.mrf.mxu1 }
 0x2fa   : > { %v8719_v57 = vsel %vm3408_vm4, %v3360_v10, %v3424_v34  ;;  %v3177_v31 = vadd.f32 %v3176_v58, %v2840_v19  ;;  %4514 = vmatpush1.msra.mxu1 %v11104_v61  ;;  %v3182_v50 = vpop.f32.mrf.mxu0  ;;  %v8722_v22 = vand.u32 4294901760, %v3439_v27  ;;  %v10308_v26 = vand.u32 4294901760, %v8706_v13  ;;  %v11107_v19 = vld [vmem:[#allocation25_spill] sm:$0xff]  ;;  %v11113_v10 = vld [vmem:[#allocation42_spill] sm:$0xff] }
 0x2fb   : > { %v8725_v7 = vsel %vm3409_vm5, %v3362_v21, %v3425_v24  ;;  %v3426_v51 = vmul.f32 0.001, %v3368_v53  ;;  %v3183_v0 = vadd.f32 %v3182_v50, %v2850_v2  ;;  %4516 = vmatprep.subr.mxu1 %v11106_v29  ;;  %v3666_v44 = vand.u32 4294901760, %v3665_v60  ;;  %v3391_v20 = vpop.f32.mrf.mxu1  ;;  %v11116_v58 = vld [vmem:[#allocation45_spill] sm:$0xff] }
 0x2fc   : > { %11105 = vst [vmem:[#allocation125_spill] sm:$0xff] %v8722_v22  ;;  %vm3410_vm6 = vcmp.ge.f32.partialorder %v3368_v53, 0.0  ;;  %v3370_v6 = vadd.f32 %v8667_v33, %v3177_v31  ;;  %4178 = vmatprep.mubr.f32.mxu1 %v8722_v22  ;;  %4518 = vmatpush1.msra.mxu1 %v11107_v19  ;;  %v3184_v23 = vpop.f32.mrf.mxu0  ;;  %v3659_v55 = vsub.f32 %v8706_v13, %v10308_v26  ;;  %v8735_v38 = vand.u32 4294901760, %v8725_v7 }
 0x2fd   : > { %v3376_v5 = vadd.f32 %v3375_v49, %v3183_v0  ;;  %4180 = vmatmul.mubr.f32.gmra.mxu1 %v8701_v52  ;;  %v3185_v2 = vadd.f32 %v3184_v23, %v8671_v32  ;;  %4520 = vmatprep.subr.mxu1 %v11109_v16  ;;  %v8741_v33 = vand.u32 4294901760, %v8719_v57  ;;  %v10305_v56 = vand.u32 4294901760, %v8716_v3  ;;  %v3393_v31 = vpop.f32.mrf.mxu1  ;;  %v11145_v52 = vld [vmem:[#allocation135_spill] sm:$0xff] }
 0x2fe   : > { %11108 = vst [vmem:[#allocation144_spill] sm:$0xff] %v8735_v38  ;;  %vm3411_vm7 = vcmp.ge.f32.partialorder %v3370_v6, 0.0  ;;  %v3427_v14 = vmul.f32 0.001, %v3370_v6  ;;  %4522 = vmatpush1.msra.mxu1 %v11111_v12  ;;  %v3190_v4 = vpop.f32.mrf.mxu0  ;;  %v3660_v39 = vand.u32 4294901760, %v3659_v55  ;;  %4186 = vmatprep.mubr.f32.mxu1 %v8735_v38  ;;  %v8747_v49 = vsub.f32 %v3439_v27, %v8722_v22 }
 0x2ff   : > { %11110 = vst [vmem:[#allocation126_spill] sm:$0xff] %v8741_v33  ;;  %v8750_v32 = vsel %vm3410_vm6, %v3368_v53, %v3426_v51  ;;  %v3428_v17 = vmul.f32 0.001, %v3376_v5  ;;  %v3378_v36 = vadd.f32 %v8692_v30, %v3185_v2  ;;  %v3191_v9 = vadd.f32 %v3190_v4, %v8674_v42  ;;  %4524 = vmatprep.subr.mxu1 %v11112_v43  ;;  %v11115_v30 = vld [vmem:[#allocation17_spill] sm:$0xff]  ;;  %v11123_v4 = vld [vmem:[#allocation38_spill] sm:$0xff] }
 0x300   : > { %v3443_v8 = vsel %vm3411_vm7, %v3370_v6, %v3427_v14  ;;  %vm3412_vm8 = vcmp.ge.f32.partialorder %v3376_v5, 0.0  ;;  %3661 = vmatprep.mubr.f32.mxu0 %v3660_v39  ;;  %4526 = vmatpush1.msra.mxu1 %v11113_v10  ;;  %v3192_v37 = vpop.f32.mrf.mxu0  ;;  %v10306_v15 = vand.u32 4294901760, %v8747_v49  ;;  %v8759_v34 = vadd.f32 %v11114_v45, %v8697_v40  ;;  %v11120_v51 = vld [vmem:[#allocation49_spill] sm:$0xff]  ;;  %v11121_v6 = vld [vmem:[#allocation8_spill] sm:$0xff]  ;;  %v11122_v14 = vld [vmem:[#allocation22_spill] sm:$0xff] }
 0x301   : > { %vm3413_vm9 = vcmp.ge.f32.partialorder %v3378_v36, 0.0  ;;  %v3429_v21 = vmul.f32 0.001, %v3378_v36  ;;  %v3384_v11 = vadd.f32 %v3383_v59, %v3191_v9  ;;  %3667 = vmatmul.mubr.f32.vlgmr.msra.gmra.mxu0 %v3666_v44  ;;  %4188 = vmatmul.mubr.f32.gmra.mxu1 %v8741_v33  ;;  %v3681_v42 = vsub.f32 %v8716_v3, %v10305_v56 }
 0x302   : > { %4239 = vmatpush1.msra.mxu0 %v11115_v30  ;;  %v3193_v27 = vadd.f32 %v3192_v37, %v8677_v46  ;;  %4528 = vmatprep.subr.mxu1 %v11116_v58  ;;  %v3198_v60 = vpop.f32.mrf.mxu0  ;;  %v3675_v40 = vsub.f32 %v8747_v49, %v10306_v15  ;;  %v8771_v25 = vand.u32 4294901760, %v3443_v8  ;;  %v8774_v59 = vand.u32 4294901760, %v8750_v32  ;;  %v11119_v46 = vld [vmem:[#allocation32_spill] sm:$0xff]  ;;  %v3399_v37 = vpop.f32.mrf.mxu1  ;;  %v11132_v15 = vld [vmem:[#allocation35_spill] sm:$0xff] }
 0x303   : > { %v8777_v24 = vsel %vm3412_vm8, %v3376_v5, %v3428_v17  ;;  %v8779_v53 = vsel %vm3413_vm9, %v3378_v36, %v3429_v21  ;;  %v3430_v50 = vmul.f32 0.001, %v3384_v11  ;;  %4242 = vmatprep.subr.mxu0 %v11119_v46  ;;  %4530 = vmatpush1.msra.mxu1 %v11120_v51  ;;  %v3199_v0 = vadd.f32 %v3198_v60, %v8682_v41  ;;  %v11127_v60 = vld [vmem:[#allocation39_spill] sm:$0xff] }
 0x304   : > { %11117 = vst [vmem:[#allocation11_spill] sm:$0xff] %v8771_v25  ;;  %11118 = vst [vmem:[#allocation29_spill] sm:$0xff] %v8774_v59  ;;  %vm3414_vm10 = vcmp.ge.f32.partialorder %v3384_v11, 0.0  ;;  %v3386_v44 = vadd.f32 %v3385_v47, %v3193_v27  ;;  %4245 = vmatpush1.msra.mxu0 %v11121_v6  ;;  %v3676_v23 = vand.u32 4294901760, %v3675_v40  ;;  %4194 = vmatprep.mubr.f32.mxu1 %v8771_v25  ;;  %v3200_v55 = vpop.f32.mrf.mxu0  ;;  %v3682_v39 = vand.u32 4294901760, %v3681_v42  ;;  %v11128_v40 = vld [vmem:[#allocation65_spill] sm:$0xff] }
 0x305   : > { %v8788_v5 = vsub.f32 %v8725_v7, %v8735_v38  ;;  %v3392_v2 = vadd.f32 %v3391_v20, %v3199_v0  ;;  %4248 = vmatprep.subr.mxu0 %v11122_v14  ;;  %4532 = vmatprep.subr.mxu1 %v11123_v4  ;;  %v3201_v41 = vadd.f32 %v3200_v55, %v8685_v62  ;;  %v8794_v47 = vand.u32 4294901760, %v8779_v53  ;;  %v11125_v62 = vld [vmem:[#allocation73_spill] sm:$0xff]  ;;  %v11131_v55 = vld [vmem:[#allocation40_spill] sm:$0xff] }
 0x306   : > { %vm3415_vm11 = vcmp.ge.f32.partialorder %v3386_v44, 0.0  ;;  %v3431_v17 = vmul.f32 0.001, %v3386_v44  ;;  %3677 = vmatprep.mubr.f32.mxu0 %v3676_v23  ;;  %4196 = vmatmul.mubr.f32.gmra.mxu1 %v8774_v59  ;;  %v3206_v36 = vpop.f32.mrf.mxu0  ;;  %v8800_v20 = vsub.f32 %v8719_v57, %v8741_v33  ;;  %v3446_v9 = vsel %vm3414_vm10, %v3384_v11, %v3430_v50  ;;  %v11129_v23 = vld [vmem:[#allocation12_spill] sm:$0xff] }
 0x307   : > { %11124 = vst [vmem:[#allocation15_spill] sm:$0xff] %v8794_v47  ;;  %v10304_v7 = vand.u32 4294901760, %v8788_v5  ;;  %3683 = vmatmul.mubr.f32.gmra.mxu0 %v3682_v39  ;;  %4534 = vmatpush1.msra.mxu1 %v11125_v62  ;;  %v3394_v45 = vadd.f32 %v3393_v31, %v3201_v41  ;;  %v3207_v21 = vadd.f32 %v3206_v36, %v8712_v48  ;;  %v8806_v42 = vand.u32 4294901760, %v8777_v24  ;;  %v3401_v36 = vpop.f32.mrf.mxu1 }
 0x308   : > { %v3447_v27 = vsel %vm3415_vm11, %v3386_v44, %v3431_v17  ;;  %4251 = vmatpush1.msra.mxu0 %v11127_v60  ;;  %4536 = vmatprep.subr.mxu1 %v11128_v40  ;;  %v10312_v11 = vand.u32 4294901760, %v8800_v20  ;;  %v3208_v50 = vpop.f32.mrf.mxu0  ;;  %v8815_v0 = vsub.f32 %v3443_v8, %v8771_v25  ;;  %vm3416_vm12 = vcmp.ge.f32.partialorder %v3392_v2, 0.0  ;;  %v11130_v44 = vld [vmem:[#allocation130_spill] sm:$0xff] }
 0x309   : > { %11126 = vst [vmem:[#allocation36_spill] sm:$0xff] %v8806_v42  ;;  %v3691_v57 = vsub.f32 %v8788_v5, %v10304_v7  ;;  %v3432_v48 = vmul.f32 0.001, %v3392_v2  ;;  %vm3417_vm13 = vcmp.ge.f32.partialorder %v3394_v45, 0.0  ;;  %v3433_v31 = vmul.f32 0.001, %v3394_v45  ;;  %4254 = vmatprep.subr.mxu0 %v11129_v23  ;;  %4538 = vmatpush1.msra.mxu1 %v11130_v44 }
 0x30a   : > { %4257 = vmatpush1.msra.mxu0 %v11131_v55  ;;  %4202 = vmatprep.mubr.f32.mxu1 %v8794_v47  ;;  %v3697_v41 = vsub.f32 %v8800_v20, %v10312_v11  ;;  %v3209_v8 = vadd.f32 %v3208_v50, %v8759_v34  ;;  %v10311_v17 = vand.u32 4294901760, %v8815_v0  ;;  %v3400_v56 = vadd.f32 %v3399_v37, %v3207_v21  ;;  %v11136_v21 = vld [vmem:[#allocation123_spill] sm:$0xff] }
 0x30b   : > { %v3692_v39 = vand.u32 4294901760, %v3691_v57  ;;  %v3449_v7 = vsel %vm3417_vm13, %v3394_v45, %v3433_v31  ;;  %4260 = vmatprep.subr.mxu0 %v11132_v15  ;;  %4540 = vmatprep.subr.mxu1 %v11133_v54  ;;  %v8828_v26 = vand.u32 4294901760, %v3447_v27  ;;  %v8836_v50 = vsub.f32 %v8750_v32, %v8774_v59  ;;  %v11135_v45 = vld [vmem:[#allocation20_spill] sm:$0xff] }
 0x30c   : > { %v3698_v57 = vand.u32 4294901760, %v3697_v41  ;;  %4204 = vmatmul.mubr.f32.gmra.mxu1 %v8806_v42  ;;  %v3402_v25 = vadd.f32 %v3401_v36, %v3209_v8  ;;  %v3707_v34 = vsub.f32 %v8815_v0, %v10311_v17  ;;  %v3448_v37 = vsel %vm3416_vm12, %v3392_v2, %v3432_v48  ;;  %4263 = vmatpush1.msra.mxu0 %v11135_v45  ;;  %v11138_v8 = vld [vmem:[#allocation33_spill] sm:$0xff]  ;;  %v11139_v17 = vld [vmem:[#allocation128_spill] sm:$0xff] }
 0x30d   : > { %11134 = vst [vmem:[#allocation31_spill] sm:$0xff] %v8828_v26  ;;  %3693 = vmatprep.mubr.f32.mxu0 %v3692_v39  ;;  %4542 = vmatpush1.msra.mxu1 %v11136_v21  ;;  %v8841_v31 = vand.u32 4294901760, %v3446_v9  ;;  %v8845_v39 = vsub.f32 %v8779_v53, %v8794_v47  ;;  %v10325_v32 = vand.u32 4294901760, %v8836_v50  ;;  %v11140_v2 = vld [vmem:[#allocation68_spill] sm:$0xff]  ;;  %v8852_v11 = vand.u32 4294901760, %v3449_v7 }
 0x30e   : > { %3699 = vmatmul.mubr.f32.gmra.mxu0 %v3698_v57  ;;  %vm3419_vm14 = vcmp.ge.f32.partialorder %v3402_v25, 0.0  ;;  %v3435_v41 = vmul.f32 0.001, %v3402_v25  ;;  %4266 = vmatprep.subr.mxu0 %v11138_v8  ;;  %v3708_v36 = vand.u32 4294901760, %v3707_v34  ;;  %v8856_v53 = vsub.f32 %v8777_v24, %v8806_v42  ;;  %v11142_v34 = vld [vmem:[#allocation133_spill] sm:$0xff]  ;;  %v11143_v24 = vld [vmem:[#allocation59_spill] sm:$0xff] }
 0x30f   : > { %11137 = vst [vmem:[#allocation25_spill] sm:$0xff] %v8841_v31  ;;  %4544 = vmatprep.subr.mxu1 %v11139_v17  ;;  %4269 = vmatpush1.msra.mxu0 %v11140_v2  ;;  %11141 = vst [vmem:[#allocation26_spill] sm:$0xff] %v8852_v11  ;;  %v8859_v57 = vsub.f32 %v3447_v27, %v8828_v26  ;;  %vm3418_vm15 = vcmp.ge.f32.partialorder %v3400_v56, 0.0  ;;  %v3434_v47 = vmul.f32 0.001, %v3400_v56  ;;  %v11144_v27 = vand.u32 4294901760, %v8845_v39 }
 0x310   : > { %4546 = vmatpush1.msra.mxu1 %v11142_v34  ;;  %3709 = vmatprep.mubr.f32.mxu0 %v3708_v36  ;;  %v3713_v59 = vsub.f32 %v8836_v50, %v10325_v32  ;;  %v8866_v48 = vsub.f32 %v3446_v9, %v8841_v31  ;;  %v3451_v33 = vsel %vm3419_vm14, %v3402_v25, %v3435_v41  ;;  %v10336_v38 = vand.u32 4294901760, %v8856_v53  ;;  %v11147_v25 = vld [vmem:[#allocation112_spill] sm:$0xff] }
 0x311   : > { %4210 = vmatprep.mubr.f32.mxu1 %v8828_v26  ;;  %4272 = vmatprep.subr.mxu0 %v11143_v24  ;;  %v3723_v42 = vsub.f32 %v8845_v39, %v11144_v27  ;;  %v8878_v9 = vand.u32 4294901760, %v3448_v37  ;;  %v11148_v41 = vld [vmem:[#allocation48_spill] sm:$0xff]  ;;  %v8886_v22 = vsub.f32 %v3449_v7, %v8852_v11  ;;  %v3450_v36 = vsel %vm3418_vm15, %v3400_v56, %v3434_v47  ;;  %v11155_v47 = vld [vmem:[#allocation127_spill] sm:$0xff] }
 0x312   : > { %4548 = vmatprep.subr.mxu1 %v11145_v52  ;;  %v3714_v32 = vand.u32 4294901760, %v3713_v59  ;;  %4212 = vmatmul.mubr.f32.gmra.mxu1 %v8841_v31  ;;  %v3729_v27 = vsub.f32 %v8856_v53, %v10336_v38  ;;  %v11149_v59 = vld [vmem:[#allocation131_spill] sm:$0xff]  ;;  %v11150_v31 = vand.u32 4294901760, %v8859_v57  ;;  %v8893_v1 = vand.u32 4294901760, %v3451_v33  ;;  %v11154_v38 = vld [vmem:[#allocation41_spill] sm:$0xff] }
 0x313   : > { %11146 = vst [vmem:[#allocation30_spill] sm:$0xff] %v8878_v9  ;;  %4275 = vmatpush1.msra.mxu0 %v11147_v25  ;;  %4550 = vmatpush1.msra.mxu1 %v11148_v41  ;;  %v3724_v26 = vand.u32 4294901760, %v3723_v42  ;;  %v11152_v41 = vld [vmem:[#allocation52_spill] sm:$0xff]  ;;  %v8900_v56 = vsub.f32 %v3448_v37, %v8878_v9  ;;  %v11157_v42 = vld [vmem:[#allocation57_spill] sm:$0xff] }
 0x314   : > { %3715 = vmatmul.mubr.f32.gmra.mxu0 %v3714_v32  ;;  %4278 = vmatprep.subr.mxu0 %v11149_v59  ;;  %v3739_v18 = vsub.f32 %v8859_v57, %v11150_v31  ;;  %11151 = vst [vmem:[#allocation18_spill] sm:$0xff] %v8893_v1  ;;  %v11153_v25 = vld [vmem:[#allocation132_spill] sm:$0xff]  ;;  %v3730_v7 = vand.u32 4294901760, %v3729_v27  ;;  %v8904_v31 = vand.u32 4294901760, %v3450_v36  ;;  %v8912_v27 = vsub.f32 %v3451_v33, %v8893_v1  ;;  %v11159_v37 = vld [vmem:[#allocation129_spill] sm:$0xff] }
 0x315   : > { %4552 = vmatprep.subr.mxu1 %v11152_v41  ;;  %4281 = vmatpush1.msra.mxu0 %v11153_v25  ;;  %v11158_v25 = vand.u32 4294901760, %v8866_v48  ;;  %v11166_v32 = vld [vmem:[#allocation37_spill] sm:$0xff] }
 0x316   : > { %4554 = vmatpush1.msra.mxu1 %v11154_v38  ;;  %3725 = vmatprep.mubr.f32.mxu0 %v3724_v26  ;;  %11156 = vst [vmem:[#allocation42_spill] sm:$0xff] %v8904_v31  ;;  %v3740_v41 = vand.u32 4294901760, %v3739_v18  ;;  %v11163_v18 = vld [vmem:[#allocation10_spill] sm:$0xff]  ;;  %v8925_v33 = vsub.f32 %v3450_v36, %v8904_v31  ;;  %v11169_v36 = vld [vmem:[#allocation53_spill] sm:$0xff] }
 0x317   : > { %4218 = vmatprep.mubr.f32.mxu1 %v8852_v11  ;;  %4284 = vmatprep.subr.mxu0 %v11155_v47  ;;  %v3745_v26 = vsub.f32 %v8866_v48, %v11158_v25  ;;  %v11160_v11 = vld [vmem:[#allocation46_spill] sm:$0xff] }
 0x318   : > { %4556 = vmatprep.subr.mxu1 %v11157_v42  ;;  %3731 = vmatmul.mubr.f32.gmra.mxu0 %v3730_v7  ;;  %v11161_v47 = vld [vmem:[#allocation134_spill] sm:$0xff]  ;;  %v11162_v42 = vld [vmem:[#allocation47_spill] sm:$0xff]  ;;  %v11164_v7 = vand.u32 4294901760, %v8886_v22 }
 0x319   : > { %4220 = vmatmul.mubr.f32.gmra.mxu1 %v8878_v9  ;;  %4287 = vmatpush1.msra.mxu0 %v11159_v37  ;;  %v11165_v9 = vld [vmem:[#allocation50_spill] sm:$0xff]  ;;  %v3746_v37 = vand.u32 4294901760, %v3745_v26  ;;  %v11170_v26 = vld [vmem:[#allocation139_spill] sm:$0xff] }
 0x31a   : > { %4558 = vmatpush1.msra.mxu1 %v11160_v11  ;;  %4290 = vmatprep.subr.mxu0 %v11161_v47  ;;  %v3755_v25 = vsub.f32 %v8886_v22, %v11164_v7  ;;  %v11171_v11 = vld [vmem:[#allocation56_spill] sm:$0xff] }
 0x31b   : > { %4560 = vmatprep.subr.mxu1 %v11162_v42  ;;  %4293 = vmatpush1.msra.mxu0 %v11163_v18  ;;  %v11167_v42 = vld [vmem:[#allocation51_spill] sm:$0xff]  ;;  %v11168_v18 = vand.u32 4294901760, %v8900_v56  ;;  %v11181_v47 = vld [vmem:[#allocation64_spill] sm:$0xff] }
 0x31c   : > { %4562 = vmatpush1.msra.mxu1 %v11165_v9  ;;  %3741 = vmatprep.mubr.f32.mxu0 %v3740_v41  ;;  %v3756_v9 = vand.u32 4294901760, %v3755_v25  ;;  %v11177_v41 = vld [vmem:[#allocation60_spill] sm:$0xff] }
 0x31d   : > { %4226 = vmatprep.mubr.f32.mxu1 %v8893_v1  ;;  %4296 = vmatprep.subr.mxu0 %v11166_v32  ;;  %v3761_v7 = vsub.f32 %v8900_v56, %v11168_v18  ;;  %v11172_v1 = vand.u32 4294901760, %v8912_v27  ;;  %v11174_v32 = vand.u32 4294901760, %v8706_v13  ;;  %v11175_v18 = vld [vmem:[#allocation44_spill] sm:$0xff] }
 0x31e   : > { %4564 = vmatprep.subr.mxu1 %v11167_v42  ;;  %3747 = vmatmul.mubr.f32.gmra.mxu0 %v3746_v37  ;;  %v11173_v37 = vld [vmem:[#allocation55_spill] sm:$0xff] }
 0x31f   : > { %4228 = vmatmul.mubr.f32.gmra.mxu1 %v8904_v31  ;;  %4299 = vmatpush1.msra.mxu0 %v11169_v36  ;;  %v3771_v42 = vsub.f32 %v8912_v27, %v11172_v1  ;;  %v11176_v31 = vld [vmem:[#allocation72_spill] sm:$0xff]  ;;  %v3762_v25 = vand.u32 4294901760, %v3761_v7  ;;  %v11179_v36 = vld [vmem:[#allocation63_spill] sm:$0xff]  ;;  %v11184_v7 = vld [vmem:[#allocation66_spill] sm:$0xff] }
 0x320   : > { %4566 = vmatpush1.msra.mxu1 %v11170_v26  ;;  %4302 = vmatprep.subr.mxu0 %v11171_v11  ;;  %v11178_v26 = vand.u32 4294901760, %v8925_v33 }
 0x321   : > { %4568 = vmatprep.subr.mxu1 %v11173_v37  ;;  %4638 = vmatprep.mubr.f32.mxu1 %v11174_v32  ;;  %v3772_v1 = vand.u32 4294901760, %v3771_v42  ;;  %v11180_v37 = vld [vmem:[#allocation61_spill] sm:$0xff]  ;;  %v11182_v32 = vld [vmem:[#allocation62_spill] sm:$0xff]  ;;  %v11188_v42 = vld [vmem:[#allocation67_spill] sm:$0xff] }
 0x322   : > { %4305 = vmatpush1.msra.mxu0 %v11175_v18  ;;  %4570 = vmatpush1.msra.mxu1 %v11176_v31  ;;  %v3777_v11 = vsub.f32 %v8925_v33, %v11178_v26  ;;  %v11183_v18 = vld [vmem:[#allocation77_spill] sm:$0xff]  ;;  %v11186_v31 = vld [vmem:[#allocation54_spill] sm:$0xff]  ;;  %v11187_v26 = vld [vmem:[#allocation71_spill] sm:$0xff] }
 0x323   : > { %3757 = vmatprep.mubr.f32.mxu0 %v3756_v9  ;;  %4308 = vmatprep.subr.mxu0 %v11177_v41  ;;  %v11185_v9 = vld [vmem:[#allocation70_spill] sm:$0xff] }
 0x324   : > { %4572 = vmatprep.subr.mxu1 %v11179_v36  ;;  %3763 = vmatmul.mubr.f32.gmra.mxu0 %v3762_v25  ;;  %v3778_v41 = vand.u32 4294901760, %v3777_v11  ;;  %v11189_v25 = vld [vmem:[#allocation74_spill] sm:$0xff] }
 0x325   : > { %4311 = vmatpush1.msra.mxu0 %v11180_v37  ;;  %4574 = vmatpush2.msra.mxu1 %v11181_v47  ;;  %v11190_v47 = vld [vmem:[#allocation58_spill] sm:$0xff] }
 0x326   : > { %4314 = vmatprep.subr.mxu0 %v11182_v32  ;;  %4576 = vmatprep.subr.mxu1 %v11183_v18  ;;  %v11191_v18 = vld [vmem:[#allocation75_spill] sm:$0xff]  ;;  %v11194_v11 = vld [vmem:[#allocation78_spill] sm:$0xff] }
 0x327   : > { %4317 = vmatpush1.msra.mxu0 %v11184_v7  ;;  %4578 = vmatpush2.msra.mxu1 %v11185_v9  ;;  %v11192_v7 = vld [vmem:[#allocation76_spill] sm:$0xff]  ;;  %v11193_v9 = vld [vmem:[#allocation89_spill] sm:$0xff] }
 0x328   : > { %3773 = vmatprep.mubr.f32.mxu0 %v3772_v1  ;;  %4320 = vmatprep.subr.mxu0 %v11186_v31  ;;  %v11195_v1 = vld [vmem:[#allocation79_spill] sm:$0xff] }
 0x329   : > { %4580 = vmatprep.subr.mxu1 %v11187_v26  ;;  %3779 = vmatmul.mubr.f32.gmra.mxu0 %v3778_v41  ;;  %v11196_v26 = vld [vmem:[#allocation69_spill] sm:$0xff]  ;;  %v11197_v41 = vld [vmem:[#allocation92_spill] sm:$0xff] }
 0x32a   : > { %4323 = vmatpush1.msra.mxu0 %v11188_v42  ;;  %4582 = vmatpush2.msra.mxu1 %v11189_v25  ;;  %v11198_v42 = vld [vmem:[#allocation82_spill] sm:$0xff]  ;;  %v11199_v25 = vld [vmem:[#allocation85_spill] sm:$0xff] }
 0x32b   : > { %4326 = vmatprep.subr.mxu0 %v11190_v47  ;;  %4428 = vmatprep.mubr.f32.mxu0 %v8706_v13  ;;  %v11200_v47 = vld [vmem:[#allocation83_spill] sm:$0xff]  ;;  %v11201_v13 = vld [vmem:[#allocation98_spill] sm:$0xff] }
 0x32c   : > { %4584 = vmatprep.subr.mxu1 %v11191_v18  ;;  %4329 = vmatpush1.msra.mxu0 %v11192_v7  ;;  %v11202_v18 = vld [vmem:[#allocation84_spill] sm:$0xff]  ;;  %v11203_v7 = vld [vmem:[#allocation87_spill] sm:$0xff] }
 0x32d   : > { %4586 = vmatpush2.msra.mxu1 %v11193_v9  ;;  %4332 = vmatprep.subr.mxu0 %v11194_v11  ;;  %v11204_v9 = vld [vmem:[#allocation88_spill] sm:$0xff]  ;;  %v11205_v11 = vld [vmem:[#allocation90_spill] sm:$0xff] }
 0x32e   : > { %4588 = vmatprep.subr.mxu1 %v11195_v1  ;;  %4335 = vmatpush2.msra.mxu0 %v11196_v26  ;;  %v11206_v1 = vld [vmem:[#allocation80_spill] sm:$0xff] }
 0x32f   : > { %4590 = vmatpush2.msra.mxu1 %v11197_v41  ;;  %4338 = vmatprep.subr.mxu0 %v11198_v42  ;;  %v11207_v26 = vld [vmem:[#allocation104_spill] sm:$0xff]  ;;  %v11208_v41 = vld [vmem:[#allocation93_spill] sm:$0xff]  ;;  %v11209_v42 = vld [vmem:[#allocation91_spill] sm:$0xff] }
 0x330   : > { %4592 = vmatprep.subr.mxu1 %v11199_v25  ;;  %4341 = vmatpush2.msra.mxu0 %v11200_v47  ;;  %v11210_v25 = vld [vmem:[#allocation81_spill] sm:$0xff] }
 0x331   : > { %4594 = vmatpush2.msra.mxu1 %v11201_v13  ;;  %4344 = vmatprep.subr.mxu0 %v11202_v18  ;;  %v11211_v47 = vld [vmem:[#allocation105_spill] sm:$0xff]  ;;  %v11212_v13 = vld [vmem:[#allocation94_spill] sm:$0xff] }
 0x332   : > { %4596 = vmatprep.subr.mxu1 %v11203_v7  ;;  %4347 = vmatpush2.msra.mxu0 %v11204_v9  ;;  %v11213_v18 = vld [vmem:[#allocation97_spill] sm:$0xff]  ;;  %v11214_v7 = vld [vmem:[#allocation86_spill] sm:$0xff] }
 0x333   : > { %4598 = vmatpush2.msra.mxu1 %v11205_v11  ;;  %4350 = vmatprep.subr.mxu0 %v11206_v1  ;;  %v11215_v9 = vld [vmem:[#allocation110_spill] sm:$0xff]  ;;  %v11216_v11 = vld [vmem:[#allocation99_spill] sm:$0xff] }
 0x334   : > { %4600 = vmatprep.subr.mxu1 %v11207_v26  ;;  %4353 = vmatpush2.msra.mxu0 %v11208_v41  ;;  %v11217_v1 = vld [vmem:[#allocation102_spill] sm:$0xff]  ;;  %v11218_v26 = vld [vmem:[#allocation100_spill] sm:$0xff]  ;;  %v11219_v41 = vld [vmem:[#allocation103_spill] sm:$0xff] }
 0x335   : > { %4602 = vmatpush2.msra.mxu1 %v11209_v42  ;;  %4356 = vmatprep.subr.mxu0 %v11210_v25  ;;  %v11220_v42 = vld [vmem:[#allocation95_spill] sm:$0xff]  ;;  %v11221_v25 = vld [vmem:[#allocation116_spill] sm:$0xff] }
 0x336   : > { %4604 = vmatprep.subr.mxu1 %v11211_v47  ;;  %4359 = vmatpush2.msra.mxu0 %v11212_v13  ;;  %v11222_v47 = vld [vmem:[#allocation108_spill] sm:$0xff]  ;;  %v11223_v13 = vld [vmem:[#allocation106_spill] sm:$0xff] }
 0x337   : > { %4606 = vmatpush2.msra.mxu1 %v11213_v18  ;;  %4362 = vmatprep.subr.mxu0 %v11214_v7  ;;  %v11224_v18 = vld [vmem:[#allocation96_spill] sm:$0xff] }
 0x338   : > { %4608 = vmatprep.subr.mxu1 %v11215_v9  ;;  %4365 = vmatpush2.msra.mxu0 %v11216_v11  ;;  %v11225_v7 = vld [vmem:[#allocation120_spill] sm:$0xff]  ;;  %v11226_v9 = vld [vmem:[#allocation109_spill] sm:$0xff] }
 0x339   : > { %4610 = vmatpush2.msra.mxu1 %v11217_v1  ;;  %4368 = vmatprep.subr.mxu0 %v11218_v26  ;;  %v11227_v11 = vld [vmem:[#allocation113_spill] sm:$0xff] }
 0x33a   : > { %4612 = vmatprep.subr.mxu1 %v11219_v41  ;;  %4371 = vmatpush2.msra.mxu0 %v11220_v42  ;;  %v11228_v1 = vld [vmem:[#allocation101_spill] sm:$0xff]  ;;  %v11230_v41 = vld [vmem:[#allocation114_spill] sm:$0xff]  ;;  %v11231_v42 = vld [vmem:[#allocation119_spill] sm:$0xff] }
 0x33b   : > { %4614 = vmatpush2.msra.mxu1 %v11221_v25  ;;  %4374 = vmatprep.subr.mxu0 %v11222_v47  ;;  %v11229_v26 = vld [vmem:[#allocation117_spill] sm:$0xff]  ;;  %v11232_v25 = vld [vmem:[#allocation115_spill] sm:$0xff] }
 0x33c   : > { %4616 = vmatprep.subr.mxu1 %v11223_v13  ;;  %4377 = vmatpush2.msra.mxu0 %v11224_v18  ;;  %v11233_v47 = vld [vmem:[#allocation137_spill] sm:$0xff]  ;;  %v11234_v13 = vld [vmem:[#allocation107_spill] sm:$0xff] }
 0x33d   : > { %4618 = vmatpush2.msra.mxu1 %v11225_v7  ;;  %4380 = vmatprep.subr.mxu0 %v11226_v9  ;;  %v11235_v18 = vld [vmem:[#allocation143_spill] sm:$0xff]  ;;  %v11236_v7 = vld [vmem:[#allocation121_spill] sm:$0xff]  ;;  %v11237_v9 = vld [vmem:[#allocation142_spill] sm:$0xff] }
 0x33e   : > { %4620 = vmatprep.subr.mxu1 %v11227_v11  ;;  %4383 = vmatpush2.msra.mxu0 %v11228_v1  ;;  %v11238_v11 = vld [vmem:[#allocation111_spill] sm:$0xff]  ;;  %v11239_v1 = vld [vmem:[#allocation13_spill] sm:$0xff] }
 0x33f   : > { %4622 = vmatpush2.msra.mxu1 %v11229_v26  ;;  %4386 = vmatprep.subr.mxu0 %v11230_v41  ;;  %v11240_v26 = vld [vmem:[#allocation124_spill] sm:$0xff]  ;;  %v11241_v41 = vld [vmem:[#allocation27_spill] sm:$0xff] }
 0x340   : > { %4624 = vmatprep.subr.mxu1 %v11231_v42  ;;  %4389 = vmatpush2.msra.mxu0 %v11232_v25  ;;  %v11242_v42 = vld [vmem:[#allocation118_spill] sm:$0xff] }
 0x341   : > { %4626 = vmatpush2.msra.mxu1 %v11233_v47  ;;  %4392 = vmatprep.subr.mxu0 %v11234_v13  ;;  %v11243_v47 = vand.u32 4294901760, %v8690_v63  ;;  %v11244_v13 = vld [vmem:[#allocation34_spill] sm:$0xff] }
 0x342   : > { %4628 = vmatprep.subr.mxu1 %v11235_v18  ;;  %4395 = vmatpush2.msra.mxu0 %v11236_v7  ;;  %v11245_v18 = vld [vmem:[#allocation122_spill] sm:$0xff]  ;;  %v11246_v7 = vand.u32 4294901760, %v8747_v49 }
 0x343   : > { %4630 = vmatpush2.msra.mxu1 %v11237_v9  ;;  %4398 = vmatprep.subr.mxu0 %v11238_v11  ;;  %v11247_v11 = vld [vmem:[#allocation141_spill] sm:$0xff] }
 0x344   : > { %4632 = vmatprep.subr.mxu1 %v11239_v1  ;;  %4401 = vmatpush2.msra.mxu0 %v11240_v26  ;;  %v11248_v26 = vld [vmem:[#allocation140_spill] sm:$0xff] }
 0x345   : > { %4634 = vmatpush2.msra.mxu1 %v11241_v41  ;;  %4404 = vmatprep.subr.mxu0 %v11242_v42  ;;  %v11249_v42 = vld [vmem:[#allocation16_spill] sm:$0xff] }
 0x346   : > { %4642 = vmatmul.mubr.f32.vlgmr.msra.gmra.mxu1 %v11243_v47  ;;  %5054 = vmatprep.subr.mxu1 %v11244_v13  ;;  %v11250_v47 = vand.u32 4294901760, %v8716_v3  ;;  %v11251_v13 = vld [vmem:[#allocation14_spill] sm:$0xff] }
 0x347   : > { %4407 = vmatpush2.msra.mxu0 %v11245_v18  ;;  %4650 = vmatprep.mubr.f32.mxu1 %v11246_v7  ;;  %v11252_v7 = vand.u32 4294901760, %v8788_v5 }
 0x348   : > { %5056 = vmatpush1.msra.mxu1 %v11101_v35  ;;  %4410 = vmatprep.subr.mxu0 %v11247_v11  ;;  %v11253_v35 = vld [vmem:[#allocation21_spill] sm:$0xff] }
 0x349   : > { %5058 = vmatprep.subr.mxu1 %v11103_v28  ;;  %4413 = vmatpush2.msra.mxu0 %v11248_v26  ;;  %v11254_v28 = vld [vmem:[#allocation23_spill] sm:$0xff] }
 0x34a   : > { %5060 = vmatpush1.msra.mxu1 %v11104_v61  ;;  %4416 = vmatprep.subr.mxu0 %v11249_v42  ;;  %v11255_v61 = vand.u32 4294901760, %v8800_v20 }
 0x34b   : > { %4654 = vmatmul.mubr.f32.gmra.mxu1 %v11250_v47  ;;  %5062 = vmatprep.subr.mxu1 %v11106_v29  ;;  %v11256_v29 = vld [vmem:[#allocation19_spill] sm:$0xff] }
 0x34c   : > { %4419 = vmatpush2.msra.mxu0 %v11251_v13  ;;  %4662 = vmatprep.mubr.f32.mxu1 %v11252_v7  ;;  %v11257_v47 = vand.u32 4294901760, %v11256_v29  ;;  %v11297_v7 = vld [vmem:[#allocation50_spill] sm:$0xff] }
 0x34d   : > { %5064 = vmatpush1.msra.mxu1 %v11107_v19  ;;  %4422 = vmatprep.subr.mxu0 %v11253_v35  ;;  %v11258_v19 = vand.u32 4294901760, %v8815_v0 }
 0x34e   : > { %5066 = vmatprep.subr.mxu1 %v11109_v16  ;;  %4425 = vmatpush2.msra.mxu0 %v11254_v28  ;;  %v11259_v16 = vand.u32 4294901760, %v11115_v30  ;;  %v11265_v30 = vand.u32 4294901760, %v11127_v60 }
 0x34f   : > { %5068 = vmatpush1.msra.mxu1 %v11111_v12  ;;  %4431 = vmatmul.mubr.f32.vlgmr.msra.gmra.mxu0 %v8690_v63  ;;  %v11260_v63 = vand.u32 4294901760, %v11119_v46  ;;  %v11261_v12 = vand.u32 4294901760, %v11121_v6  ;;  %v11268_v46 = vand.u32 4294901760, %v8856_v53  ;;  %v11270_v6 = vand.u32 4294901760, %v8859_v57 }
 0x350   : > { %4666 = vmatmul.mubr.f32.gmra.mxu1 %v11255_v61  ;;  %4735 = vmatprep.subr.mxu0 %v11257_v47  ;;  %v11299_v61 = vld [vmem:[#allocation37_spill] sm:$0xff]  ;;  %v11301_v47 = vld [vmem:[#allocation51_spill] sm:$0xff] }
 0x351   : > { %5070 = vmatprep.subr.mxu1 %v11112_v43  ;;  %4438 = vmatprep.mubr.f32.mxu0 %v8747_v49  ;;  %v11262_v49 = vand.u32 4294901760, %v8836_v50  ;;  %v11263_v43 = vand.u32 4294901760, %v11122_v14  ;;  %v11272_v14 = vand.u32 4294901760, %v11138_v8  ;;  %v11300_v29 = vand.u32 4294901760, %v11299_v61  ;;  %v11352_v61 = vld [vmem:[#allocation104_spill] sm:$0xff] }
 0x352   : > { %4674 = vmatprep.mubr.f32.mxu1 %v11258_v19  ;;  %4739 = vmatpush1.msra.mxu0 %v11259_v16  ;;  %v11302_v19 = vld [vmem:[#allocation53_spill] sm:$0xff] }
 0x353   : > { %5072 = vmatpush1.msra.mxu1 %v11113_v10  ;;  %4743 = vmatprep.subr.mxu0 %v11260_v63  ;;  %v11264_v10 = vand.u32 4294901760, %v8845_v39  ;;  %v11303_v16 = vand.u32 4294901760, %v11302_v19  ;;  %v11304_v63 = vld [vmem:[#allocation139_spill] sm:$0xff] }
 0x354   : > { %5074 = vmatprep.subr.mxu1 %v11116_v58  ;;  %4747 = vmatpush1.msra.mxu0 %v11261_v12  ;;  %v11267_v58 = vand.u32 4294901760, %v11131_v55  ;;  %v11305_v12 = vld [vmem:[#allocation24_spill] sm:$0xff]  ;;  %v11355_v19 = vld [vmem:[#allocation91_spill] sm:$0xff] }
 0x355   : > { %5076 = vmatpush1.msra.mxu1 %v11120_v51  ;;  %4441 = vmatmul.mubr.f32.gmra.mxu0 %v8716_v3  ;;  %v11266_v3 = vand.u32 4294901760, %v11129_v23  ;;  %v11269_v51 = vand.u32 4294901760, %v11132_v15  ;;  %v11273_v15 = vand.u32 4294901760, %v11140_v2  ;;  %v11281_v23 = vld [vmem:[#allocation52_spill] sm:$0xff]  ;;  %v11291_v2 = vld [vmem:[#allocation46_spill] sm:$0xff] }
 0x356   : > { %4678 = vmatmul.mubr.f32.gmra.mxu1 %v11262_v49  ;;  %4751 = vmatprep.subr.mxu0 %v11263_v43  ;;  %v11306_v49 = vld [vmem:[#allocation56_spill] sm:$0xff] }
 0x357   : > { %5078 = vmatprep.subr.mxu1 %v11123_v4  ;;  %4448 = vmatprep.mubr.f32.mxu0 %v8788_v5  ;;  %v11271_v5 = vand.u32 4294901760, %v11135_v45  ;;  %v11275_v4 = vand.u32 4294901760, %v11143_v24  ;;  %v11287_v45 = vld [vmem:[#allocation57_spill] sm:$0xff]  ;;  %v11295_v24 = vld [vmem:[#allocation10_spill] sm:$0xff]  ;;  %v11307_v43 = vand.u32 4294901760, %v11306_v49 }
 0x358   : > { %4686 = vmatprep.mubr.f32.mxu1 %v11264_v10  ;;  %4755 = vmatpush1.msra.mxu0 %v11265_v30  ;;  %v11309_v10 = vld [vmem:[#allocation44_spill] sm:$0xff]  ;;  %v11359_v49 = vld [vmem:[#allocation94_spill] sm:$0xff] }
 0x359   : > { %5080 = vmatpush1.msra.mxu1 %v11125_v62  ;;  %4759 = vmatprep.subr.mxu0 %v11266_v3  ;;  %v11277_v62 = vld [vmem:[#allocation112_spill] sm:$0xff]  ;;  %v11310_v30 = vand.u32 4294901760, %v11309_v10  ;;  %v11362_v10 = vld [vmem:[#allocation86_spill] sm:$0xff] }
 0x35a   : > { %5082 = vmatprep.subr.mxu1 %v11128_v40  ;;  %4763 = vmatpush1.msra.mxu0 %v11267_v58  ;;  %v11278_v60 = vand.u32 4294901760, %v11277_v62  ;;  %v11279_v40 = vld [vmem:[#allocation48_spill] sm:$0xff]  ;;  %v11328_v62 = vld [vmem:[#allocation75_spill] sm:$0xff] }
 0x35b   : > { %5084 = vmatpush1.msra.mxu1 %v11130_v44  ;;  %4451 = vmatmul.mubr.f32.gmra.mxu0 %v8800_v20  ;;  %v11276_v20 = vand.u32 4294901760, %v8886_v22  ;;  %v11282_v44 = vld [vmem:[#allocation132_spill] sm:$0xff] }
 0x35c   : > { %4690 = vmatmul.mubr.f32.gmra.mxu1 %v11268_v46  ;;  %4767 = vmatprep.subr.mxu0 %v11269_v51  ;;  %v11283_v55 = vand.u32 4294901760, %v11282_v44  ;;  %v11311_v3 = vld [vmem:[#allocation72_spill] sm:$0xff]  ;;  %v11314_v46 = vand.u32 4294901760, %v11180_v37  ;;  %v11323_v37 = vld [vmem:[#allocation67_spill] sm:$0xff]  ;;  %v11335_v44 = vld [vmem:[#allocation69_spill] sm:$0xff] }
 0x35d   : > { %5086 = vmatprep.subr.mxu1 %v11133_v54  ;;  %4458 = vmatprep.mubr.f32.mxu0 %v8815_v0  ;;  %v11274_v54 = vand.u32 4294901760, %v8866_v48  ;;  %v11280_v0 = vand.u32 4294901760, %v11149_v59  ;;  %v11296_v59 = vand.u32 4294901760, %v11295_v24  ;;  %v11315_v51 = vld [vmem:[#allocation64_spill] sm:$0xff] }
 0x35e   : > { %4698 = vmatprep.mubr.f32.mxu1 %v11270_v6  ;;  %4771 = vmatpush1.msra.mxu0 %v11271_v5  ;;  %v11316_v6 = vand.u32 4294901760, %v11182_v32  ;;  %v11317_v5 = vld [vmem:[#allocation77_spill] sm:$0xff]  ;;  %v11325_v32 = vld [vmem:[#allocation74_spill] sm:$0xff] }
 0x35f   : > { %5088 = vmatpush1.msra.mxu1 %v11136_v21  ;;  %4775 = vmatprep.subr.mxu0 %v11272_v14  ;;  %v11288_v21 = vand.u32 4294901760, %v8912_v27  ;;  %v11318_v14 = vld [vmem:[#allocation66_spill] sm:$0xff] }
 0x360   : > { %5090 = vmatprep.subr.mxu1 %v11139_v17  ;;  %4779 = vmatpush1.msra.mxu0 %v11273_v15  ;;  %v11285_v17 = vld [vmem:[#allocation127_spill] sm:$0xff]  ;;  %v11319_v15 = vand.u32 4294901760, %v11318_v14 }
 0x361   : > { %5092 = vmatpush1.msra.mxu1 %v11142_v34  ;;  %4461 = vmatmul.mubr.f32.gmra.mxu0 %v8836_v50  ;;  %v11286_v50 = vand.u32 4294901760, %v11285_v17  ;;  %v11294_v34 = vld [vmem:[#allocation47_spill] sm:$0xff]  ;;  %v11338_v17 = vld [vmem:[#allocation82_spill] sm:$0xff] }
 0x362   : > { %4702 = vmatmul.mubr.f32.gmra.mxu1 %v11274_v54  ;;  %4783 = vmatprep.subr.mxu0 %v11275_v4  ;;  %v11324_v54 = vand.u32 4294901760, %v11323_v37  ;;  %v11326_v4 = vld [vmem:[#allocation58_spill] sm:$0xff]  ;;  %v11371_v14 = vld [vmem:[#allocation95_spill] sm:$0xff] }
 0x363   : > { %5094 = vmatprep.subr.mxu1 %v11145_v52  ;;  %4468 = vmatprep.mubr.f32.mxu0 %v8845_v39  ;;  %v11284_v52 = vand.u32 4294901760, %v8900_v56  ;;  %v11289_v39 = vld [vmem:[#allocation129_spill] sm:$0xff]  ;;  %v11376_v37 = vld [vmem:[#allocation106_spill] sm:$0xff] }
 0x364   : > { %4710 = vmatprep.mubr.f32.mxu1 %v11276_v20  ;;  %4787 = vmatpush1.msra.mxu0 %v11278_v60  ;;  %v11290_v8 = vand.u32 4294901760, %v11289_v39  ;;  %v11327_v20 = vand.u32 4294901760, %v11326_v4  ;;  %v11329_v60 = vld [vmem:[#allocation76_spill] sm:$0xff] }
 0x365   : > { %5096 = vmatpush1.msra.mxu1 %v11279_v40  ;;  %4791 = vmatprep.subr.mxu0 %v11280_v0  ;;  %v11330_v40 = vand.u32 4294901760, %v11329_v60  ;;  %v11379_v4 = vld [vmem:[#allocation120_spill] sm:$0xff]  ;;  %v11382_v60 = vld [vmem:[#allocation113_spill] sm:$0xff] }
 0x366   : > { %5098 = vmatprep.subr.mxu1 %v11281_v23  ;;  %4795 = vmatpush1.msra.mxu0 %v11283_v55  ;;  %v11334_v23 = vld [vmem:[#allocation79_spill] sm:$0xff]  ;;  %v11336_v55 = vand.u32 4294901760, %v11335_v44 }
 0x367   : > { %5100 = vmatpush1.msra.mxu1 %v11154_v38  ;;  %4471 = vmatmul.mubr.f32.gmra.mxu0 %v8856_v53  ;;  %v11292_v38 = vld [vmem:[#allocation134_spill] sm:$0xff]  ;;  %v11388_v44 = vld [vmem:[#allocation119_spill] sm:$0xff] }
 0x368   : > { %4714 = vmatmul.mubr.f32.gmra.mxu1 %v11284_v52  ;;  %4799 = vmatprep.subr.mxu0 %v11286_v50  ;;  %v11293_v53 = vand.u32 4294901760, %v11292_v38  ;;  %v11337_v52 = vld [vmem:[#allocation92_spill] sm:$0xff]  ;;  %v11339_v50 = vand.u32 4294901760, %v11338_v17  ;;  %v11391_v17 = vld [vmem:[#allocation107_spill] sm:$0xff] }
 0x369   : > { %5102 = vmatprep.subr.mxu1 %v11287_v45  ;;  %4478 = vmatprep.mubr.f32.mxu0 %v8859_v57  ;;  %v11298_v57 = vand.u32 4294901760, %v8925_v33  ;;  %v11340_v45 = vld [vmem:[#allocation85_spill] sm:$0xff] }
 0x36a   : > { %4722 = vmatprep.mubr.f32.mxu1 %v11288_v21  ;;  %4803 = vmatpush1.msra.mxu0 %v11290_v8  ;;  %v11341_v21 = vld [vmem:[#allocation83_spill] sm:$0xff]  ;;  %v11343_v8 = vld [vmem:[#allocation98_spill] sm:$0xff] }
 0x36b   : > { %5104 = vmatpush1.msra.mxu1 %v11291_v2  ;;  %4807 = vmatprep.subr.mxu0 %v11293_v53  ;;  %v11342_v39 = vand.u32 4294901760, %v11341_v21  ;;  %v11344_v2 = vld [vmem:[#allocation84_spill] sm:$0xff]  ;;  %v11346_v53 = vld [vmem:[#allocation87_spill] sm:$0xff]  ;;  %v11394_v21 = vld [vmem:[#allocation121_spill] sm:$0xff] }
 0x36c   : > { %5106 = vmatprep.subr.mxu1 %v11294_v34  ;;  %4811 = vmatpush1.msra.mxu0 %v11296_v59  ;;  %v11345_v38 = vand.u32 4294901760, %v11344_v2  ;;  %v11347_v34 = vld [vmem:[#allocation88_spill] sm:$0xff]  ;;  %v11349_v59 = vld [vmem:[#allocation90_spill] sm:$0xff] }
 0x36d   : > { %5108 = vmatpush1.msra.mxu1 %v11297_v7  ;;  %4481 = vmatmul.mubr.f32.gmra.mxu0 %v8866_v48  ;;  %v11308_v48 = vld [vmem:[#allocation55_spill] sm:$0xff]  ;;  %v11348_v24 = vand.u32 4294901760, %v11347_v34  ;;  %v11350_v7 = vld [vmem:[#allocation80_spill] sm:$0xff] }
 0x36e   : > { %4726 = vmatmul.mubr.f32.gmra.mxu1 %v11298_v57  ;;  %4815 = vmatprep.subr.mxu0 %v11300_v29  ;;  %v11351_v57 = vand.u32 4294901760, %v11350_v7  ;;  %v11353_v29 = vld [vmem:[#allocation93_spill] sm:$0xff] }
 0x36f   : > { %5110 = vmatprep.subr.mxu1 %v11301_v47  ;;  %4488 = vmatprep.mubr.f32.mxu0 %v8886_v22  ;;  %v11312_v22 = vld [vmem:[#allocation60_spill] sm:$0xff]  ;;  %v11354_v47 = vand.u32 4294901760, %v11353_v29  ;;  %v11404_v7 = vld [vmem:[#allocation125_spill] sm:$0xff] }
 0x370   : > { %4819 = vmatpush1.msra.mxu0 %v11303_v16  ;;  %5112 = vmatpush1.msra.mxu1 %v11304_v63  ;;  %v11313_v58 = vand.u32 4294901760, %v11312_v22  ;;  %v11356_v16 = vld [vmem:[#allocation81_spill] sm:$0xff]  ;;  %v11365_v22 = vld [vmem:[#allocation99_spill] sm:$0xff]  ;;  %v11410_v29 = vld [vmem:[#allocation144_spill] sm:$0xff] }
 0x371   : > { %5182 = vmatprep.mubr.f32.mxu1 %v11305_v12  ;;  %4823 = vmatprep.subr.mxu0 %v11307_v43  ;;  %v11357_v63 = vand.u32 4294901760, %v11356_v16  ;;  %v11360_v43 = vand.u32 4294901760, %v11359_v49  ;;  %v11420_v16 = vld [vmem:[#allocation26_spill] sm:$0xff] }
 0x372   : > { %5114 = vmatprep.subr.mxu1 %v11308_v48  ;;  %4827 = vmatpush1.msra.mxu0 %v11310_v30  ;;  %v11361_v48 = vld [vmem:[#allocation97_spill] sm:$0xff]  ;;  %v11363_v30 = vand.u32 4294901760, %v11362_v10  ;;  %v11423_v49 = vld [vmem:[#allocation42_spill] sm:$0xff]  ;;  %v9298_v10 = vld [vmem:[%s9536_s6] sm:$0x3] }
 0x373   : > { %5116 = vmatpush1.msra.mxu1 %v11311_v3  ;;  %4491 = vmatmul.mubr.f32.gmra.mxu0 %v8900_v56  ;;  %v11320_v56 = vld [vmem:[#allocation70_spill] sm:$0xff] }
 0x374   : > { %4831 = vmatprep.subr.mxu0 %v11313_v58  ;;  %5118 = vmatprep.subr.mxu1 %v11179_v36  ;;  %v11321_v36 = vand.u32 4294901760, %v11186_v31  ;;  %v11332_v31 = vld [vmem:[#allocation78_spill] sm:$0xff]  ;;  %v11366_v58 = vand.u32 4294901760, %v11365_v22 }
 0x375   : > { %4498 = vmatprep.mubr.f32.mxu0 %v8912_v27  ;;  %4835 = vmatpush1.msra.mxu0 %v11314_v46  ;;  %v11322_v27 = vld [vmem:[#allocation71_spill] sm:$0xff]  ;;  %v11333_v0 = vand.u32 4294901760, %v11332_v31  ;;  %v11364_v3 = vld [vmem:[#allocation110_spill] sm:$0xff]  ;;  %v11385_v31 = vld [vmem:[#allocation117_spill] sm:$0xff] }
 0x376   : > { %5120 = vmatpush2.msra.mxu1 %v11315_v51  ;;  %4839 = vmatprep.subr.mxu0 %v11316_v6  ;;  %v11367_v46 = vld [vmem:[#allocation102_spill] sm:$0xff]  ;;  %v11368_v51 = vld [vmem:[#allocation100_spill] sm:$0xff] }
 0x377   : > { %5122 = vmatprep.subr.mxu1 %v11317_v5  ;;  %4843 = vmatpush1.msra.mxu0 %v11319_v15  ;;  %v11369_v6 = vand.u32 4294901760, %v11368_v51  ;;  %v11370_v5 = vld [vmem:[#allocation103_spill] sm:$0xff]  ;;  %v11372_v15 = vand.u32 4294901760, %v11371_v14 }
 0x378   : > { %5124 = vmatpush2.msra.mxu1 %v11320_v56  ;;  %4501 = vmatmul.mubr.f32.gmra.mxu0 %v8925_v33  ;;  %v11331_v33 = vld [vmem:[#allocation89_spill] sm:$0xff]  ;;  %v11373_v56 = vld [vmem:[#allocation116_spill] sm:$0xff] }
 0x379   : > { %4847 = vmatprep.subr.mxu0 %v11321_v36  ;;  %5126 = vmatprep.subr.mxu1 %v11322_v27  ;;  %v11374_v36 = vld [vmem:[#allocation108_spill] sm:$0xff] }
 0x37a   : > { %4851 = vmatpush1.msra.mxu0 %v11324_v54  ;;  %4989 = vmatprep.mubr.f32.mxu0 %v11305_v12  ;;  %v11358_v12 = vld [vmem:[#allocation105_spill] sm:$0xff]  ;;  %v11375_v27 = vand.u32 4294901760, %v11374_v36  ;;  %v11377_v54 = vld [vmem:[#allocation96_spill] sm:$0xff] }
 0x37b   : > { %5128 = vmatpush2.msra.mxu1 %v11325_v32  ;;  %4855 = vmatprep.subr.mxu0 %v11327_v20  ;;  %v11378_v32 = vand.u32 4294901760, %v11377_v54  ;;  %v11380_v20 = vld [vmem:[#allocation109_spill] sm:$0xff] }
 0x37c   : > { %5130 = vmatprep.subr.mxu1 %v11328_v62  ;;  %4859 = vmatpush1.msra.mxu0 %v11330_v40  ;;  %v11381_v62 = vand.u32 4294901760, %v11380_v20  ;;  %v11383_v40 = vld [vmem:[#allocation101_spill] sm:$0xff] }
 0x37d   : > { %5132 = vmatpush2.msra.mxu1 %v11331_v33  ;;  %4863 = vmatprep.subr.mxu0 %v11333_v0  ;;  %v11384_v33 = vand.u32 4294901760, %v11383_v40  ;;  %v11386_v0 = vld [vmem:[#allocation114_spill] sm:$0xff] }
 0x37e   : > { %5134 = vmatprep.subr.mxu1 %v11334_v23  ;;  %4867 = vmatpush2.msra.mxu0 %v11336_v55  ;;  %v11387_v23 = vand.u32 4294901760, %v11386_v0  ;;  %v11389_v55 = vand.u32 4294901760, %v11232_v25 }
 0x37f   : > { %5136 = vmatpush2.msra.mxu1 %v11337_v52  ;;  %4871 = vmatprep.subr.mxu0 %v11339_v50  ;;  %v11390_v52 = vld [vmem:[#allocation137_spill] sm:$0xff]  ;;  %v11392_v50 = vand.u32 4294901760, %v11391_v17 }
 0x380   : > { %5138 = vmatprep.subr.mxu1 %v11340_v45  ;;  %4875 = vmatpush2.msra.mxu0 %v11342_v39  ;;  %v11393_v45 = vld [vmem:[#allocation143_spill] sm:$0xff]  ;;  %v11395_v39 = vand.u32 4294901760, %v11394_v21 }
 0x381   : > { %5140 = vmatpush2.msra.mxu1 %v11343_v8  ;;  %4879 = vmatprep.subr.mxu0 %v11345_v38  ;;  %v11396_v8 = vld [vmem:[#allocation111_spill] sm:$0xff]  ;;  %v11398_v38 = vld [vmem:[#allocation124_spill] sm:$0xff] }
 0x382   : > { %5142 = vmatprep.subr.mxu1 %v11346_v53  ;;  %4883 = vmatpush2.msra.mxu0 %v11348_v24  ;;  %v11397_v2 = vand.u32 4294901760, %v11396_v8  ;;  %v11399_v25 = vand.u32 4294901760, %v11398_v38  ;;  %v11400_v53 = vld [vmem:[#allocation118_spill] sm:$0xff]  ;;  %v11402_v24 = vld [vmem:[#allocation145_spill] sm:$0xff] }
 0x383   : > { %5144 = vmatpush2.msra.mxu1 %v11349_v59  ;;  %4887 = vmatprep.subr.mxu0 %v11351_v57  ;;  %v11401_v34 = vand.u32 4294901760, %v11400_v53  ;;  %v11403_v59 = vand.u32 4294901760, %v11245_v18  ;;  %v11407_v57 = vand.u32 4294901760, %v11249_v42  ;;  %v11411_v18 = vand.u32 4294901760, %v11253_v35  ;;  %v11414_v42 = vld [vmem:[#allocation11_spill] sm:$0xff]  ;;  %v11417_v35 = vld [vmem:[#allocation36_spill] sm:$0xff] }
 0x384   : > { %5146 = vmatprep.subr.mxu1 %v11352_v61  ;;  %4891 = vmatpush2.msra.mxu0 %v11354_v47  ;;  %v11409_v61 = vand.u32 4294901760, %v11251_v13  ;;  %v11412_v47 = vand.u32 4294901760, %v11254_v28  ;;  %v11416_v13 = vld [vmem:[#allocation15_spill] sm:$0xff] }
 0x385   : > { %5148 = vmatpush2.msra.mxu1 %v11355_v19  ;;  %4895 = vmatprep.subr.mxu0 %v11357_v63  ;;  %v11418_v28 = vld [vmem:[#allocation31_spill] sm:$0xff]  ;;  %v11419_v19 = vld [vmem:[#allocation25_spill] sm:$0xff]  ;;  %v11421_v63 = vld [vmem:[#allocation30_spill] sm:$0xff] }
 0x386   : > { %5150 = vmatprep.subr.mxu1 %v11358_v12  ;;  %4899 = vmatpush2.msra.mxu0 %v11360_v43  ;;  %v11422_v12 = vld [vmem:[#allocation18_spill] sm:$0xff] }
 0x387   : > { %5152 = vmatpush2.msra.mxu1 %v11361_v48  ;;  %4903 = vmatprep.subr.mxu0 %v11363_v30 }
 0x388   : > { %5154 = vmatprep.subr.mxu1 %v11364_v3  ;;  %4907 = vmatpush2.msra.mxu0 %v11366_v58  ;;  %v11424_v3 = vld [vmem:[#allocation136_spill] sm:$0xff] }
 0x389   : > { %5156 = vmatpush2.msra.mxu1 %v11367_v46  ;;  %4911 = vmatprep.subr.mxu0 %v11369_v6  ;;  %v3521_v22 = vrot.slane %v9298_v10, %v11424_v3 }
 0x38a   : > { %5158 = vmatprep.subr.mxu1 %v11370_v5  ;;  %4915 = vmatpush2.msra.mxu0 %v11372_v15 }
 0x38b   : > { %5160 = vmatpush2.msra.mxu1 %v11373_v56  ;;  %4919 = vmatprep.subr.mxu0 %v11375_v27 }
 0x38c   : > { %5162 = vmatprep.subr.mxu1 %v11376_v37  ;;  %4923 = vmatpush2.msra.mxu0 %v11378_v32 }
 0x38d   : > { %5164 = vmatpush2.msra.mxu1 %v11379_v4  ;;  %4927 = vmatprep.subr.mxu0 %v11381_v62 }
 0x38e   : > { %5166 = vmatprep.subr.mxu1 %v11382_v60  ;;  %4931 = vmatpush2.msra.mxu0 %v11384_v33 }
 0x38f   : > { %5168 = vmatpush2.msra.mxu1 %v11385_v31  ;;  %4935 = vmatprep.subr.mxu0 %v11387_v23 }
 0x390   : > { %5170 = vmatprep.subr.mxu1 %v11388_v44  ;;  %4939 = vmatpush2.msra.mxu0 %v11389_v55 }
 0x391   : > { %5172 = vmatpush2.msra.mxu1 %v11390_v52  ;;  %4943 = vmatprep.subr.mxu0 %v11392_v50 }
 0x392   : > { %5174 = vmatprep.subr.mxu1 %v11393_v45  ;;  %4947 = vmatpush2.msra.mxu0 %v11395_v39 }
 0x393   : > { %5176 = vmatpush2.msra.mxu1 %v11237_v9  ;;  %4951 = vmatprep.subr.mxu0 %v11397_v2  ;;  %v11405_v9 = vand.u32 4294901760, %v11247_v11  ;;  %v11415_v11 = vld [vmem:[#allocation29_spill] sm:$0xff] }
 0x394   : > { %5178 = vmatprep.subr.mxu1 %v11239_v1  ;;  %4955 = vmatpush2.msra.mxu0 %v11399_v25  ;;  %v11406_v1 = vand.u32 4294901760, %v11248_v26  ;;  %v11413_v26 = vld [vmem:[#allocation126_spill] sm:$0xff] }
 0x395   : > { %5180 = vmatpush2.msra.mxu1 %v11241_v41  ;;  %4959 = vmatprep.subr.mxu0 %v11401_v34  ;;  %v11408_v41 = vld [vmem:[#allocation28_spill] sm:$0xff] }
 0x396   : > { %5184 = vmatmul.mubr.f32.vlgmr.msra.gmra.mxu1 %v11402_v24  ;;  %4963 = vmatpush2.msra.mxu0 %v11403_v59 }
 0x397   : > { %5190 = vmatprep.mubr.f32.mxu1 %v11404_v7  ;;  %4967 = vmatprep.subr.mxu0 %v11405_v9 }
 0x398   : > { %4971 = vmatpush2.msra.mxu0 %v11406_v1 }
 0x399   : > { %4975 = vmatprep.subr.mxu0 %v11407_v57 }
 0x39a   : > { %5192 = vmatmul.mubr.f32.gmra.mxu1 %v11408_v41  ;;  %4979 = vmatpush2.msra.mxu0 %v11409_v61 }
 0x39b   : > { %5198 = vmatprep.mubr.f32.mxu1 %v11410_v29  ;;  %4983 = vmatprep.subr.mxu0 %v11411_v18 }
 0x39c   : > { %4987 = vmatpush2.msra.mxu0 %v11412_v47 }
 0x39d   : > { %4991 = vmatmul.mubr.f32.vlgmr.msra.gmra.mxu0 %v11402_v24 }
 0x39e   : > { %5200 = vmatmul.mubr.f32.gmra.mxu1 %v11413_v26  ;;  %4997 = vmatprep.mubr.f32.mxu0 %v11404_v7 }
 0x39f   : > { %5206 = vmatprep.mubr.f32.mxu1 %v11414_v42 }
 0x3a1   : > { %4999 = vmatmul.mubr.f32.gmra.mxu0 %v11408_v41 }
 0x3a2   : > { %5208 = vmatmul.mubr.f32.gmra.mxu1 %v11415_v11  ;;  %5005 = vmatprep.mubr.f32.mxu0 %v11410_v29 }
 0x3a3   : > { %5214 = vmatprep.mubr.f32.mxu1 %v11416_v13 }
 0x3a5   : > { %5007 = vmatmul.mubr.f32.gmra.mxu0 %v11413_v26 }
 0x3a6   : > { %5216 = vmatmul.mubr.f32.gmra.mxu1 %v11417_v35  ;;  %5013 = vmatprep.mubr.f32.mxu0 %v11414_v42 }
 0x3a7   : > { %5222 = vmatprep.mubr.f32.mxu1 %v11418_v28 }
 0x3a9   : > { %5015 = vmatmul.mubr.f32.gmra.mxu0 %v11415_v11 }
 0x3aa   : > { %5224 = vmatmul.mubr.f32.gmra.mxu1 %v11419_v19  ;;  %5021 = vmatprep.mubr.f32.mxu0 %v11416_v13 }
 0x3ab   : > { %5230 = vmatprep.mubr.f32.mxu1 %v11420_v16 }
 0x3ad   : > { %5023 = vmatmul.mubr.f32.gmra.mxu0 %v11417_v35 }
 0x3ae   : > { %5232 = vmatmul.mubr.f32.gmra.mxu1 %v11421_v63  ;;  %5029 = vmatprep.mubr.f32.mxu0 %v11418_v28 }
 0x3af   : > { %5238 = vmatprep.mubr.f32.mxu1 %v11422_v12 }
 0x3b1   : > { %5031 = vmatmul.mubr.f32.gmra.mxu0 %v11419_v19 }
 0x3b2   : > { %5240 = vmatmul.mubr.f32.gmra.mxu1 %v11423_v49  ;;  %5037 = vmatprep.mubr.f32.mxu0 %v11420_v16 }
 0x3b5   : > { %5039 = vmatmul.mubr.f32.gmra.mxu0 %v11421_v63 }
 0x3b6   : > { %5045 = vmatprep.mubr.f32.mxu0 %v11422_v12 }
 0x3b7   : > { %v4173_v43 = vpop.f32.mrf.mxu1 }
 0x3b9   : > { %5047 = vmatmul.mubr.f32.gmra.mxu0 %v11423_v49  ;;  %v9293_v48 = vpop.f32.mrf.mxu1 }
 0x3bd   : > { %v4181_v30 = vpop.f32.mrf.mxu1 }
 0x3bf   : > { %v9302_v58 = vpop.f32.mrf.mxu1 }
 0x3c1   : > { %v3668_v46 = vpop.f32.mrf.mxu0  ;;  %v4189_v6 = vpop.f32.mrf.mxu1 }
 0x3c2   : > { %v3669_v51 = vadd.f32 %v3668_v46, %v3521_v22 }
 0x3c3   : > { %v9304_v5 = vpop.f32.mrf.mxu0  ;;  %v9308_v15 = vpop.f32.mrf.mxu1 }
 0x3c4   : > { %v9306_v14 = vadd.f32 %v4173_v43, %v3669_v51 }
 0x3c6   : > { %v4197_v54 = vpop.f32.mrf.mxu1 }
 0x3c7   : > { %v3684_v56 = vpop.f32.mrf.mxu0 }
 0x3c8   : > { %v3685_v36 = vadd.f32 %v3684_v56, %v3521_v22  ;;  %v9314_v4 = vpop.f32.mrf.mxu1 }
 0x3c9   : > { %v9310_v27 = vpop.f32.mrf.mxu0 }
 0x3ca   : > { %v9312_v37 = vadd.f32 %v4181_v30, %v3685_v36 }
 0x3cc   : > { %v4205_v40 = vpop.f32.mrf.mxu1 }
 0x3ce   : > { %v3700_v32 = vpop.f32.mrf.mxu0  ;;  %v9322_v23 = vpop.f32.mrf.mxu1 }
 0x3cf   : > { %v3701_v20 = vadd.f32 %v3700_v32, %v3521_v22 }
 0x3d0   : > { %v9316_v62 = vpop.f32.mrf.mxu0 }
 0x3d1   : > { %v9318_v60 = vadd.f32 %v4189_v6, %v3701_v20 }
 0x3d2   : > { %v4213_v50 = vpop.f32.mrf.mxu1 }
 0x3d4   : > { %v3716_v33 = vpop.f32.mrf.mxu0  ;;  %v9330_v39 = vpop.f32.mrf.mxu1 }
 0x3d5   : > { %v3717_v31 = vadd.f32 %v3716_v33, %v3521_v22 }
 0x3d6   : > { %v9320_v0 = vpop.f32.mrf.mxu0 }
 0x3d7   : > { %v9324_v44 = vadd.f32 %v4197_v54, %v3717_v31  ;;  %v11433_v31 = vld [vmem:[#allocation138_spill] sm:$0xff] }
 0x3d8   : > { %v3732_v55 = vpop.f32.mrf.mxu0 }
 0x3d9   : > { %v3733_v52 = vadd.f32 %v3732_v55, %v3521_v22  ;;  %v4221_v25 = vpop.f32.mrf.mxu1  ;;  %v9388_v55 = vrot.slane %v9298_v10, %v11433_v31 }
 0x3da   : > { %v9326_v17 = vpop.f32.mrf.mxu0 }
 0x3db   : > { %v9328_v45 = vadd.f32 %v4205_v40, %v3733_v52  ;;  %v9338_v59 = vpop.f32.mrf.mxu1 }
 0x3de   : > { %v3748_v21 = vpop.f32.mrf.mxu0 }
 0x3df   : > { %v3749_v8 = vadd.f32 %v3748_v21, %v3521_v22  ;;  %v4229_v57 = vpop.f32.mrf.mxu1  ;;  %v3671_v21 = vadd.f32 %v9304_v5, %v9388_v55  ;;  %v3703_v5 = vadd.f32 %v9316_v62, %v9388_v55 }
 0x3e0   : > { %v9332_v2 = vpop.f32.mrf.mxu0 }
 0x3e1   : > { %v9334_v38 = vadd.f32 %v4213_v50, %v3749_v8  ;;  %v9344_v61 = vpop.f32.mrf.mxu1 }
 0x3e3   : > { %11425 = vst [vmem:[#allocation43_spill] sm:$0xff] %v9334_v38 }
 0x3e4   : > { %v3764_v53 = vpop.f32.mrf.mxu0 }
 0x3e5   : > { %v3765_v34 = vadd.f32 %v3764_v53, %v3521_v22 }
 0x3e6   : > { %v9336_v24 = vpop.f32.mrf.mxu0 }
 0x3e7   : > { %v9340_v7 = vadd.f32 %v4221_v25, %v3765_v34  ;;  %v3687_v34 = vadd.f32 %v9310_v27, %v9388_v55 }
 0x3e9   : > { %11426 = vst [vmem:[#allocation17_spill] sm:$0xff] %v9340_v7  ;;  %v3780_v9 = vpop.f32.mrf.mxu0 }
 0x3ea   : > { %v3781_v1 = vadd.f32 %v3780_v9, %v3521_v22  ;;  %v4176_v9 = vadd.f32 %v9293_v48, %v3671_v21  ;;  %v3719_v48 = vadd.f32 %v9320_v0, %v9388_v55 }
 0x3eb   : > { %v9348_v47 = vpop.f32.mrf.mxu0 }
 0x3ec   : > { %v9342_v41 = vadd.f32 %v4229_v57, %v3781_v1 }
 0x3ee   : > { %11427 = vst [vmem:[#allocation45_spill] sm:$0xff] %v9342_v41 }
 0x406   : > { %v9346_v29 = vpop.f32.mrf.mxu1 }
 0x408   : > { %v4645_v18 = vpop.f32.mrf.mxu1 }
 0x40b   : > { %v9352_v42 = vpop.f32.mrf.mxu1 }
 0x40d   : > { %v4657_v13 = vpop.f32.mrf.mxu1 }
 0x40f   : > { %v9350_v26 = vpop.f32.mrf.mxu0 }
 0x410   : > { %v9356_v28 = vpop.f32.mrf.mxu1 }
 0x411   : > { %v4434_v11 = vpop.f32.mrf.mxu0 }
 0x412   : > { %v4669_v16 = vpop.f32.mrf.mxu1  ;;  %v4435_v1 = vadd.f32 %v4434_v11, %v4176_v9  ;;  %v4192_v11 = vadd.f32 %v9308_v15, %v3703_v5 }
 0x414   : > { %v4646_v27 = vadd.f32 %v4645_v18, %v4435_v1  ;;  %v4200_v18 = vadd.f32 %v9314_v4, %v3719_v48 }
 0x415   : > { %v9354_v35 = vpop.f32.mrf.mxu0 }
 0x416   : > { %v9360_v12 = vpop.f32.mrf.mxu1 }
 0x417   : > { %v4444_v19 = vpop.f32.mrf.mxu0 }
 0x418   : > { %v9362_v43 = vpop.f32.mrf.mxu1 }
 0x41b   : > { %v9358_v63 = vpop.f32.mrf.mxu0 }
 0x41c   : > { %v9366_v3 = vpop.f32.mrf.mxu1 }
 0x41d   : > { %v4454_v49 = vpop.f32.mrf.mxu0  ;;  %11428 = vst [vmem:[#allocation32_spill] sm:$0xff] %v9366_v3 }
 0x41e   : > { %v9368_v46 = vpop.f32.mrf.mxu1  ;;  %v4455_v62 = vadd.f32 %v4454_v49, %v4192_v11 }
 0x420   : > { %v4670_v49 = vadd.f32 %v4669_v16, %v4455_v62 }
 0x421   : > { %v9364_v30 = vpop.f32.mrf.mxu0 }
 0x422   : > { %v9372_v6 = vpop.f32.mrf.mxu1 }
 0x423   : > { %v4464_v22 = vpop.f32.mrf.mxu0  ;;  %11429 = vst [vmem:[#allocation49_spill] sm:$0xff] %v9372_v6 }
 0x424   : > { %v9374_v36 = vpop.f32.mrf.mxu1  ;;  %v4465_v15 = vadd.f32 %v4464_v22, %v4200_v18 }
 0x427   : > { %v9370_v51 = vpop.f32.mrf.mxu0 }
 0x428   : > { %v9378_v32 = vpop.f32.mrf.mxu1 }
 0x429   : > { %v4474_v56 = vpop.f32.mrf.mxu0  ;;  %11431 = vst [vmem:[#allocation22_spill] sm:$0xff] %v9378_v32 }
 0x42a   : > { %v9382_v40 = vpop.f32.mrf.mxu1 }
 0x42d   : > { %v9376_v54 = vpop.f32.mrf.mxu0 }
 0x42e   : > { %11430 = vst [vmem:[#allocation8_spill] sm:$0xff] %v9376_v54  ;;  %v9390_v52 = vpop.f32.mrf.mxu1 }
 0x42f   : > { %v9380_v20 = vpop.f32.mrf.mxu0  ;;  %11434 = vst [vmem:[#allocation73_spill] sm:$0xff] %v9390_v52  ;;  %v4184_v52 = vadd.f32 %v9302_v58, %v3687_v34 }
 0x430   : > { %v9396_v8 = vpop.f32.mrf.mxu1 }
 0x433   : > { %v9384_v33 = vpop.f32.mrf.mxu0 }
 0x434   : > { %11432 = vst [vmem:[#allocation38_spill] sm:$0xff] %v9384_v33 }
 0x435   : > { %v9392_v50 = vpop.f32.mrf.mxu0 }
 0x438   : > { %v9400_v53 = vpop.f32.mrf.mxu0 }
 0x439   : > { %11435 = vst [vmem:[#allocation39_spill] sm:$0xff] %v9400_v53  ;;  %v4445_v53 = vadd.f32 %v4444_v19, %v4184_v52  ;;  %v3735_v19 = vadd.f32 %v9326_v17, %v9388_v55  ;;  %v3751_v17 = vadd.f32 %v9332_v2, %v9388_v55 }
 0x43a   : > { %v9407_v31 = vpop.f32.mrf.mxu0 }
 0x43b   : > { %v4658_v34 = vadd.f32 %v4657_v13, %v4445_v53 }
 0x456   : > { %v9398_v25 = vpop.f32.mrf.mxu1 }
 0x458   : > { %v5187_v10 = vpop.f32.mrf.mxu1 }
 0x45a   : > { %v9405_v57 = vpop.f32.mrf.mxu1 }
 0x45c   : > { %v5195_v32 = vpop.f32.mrf.mxu1 }
 0x45d   : > { %v9412_v41 = vpop.f32.mrf.mxu0 }
 0x45e   : > { %v9414_v6 = vpop.f32.mrf.mxu1 }
 0x45f   : > { %v4994_v33 = vpop.f32.mrf.mxu0 }
 0x460   : > { %v4995_v21 = vadd.f32 %v4994_v33, %v4646_v27  ;;  %v5203_v9 = vpop.f32.mrf.mxu1 }
 0x461   : > { %v9419_v7 = vpop.f32.mrf.mxu0 }
 0x462   : > { %v5188_v3 = vadd.f32 %v5187_v10, %v4995_v21  ;;  %v9421_v58 = vpop.f32.mrf.mxu1  ;;  %v4208_v10 = vadd.f32 %v9322_v23, %v3735_v19  ;;  %v3767_v23 = vadd.f32 %v9336_v24, %v9388_v55  ;;  %v3783_v24 = vadd.f32 %v9348_v47, %v9388_v55 }
 0x463   : > { %v5002_v52 = vpop.f32.mrf.mxu0  ;;  %v4433_v55 = vadd.f32 %v9350_v26, %v9306_v14 }
 0x464   : > { %v5246_v1 = vsub.f32 0.0, %v5188_v3  ;;  %v5003_v54 = vadd.f32 %v5002_v52, %v4658_v34  ;;  %v5211_v0 = vpop.f32.mrf.mxu1  ;;  %v4475_v11 = vadd.f32 %v4474_v56, %v4208_v10 }
 0x465   : > { %v9426_v38 = vpop.f32.mrf.mxu0  ;;  %v4644_v14 = vadd.f32 %v9346_v29, %v4433_v55 }
 0x466   : > { %v5254_v33 = vmul.f32 1.442695, %v5246_v1  ;;  %v5196_v5 = vadd.f32 %v5195_v32, %v5003_v54  ;;  %v9428_v27 = vpop.f32.mrf.mxu1  ;;  %v4682_v54 = vadd.f32 %v9362_v43, %v4465_v15  ;;  %v4216_v32 = vadd.f32 %v9330_v39, %v3751_v17 }
 0x467   : > { %v5010_v13 = vpop.f32.mrf.mxu0  ;;  %v4694_v1 = vadd.f32 %v9368_v46, %v4475_v11  ;;  %v4224_v43 = vadd.f32 %v9338_v59, %v3767_v23  ;;  %v4232_v59 = vadd.f32 %v9344_v61, %v3783_v24 }
 0x468   : > { %5451 = vpow2.f32 %v5254_v33  ;;  %v5247_v53 = vsub.f32 0.0, %v5196_v5  ;;  %v5011_v4 = vadd.f32 %v5010_v13, %v4670_v49  ;;  %v5219_v3 = vpop.f32.mrf.mxu1  ;;  %v4485_v56 = vadd.f32 %v9380_v20, %v4216_v32 }
 0x469   : > { %v9433_v48 = vpop.f32.mrf.mxu0  ;;  %v4495_v5 = vadd.f32 %v9392_v50, %v4224_v43  ;;  %v4443_v32 = vadd.f32 %v9354_v35, %v9312_v37  ;;  %v4453_v35 = vadd.f32 %v9358_v63, %v9318_v60  ;;  %v5483_v63 = vld [vmem:[%s6055_s20] sm:$0xff] }
 0x46a   : > { %v5256_v21 = vmul.f32 1.442695, %v5247_v53  ;;  %v5204_v22 = vadd.f32 %v5203_v9, %v5011_v4  ;;  %v9435_v34 = vpop.f32.mrf.mxu1 }
 0x46b   : > { %v5018_v16 = vpop.f32.mrf.mxu0  ;;  %v4718_v11 = vadd.f32 %v9382_v40, %v4495_v5  ;;  %v4656_v37 = vadd.f32 %v9352_v42, %v4443_v32  ;;  %v4463_v42 = vadd.f32 %v9364_v30, %v9324_v44  ;;  %v4473_v44 = vadd.f32 %v9370_v51, %v9328_v45  ;;  %v5484_v30 = vld [vmem:[%s6055_s20 + $0x8] sm:$0xff] }
 0x46c   : > { %5453 = vpow2.f32 %v5256_v21  ;;  %v5248_v2 = vsub.f32 0.0, %v5204_v22  ;;  %v5019_v62 = vadd.f32 %v5018_v16, %v4682_v54  ;;  %v5227_v19 = vpop.f32.mrf.mxu1  ;;  %v4505_v21 = vadd.f32 %v9407_v31, %v4232_v59 }
 0x46d   : > { %v9441_v52 = vpop.f32.mrf.mxu0 }
 0x46e   : > { %v5258_v18 = vmul.f32 1.442695, %v5248_v2  ;;  %v5212_v9 = vadd.f32 %v5211_v0, %v5019_v62  ;;  %v9449_v49 = vpop.f32.mrf.mxu1  ;;  %v4706_v0 = vadd.f32 %v9374_v36, %v4485_v56 }
 0x46f   : > { %v5026_v15 = vpop.f32.mrf.mxu0 }
 0x470   : > { %5455 = vpow2.f32 %v5258_v18  ;;  %v5249_v39 = vsub.f32 0.0, %v5212_v9  ;;  %v5027_v33 = vadd.f32 %v5026_v15, %v4694_v1  ;;  %v5235_v4 = vpop.f32.mrf.mxu1  ;;  %v4993_v18 = vadd.f32 %v9412_v41, %v4644_v14 }
 0x471   : > { %v9451_v10 = vpop.f32.mrf.mxu0 }
 0x472   : > { %v5260_v20 = vmul.f32 1.442695, %v5249_v39  ;;  %v5220_v13 = vadd.f32 %v5219_v3, %v5027_v33  ;;  %v9464_v26 = vpop.f32.mrf.mxu1  ;;  %v5001_v33 = vadd.f32 %v9419_v7, %v4656_v37 }
 0x473   : > { %v5034_v46 = vpop.f32.mrf.mxu0 }
 0x474   : > { %5457 = vpow2.f32 %v5260_v20  ;;  %v5250_v17 = vsub.f32 0.0, %v5220_v13  ;;  %v5035_v53 = vadd.f32 %v5034_v46, %v4706_v0  ;;  %v5243_v29 = vpop.f32.mrf.mxu1  ;;  %v4668_v20 = vadd.f32 %v9356_v28, %v4453_v35 }
 0x475   : > { %v5452_v47 = vpop.eup %5451  ;;  %v9457_v50 = vpop.f32.mrf.mxu0  ;;  %v5194_v46 = vadd.f32 %v9405_v57, %v5001_v33 }
 0x476   : > { %v5270_v3 = vadd.f32 1.0, %v5452_v47  ;;  %v5262_v22 = vmul.f32 1.442695, %v5250_v17  ;;  %v5228_v36 = vadd.f32 %v5227_v19, %v5035_v53  ;;  %v4730_v19 = vadd.f32 %v9396_v8, %v4505_v21  ;;  %v11436_v21 = vld [vmem:[#allocation43_spill] sm:$0xff] }
 0x477   : > { %v5042_v54 = vpop.f32.mrf.mxu0  ;;  %v5186_v8 = vadd.f32 %v9398_v25, %v4993_v18  ;;  %v5009_v25 = vadd.f32 %v9426_v38, %v4668_v20  ;;  %v4680_v53 = vadd.f32 %v9360_v12, %v4463_v42  ;;  %v5295_v57 = vsub.f32 %v5484_v30, %v5194_v46  ;;  %v5487_v42 = vld [vmem:[%s6055_s20 + $0x20] sm:$0xff] }
 0x478   : > { %5459 = vrcp.f32 %v5270_v3  ;;  %v5251_v61 = vsub.f32 0.0, %v5228_v36  ;;  %v5043_v23 = vadd.f32 %v5042_v54, %v4718_v11  ;;  %v11437_v3 = vld [vmem:[#allocation8_spill] sm:$0xff] }
 0x479   : > { %v5454_v16 = vpop.eup %5453  ;;  %5461 = vpow2.f32 %v5262_v22  ;;  %v9466_v2 = vpop.f32.mrf.mxu0  ;;  %v5294_v0 = vsub.f32 %v5483_v63, %v5186_v8  ;;  %v5202_v47 = vadd.f32 %v9414_v6, %v5009_v25  ;;  %v5017_v55 = vadd.f32 %v9433_v48, %v4680_v53  ;;  %v11438_v36 = vld [vmem:[#allocation32_spill] sm:$0xff]  ;;  %v11445_v63 = vld [vmem:[#allocation73_spill] sm:$0xff] }
 0x47a   : > { %v5271_v40 = vadd.f32 1.0, %v5454_v16  ;;  %v5264_v31 = vmul.f32 1.442695, %v5251_v61  ;;  %v5236_v62 = vadd.f32 %v5235_v4, %v5043_v23  ;;  %v4483_v22 = vadd.f32 %v11437_v3, %v11436_v21  ;;  %v5485_v61 = vld [vmem:[%s6055_s20 + $0x10] sm:$0xff]  ;;  %v5488_v25 = vld [vmem:[%s6055_s20 + $0x28] sm:$0xff] }
 0x47b   : > { %v5050_v56 = vpop.f32.mrf.mxu0  ;;  %v4692_v45 = vadd.f32 %v11438_v36, %v4473_v44  ;;  %v5296_v23 = vsub.f32 %v5485_v61, %v5202_v47  ;;  %v5210_v6 = vadd.f32 %v9421_v58, %v5017_v55  ;;  %v5489_v44 = vld [vmem:[%s6055_s20 + $0x30] sm:$0xff]  ;;  %v5490_v55 = vld [vmem:[%s6055_s20 + $0x38] sm:$0xff] }
 0x47c   : > { %5463 = vrcp.f32 %v5271_v40  ;;  %v5252_v9 = vsub.f32 0.0, %v5236_v62  ;;  %v5051_v1 = vadd.f32 %v5050_v56, %v4730_v19  ;;  %v11439_v40 = vld [vmem:[#allocation17_spill] sm:$0xff] }
 0x47d   : > { %v5456_v43 = vpop.eup %5455  ;;  %5465 = vpow2.f32 %v5264_v31  ;;  %v5025_v48 = vadd.f32 %v9441_v52, %v4692_v45  ;;  %v11440_v31 = vld [vmem:[#allocation38_spill] sm:$0xff]  ;;  %v11441_v19 = vld [vmem:[#allocation49_spill] sm:$0xff] }
 0x47e   : > { %v5272_v15 = vadd.f32 1.0, %v5456_v43  ;;  %v5266_v24 = vmul.f32 1.442695, %v5252_v9  ;;  %v5244_v39 = vadd.f32 %v5243_v29, %v5051_v1  ;;  %v4493_v62 = vadd.f32 %v11440_v31, %v11439_v40  ;;  %v5486_v1 = vld [vmem:[%s6055_s20 + $0x18] sm:$0xff] }
 0x47f   : > { %v4704_v56 = vadd.f32 %v11441_v19, %v4483_v22  ;;  %v5297_v43 = vsub.f32 %v5486_v1, %v5210_v6  ;;  %v5218_v58 = vadd.f32 %v9428_v27, %v5025_v48 }
 0x480   : > { %5467 = vrcp.f32 %v5272_v15  ;;  %v5253_v41 = vsub.f32 0.0, %v5244_v39  ;;  %v11442_v15 = vld [vmem:[#allocation45_spill] sm:$0xff] }
 0x481   : > { %v5458_v5 = vpop.eup %5457  ;;  %5469 = vpow2.f32 %v5266_v24  ;;  %v5033_v52 = vadd.f32 %v9451_v10, %v4704_v56  ;;  %v11443_v24 = vld [vmem:[#allocation39_spill] sm:$0xff]  ;;  %v5298_v20 = vsub.f32 %v5487_v42, %v5218_v58 }
 0x482   : > { %v5273_v13 = vadd.f32 1.0, %v5458_v5  ;;  %v5268_v60 = vmul.f32 1.442695, %v5253_v41  ;;  %v4503_v39 = vadd.f32 %v11443_v24, %v11442_v15 }
 0x483   : > { %v5226_v27 = vadd.f32 %v9435_v34, %v5033_v52 }
 0x484   : > { %5471 = vrcp.f32 %v5273_v13 }
 0x485   : > { %v5460_v7 = vpop.eup %5459  ;;  %5473 = vpow2.f32 %v5268_v60 }
 0x486   : > { %v5462_v59 = vpop.eup %5461  ;;  %v5302_v17 = vmul.f32 %v5460_v7, %v5294_v0  ;;  %v4728_v0 = vadd.f32 %v11445_v63, %v4503_v39  ;;  %v5299_v7 = vsub.f32 %v5488_v25, %v5226_v27 }
 0x487   : > { %v5274_v28 = vadd.f32 1.0, %v5462_v59 }
 0x488   : > { %v5310_v38 = vadd.f32 %v5302_v17, %v5186_v8  ;;  %v11444_v8 = vld [vmem:[#allocation22_spill] sm:$0xff]  ;;  %v5049_v17 = vadd.f32 %v9466_v2, %v4728_v0 }
 0x489   : > { %v5464_v12 = vpop.eup %5463  ;;  %5475 = vrcp.f32 %v5274_v28  ;;  %v4716_v33 = vadd.f32 %v11444_v8, %v4493_v62 }
 0x48a   : > { %v5466_v4 = vpop.eup %5465  ;;  %5318 = vst [vmem:[%s9487_s10] sm:$0xff] %v5310_v38  ;;  %v5303_v11 = vmul.f32 %v5464_v12, %v5295_v57  ;;  %v5242_v38 = vadd.f32 %v9464_v26, %v5049_v17 }
 0x48b   : > { %v5275_v51 = vadd.f32 1.0, %v5466_v4  ;;  %v5041_v10 = vadd.f32 %v9457_v50, %v4716_v33 }
 0x48c   : > { %v5311_v54 = vadd.f32 %v5303_v11, %v5194_v46  ;;  %v5301_v12 = vsub.f32 %v5490_v55, %v5242_v38 }
 0x48d   : > { %v5468_v16 = vpop.eup %5467  ;;  %5477 = vrcp.f32 %v5275_v51  ;;  %v5234_v59 = vadd.f32 %v9449_v49, %v5041_v10 }
 0x48e   : > { %v5470_v32 = vpop.eup %5469  ;;  %5319 = vst [vmem:[%s9487_s10 + $0x8] sm:$0xff] %v5311_v54  ;;  %v5304_v14 = vmul.f32 %v5468_v16, %v5296_v23 }
 0x48f   : > { %v5276_v18 = vadd.f32 1.0, %v5470_v32  ;;  %v5300_v28 = vsub.f32 %v5489_v44, %v5234_v59 }
 0x490   : > { %v5312_v9 = vadd.f32 %v5304_v14, %v5202_v47 }
 0x491   : > { %v5472_v37 = vpop.eup %5471  ;;  %5479 = vrcp.f32 %v5276_v18 }
 0x492   : > { %v5474_v29 = vpop.eup %5473  ;;  %5320 = vst [vmem:[%s9487_s10 + $0x10] sm:$0xff] %v5312_v9  ;;  %v5305_v35 = vmul.f32 %v5472_v37, %v5297_v43 }
 0x493   : > { %v5277_v41 = vadd.f32 1.0, %v5474_v29 }
 0x494   : > { %v5313_v5 = vadd.f32 %v5305_v35, %v5210_v6 }
 0x495   : > { %5481 = vrcp.f32 %v5277_v41 }
 0x496   : > { %v5476_v13 = vpop.eup %5475  ;;  %5321 = vst [vmem:[%s9487_s10 + $0x18] sm:$0xff] %v5313_v5 }
 0x497   : > { %v5306_v60 = vmul.f32 %v5476_v13, %v5298_v20 }
 0x499   : > { %v5314_v46 = vadd.f32 %v5306_v60, %v5218_v58 }
 0x49a   : > { %v5478_v34 = vpop.eup %5477 }
 0x49b   : > { %5322 = vst [vmem:[%s9487_s10 + $0x20] sm:$0xff] %v5314_v46  ;;  %v5307_v50 = vmul.f32 %v5478_v34, %v5299_v7 }
 0x49d   : > { %v5315_v53 = vadd.f32 %v5307_v50, %v5226_v27 }
 0x49e   : > { %v5480_v30 = vpop.eup %5479 }
 0x49f   : > { %5323 = vst [vmem:[%s9487_s10 + $0x28] sm:$0xff] %v5315_v53  ;;  %v5308_v57 = vmul.f32 %v5480_v30, %v5300_v28 }
 0x4a1   : > { %v5316_v47 = vadd.f32 %v5308_v57, %v5234_v59 }
 0x4a2   : > { %v5482_v4 = vpop.eup %5481 }
 0x4a3   : > { %5324 = vst [vmem:[%s9487_s10 + $0x30] sm:$0xff] %v5316_v47  ;;  %v5309_v49 = vmul.f32 %v5482_v4, %v5301_v12 }
 0x4a5   : > { %v5317_v11 = vadd.f32 %v5309_v49, %v5242_v38 }
 0x4a7   : > { %5325 = vst [vmem:[%s9487_s10 + $0x38] sm:$0xff] %v5317_v11 }
 0x4a8 PF: > { %s19_s24 = sadd.s32 1, %s5557_s24  }
 0x4a9   : > { %p16_p3 = scmp.ge.s32.totalorder %s19_s24, 4  }
 0x4ab   :  { %18 = sbr.rel (!%p16_p3) target bundleno = 2 (0x2), region = 87 }
 0x4b0   :  { %5348 = vsyncpa [#allocation3], 1 }
 0x4b1   :  { %5350 = vsyncpa [#allocation3 + $0x1], 1 }
 0x4b2   :  { %5351 = vsyncpa [#allocation5], 1 }

</bundles_post_ra>
